<compile_context>
chip_gen: v7x
topology: tpu7x:2x2x1
jax: 0.10.0
libtpu: 0.0.40
codegen_flags: <defaults>
</compile_context>

<pallas_src>
import jax
import jax.numpy as jnp
from jax import lax
from jax.experimental import pallas as pl
from jax.experimental.pallas import tpu as pltpu

NC_PAD = 128  # lane-dense width for the classifier output


def _sigmoid(v):
    # tanh-based sigmoid: lowers cleanly to the EUP; used identically in kernel
    # and reference.
    return 0.5 * (jnp.tanh(0.5 * v) + 1.0)


def make_rnn_kernel(n_layer, seq_len, hidden, unroll):
    H = hidden
    T = seq_len

    def kernel(*refs):
        x_ref = refs[0]                                # (tb, T, in_dim)  f32
        layer_refs = refs[1:1 + 3 * n_layer]           # (wih bf16, whh bf16, b f32) per layer
        wc_ref = refs[1 + 3 * n_layer]                 # (H, NC_PAD) bf16
        bc_ref = refs[2 + 3 * n_layer]                 # (1, NC_PAD) f32
        o_ref = refs[3 + 3 * n_layer]                  # (tb, NC_PAD) f32
        xg_scr = refs[4 + 3 * n_layer]                 # (T, tb, 4H) f32 scratch
        seq_scr = refs[5 + 3 * n_layer]                # (T, tb, H)  bf16 scratch

        tb = o_ref.shape[0]

        h_last = None
        for l in range(n_layer):
            wih_ref, whh_ref, b_ref = layer_refs[3 * l:3 * l + 3]
            whh = whh_ref[...]          # (H, 4H) bf16, loop-invariant
            b = b_ref[...]              # (1, 4H) f32

            # ---- hoisted input projection: one matmul with M = T*tb ----
            if l == 0:
                x = x_ref[...]                                       # (tb, T, in)
                xg = jnp.dot(x.reshape(tb * T, -1).astype(jnp.bfloat16),
                             wih_ref[...],
                             preferred_element_type=jnp.float32)     # (tb*T, 4H)
                xg = jnp.transpose(xg.reshape(tb, T, 4 * H), (1, 0, 2))
            else:
                s = seq_scr[...]                                     # (T, tb, H) bf16
                xg = jnp.dot(s.reshape(T * tb, H), wih_ref[...],
                             preferred_element_type=jnp.float32)
                xg = xg.reshape(T, tb, 4 * H)                        # already time-major
            xg_scr[...] = xg + b                                     # bias folded in

            write_seq = l < n_layer - 1

            def step(t, carry):
                h, c = carry
                gates = xg_scr[t] + jnp.dot(h.astype(jnp.bfloat16), whh,
                                            preferred_element_type=jnp.float32)
                # gate order permuted offline to (i, f, o, g):
                sig = _sigmoid(gates[:, :3 * H])                     # one EUP slab
                i_g = sig[:, 0 * H:1 * H]
                f_g = sig[:, 1 * H:2 * H]
                o_g = sig[:, 2 * H:3 * H]
                g_g = jnp.tanh(gates[:, 3 * H:])
                c_new = f_g * c + i_g * g_g
                h_new = o_g * jnp.tanh(c_new)
                if write_seq:
                    seq_scr[t] = h_new.astype(jnp.bfloat16)
                return h_new, c_new

            init = (jnp.zeros((tb, H), jnp.float32),
                    jnp.zeros((tb, H), jnp.float32))
            h_last, _ = lax.fori_loop(0, T, step, init, unroll=unroll)

        logits = (jnp.dot(h_last.astype(jnp.bfloat16), wc_ref[...],
                          preferred_element_type=jnp.float32) + bc_ref[...])
        o_ref[...] = logits.astype(o_ref.dtype)

    return kernel


def _permute_gates(w, H):
    """PyTorch LSTM column order (i, f, g, o) -> kernel order (i, f, o, g)."""
    return jnp.concatenate([w[:, :2 * H], w[:, 3 * H:4 * H], w[:, 2 * H:3 * H]],
                           axis=1)


def rnn_forward(x, layer_params, wc_pad, bc_pad, *, n_class, block_b=None):
    """x: (B, T, in_dim) f32 (batch_first, like the PyTorch module).

    layer_params: flat [wih_0, whh_0, b_0, ...] in PyTorch gate order (i,f,g,o),
      wih_l: (in_feat_l, 4H), whh_l: (H, 4H), b_l: (1, 4H) (= b_ih + b_hh).
    wc_pad: (H, NC_PAD) zero-padded classifier weight; bc_pad: (1, NC_PAD).
    Returns logits of shape (B, n_class).
    """
    B, T, in_dim = x.shape
    H = wc_pad.shape[0]
    n_layer = len(layer_params) // 3

    if block_b is None:
        # >=2 parallel grid steps when possible (v7x: both TensorCores) while
        # keeping a real M for the recurrent matmul.
        if B >= 16 and (B // 2) % 8 == 0:
            block_b = min(B // 2, 128)
        else:
            block_b = min(B, 128)
    assert B % block_b == 0, "batch must be divisible by the batch tile"
    assert block_b == B or block_b % 8 == 0

    # Permute gate columns to (i, f, o, g) and cast matmul weights to bf16.
    kparams = []
    for l in range(n_layer):
        wih, whh, b = layer_params[3 * l:3 * l + 3]
        kparams.append(_permute_gates(wih, H).astype(jnp.bfloat16))
        kparams.append(_permute_gates(whh, H).astype(jnp.bfloat16))
        kparams.append(_permute_gates(b, H).astype(jnp.float32))
    wc_k = wc_pad.astype(jnp.bfloat16)
    bc_k = bc_pad.astype(jnp.float32)

    # Weights: constant index_map, fetched once -> single-buffer them.
    weight_specs = [pl.BlockSpec(p.shape, lambda i: (0, 0),
                                 pipeline_mode=pl.Buffered(1))
                    for p in (*kparams, wc_k, bc_k)]
    in_specs = ([pl.BlockSpec((block_b, T, in_dim), lambda i: (i, 0, 0))]
                + weight_specs)
    out_specs = pl.BlockSpec((block_b, NC_PAD), lambda i: (i, 0))

    scratch_shapes = [pltpu.VMEM((T, block_b, 4 * H), jnp.float32),   # x-gates
                      pltpu.VMEM((T, block_b, H), jnp.bfloat16)]      # layer seq

    # Advisory cost estimate so XLA doesn't schedule the call as zero-cost.
    flops = 0
    feat = in_dim
    for _ in range(n_layer):
        flops += 2 * B * T * (feat * 4 * H + H * 4 * H)
        feat = H
    flops += 2 * B * H * NC_PAD
    bytes_accessed = int(4 * x.size + 4 * B * NC_PAD
                         + sum(int(p.size) * p.dtype.itemsize
                               for p in (*kparams, wc_k, bc_k)))
    cost = pl.CostEstimate(flops=flops,
                           transcendentals=5 * B * T * n_layer * H,
                           bytes_accessed=bytes_accessed)

    # VMEM budget: x tile (double-buffered) + weights + output + scratch.
    vmem_bytes = (2 * block_b * T * in_dim * 4
                  + sum(int(p.size) * p.dtype.itemsize
                        for p in (*kparams, wc_k, bc_k))
                  + 2 * block_b * NC_PAD * 4
                  + T * block_b * 4 * H * 4 + T * block_b * H * 2)
    vmem_limit = int(min(max(2 * vmem_bytes, 32 * 1024 * 1024),
                         60 * 1024 * 1024))  # stay under v7x's 64 MiB physical

    unroll = True if T <= 8 else 4

    out_pad = pl.pallas_call(
        make_rnn_kernel(n_layer, T, H, unroll),
        out_shape=jax.ShapeDtypeStruct((B, NC_PAD), jnp.float32),
        grid=(B // block_b,),
        in_specs=in_specs,
        out_specs=out_specs,
        scratch_shapes=scratch_shapes,
        compiler_params=pltpu.CompilerParams(
            dimension_semantics=("parallel",),
            vmem_limit_bytes=vmem_limit),
        cost_estimate=cost,
    )(x, *kparams, wc_k, bc_k)
    return out_pad[:, :n_class]


def init_params(key, in_dim, hidden, n_layer, n_class):
    """nn.LSTM / nn.Linear style uniform(-1/sqrt(H), 1/sqrt(H)) init.

    Returned in PyTorch gate order (i, f, g, o); the wrapper permutes/casts.
    """
    params = []
    bound = 1.0 / (hidden ** 0.5)
    feat = in_dim
    for _ in range(n_layer):
        key, k1, k2, k3, k4 = jax.random.split(key, 5)
        wih = jax.random.uniform(k1, (feat, 4 * hidden), jnp.float32, -bound, bound)
        whh = jax.random.uniform(k2, (hidden, 4 * hidden), jnp.float32, -bound, bound)
        b_ih = jax.random.uniform(k3, (1, 4 * hidden), jnp.float32, -bound, bound)
        b_hh = jax.random.uniform(k4, (1, 4 * hidden), jnp.float32, -bound, bound)
        params.extend([wih, whh, b_ih + b_hh])
        feat = hidden
    key, kw, kb = jax.random.split(key, 3)
    wc = jax.random.uniform(kw, (hidden, n_class), jnp.float32, -bound, bound)
    bc = jax.random.uniform(kb, (1, n_class), jnp.float32, -bound, bound)
    wc_pad = jnp.zeros((hidden, NC_PAD), jnp.float32).at[:, :n_class].set(wc)
    bc_pad = jnp.zeros((1, NC_PAD), jnp.float32).at[:, :n_class].set(bc)
    return params, wc_pad, bc_pad


def rnn_reference(x, layer_params, wc_pad, bc_pad, n_class, hidden):
    """Plain-JAX f32 LSTM reference (PyTorch semantics, gate order i,f,g,o)."""
    H = hidden
    B, T, _ = x.shape
    n_layer = len(layer_params) // 3
    hp = jax.lax.Precision.HIGHEST
    seq = x
    for l in range(n_layer):
        wih, whh, b = layer_params[3 * l:3 * l + 3]
        h = jnp.zeros((B, H), jnp.float32)
        c = jnp.zeros((B, H), jnp.float32)
        outs = []
        for t in range(T):
            gates = (jnp.dot(seq[:, t, :], wih, precision=hp)
                     + jnp.dot(h, whh, precision=hp) + b)
            i_g = _sigmoid(gates[:, 0 * H:1 * H])
            f_g = _sigmoid(gates[:, 1 * H:2 * H])
            g_g = jnp.tanh(gates[:, 2 * H:3 * H])
            o_g = _sigmoid(gates[:, 3 * H:4 * H])
            c = f_g * c + i_g * g_g
            h = o_g * jnp.tanh(c)
            outs.append(h)
        seq = jnp.stack(outs, axis=1)
    return (jnp.dot(seq[:, -1, :], wc_pad[:, :n_class], precision=hp)
            + bc_pad[:, :n_class])


if __name__ == "__main__":
    IN_DIM, HIDDEN, N_LAYER, N_CLASS = 28, 128, 2, 10
    B, T = 16, 8

    key = jax.random.PRNGKey(0)
    key, kx = jax.random.split(key)
    x = jax.random.normal(kx, (B, T, IN_DIM), jnp.float32)
    layer_params, wc_pad, bc_pad = init_params(key, IN_DIM, HIDDEN, N_LAYER, N_CLASS)

    out = rnn_forward(x, layer_params, wc_pad, bc_pad, n_class=N_CLASS)
    out = jax.block_until_ready(out)

    ref = rnn_reference(x, layer_params, wc_pad, bc_pad, N_CLASS, HIDDEN)
    assert out.shape == (B, N_CLASS), out.shape
    # bf16 MXU operands (f32 accumulation) -> looser tolerance than pure f32.
    assert jnp.allclose(out, ref, atol=3e-2, rtol=3e-2), (
        "mismatch vs reference, max abs diff = %g"
        % float(jnp.max(jnp.abs(out - ref))))
    print("KERNEL_OK")
</pallas_src>

<mosaic_0001>
module attributes {stable_mosaic.version = 11 : i64} {
  func.func @kernel(%arg0: i32, %arg1: memref<8x8x28xf32, #tpu.memory_space<vmem>>, %arg2: memref<28x512xbf16, #tpu.memory_space<vmem>>, %arg3: memref<128x512xbf16, #tpu.memory_space<vmem>>, %arg4: memref<1x512xf32, #tpu.memory_space<vmem>>, %arg5: memref<128x512xbf16, #tpu.memory_space<vmem>>, %arg6: memref<128x512xbf16, #tpu.memory_space<vmem>>, %arg7: memref<1x512xf32, #tpu.memory_space<vmem>>, %arg8: memref<128x128xbf16, #tpu.memory_space<vmem>>, %arg9: memref<1x128xf32, #tpu.memory_space<vmem>>, %arg10: memref<8x128xf32, #tpu.memory_space<vmem>>, %arg11: memref<8x8x512xf32, #tpu.memory_space<vmem>>, %arg12: memref<8x8x128xbf16, #tpu.memory_space<vmem>>) attributes {dimension_semantics = [#tpu.dimension_semantics<parallel>], iteration_bounds = array<i64: 2>, scalar_prefetch = 0 : i64, scratch_operands = 2 : i64, tpu.core_type = #tpu.core_type<tc>, window_params = [{transform_indices = @transform_0, window_bounds = array<i64: 8, 8, 28>}, {pipeline_mode = #tpu.pipeline_mode<synchronous>, transform_indices = @transform_1, window_bounds = array<i64: 28, 512>}, {pipeline_mode = #tpu.pipeline_mode<synchronous>, transform_indices = @transform_2, window_bounds = array<i64: 128, 512>}, {pipeline_mode = #tpu.pipeline_mode<synchronous>, transform_indices = @transform_3, window_bounds = array<i64: 1, 512>}, {pipeline_mode = #tpu.pipeline_mode<synchronous>, transform_indices = @transform_4, window_bounds = array<i64: 128, 512>}, {pipeline_mode = #tpu.pipeline_mode<synchronous>, transform_indices = @transform_5, window_bounds = array<i64: 128, 512>}, {pipeline_mode = #tpu.pipeline_mode<synchronous>, transform_indices = @transform_6, window_bounds = array<i64: 1, 512>}, {pipeline_mode = #tpu.pipeline_mode<synchronous>, transform_indices = @transform_7, window_bounds = array<i64: 128, 128>}, {pipeline_mode = #tpu.pipeline_mode<synchronous>, transform_indices = @transform_8, window_bounds = array<i64: 1, 128>}, {transform_indices = @transform_9, window_bounds = array<i64: 8, 128>}]} {
    %c0 = arith.constant 0 : index
    %c0_0 = arith.constant 0 : index
    %0 = vector.load %arg3[%c0, %c0_0] : memref<128x512xbf16, #tpu.memory_space<vmem>>, vector<128x512xbf16>
    %c0_1 = arith.constant 0 : index
    %c0_2 = arith.constant 0 : index
    %1 = vector.load %arg4[%c0_1, %c0_2] : memref<1x512xf32, #tpu.memory_space<vmem>>, vector<1x512xf32>
    %c0_3 = arith.constant 0 : index
    %c0_4 = arith.constant 0 : index
    %c0_5 = arith.constant 0 : index
    %2 = vector.load %arg1[%c0_3, %c0_4, %c0_5] : memref<8x8x28xf32, #tpu.memory_space<vmem>>, vector<8x8x28xf32>
    %3 = vector.shape_cast %2 : vector<8x8x28xf32> to vector<64x28xf32>
    %4 = arith.truncf %3 : vector<64x28xf32> to vector<64x28xbf16>
    %c0_6 = arith.constant 0 : index
    %c0_7 = arith.constant 0 : index
    %5 = vector.load %arg2[%c0_6, %c0_7] : memref<28x512xbf16, #tpu.memory_space<vmem>>, vector<28x512xbf16>
    %cst = arith.constant dense<0.000000e+00> : vector<64x512xf32>
    %6 = tpu.matmul %4, %5, %cst {dimension_numbers = #tpu.dot_dimension_numbers<[1], [0], [0], [1], [0, 0, 1, 1], [], []>} : vector<64x28xbf16>, vector<28x512xbf16>, vector<64x512xf32> -> vector<64x512xf32>
    %7 = vector.shape_cast %6 : vector<64x512xf32> to vector<8x8x512xf32>
    %8 = tpu.transpose %7, [1, 0, 2] : vector<8x8x512xf32> -> vector<8x8x512xf32>
    %9 = vector.shape_cast %1 : vector<1x512xf32> to vector<1x1x512xf32>
    %10 = vector.broadcast %9 : vector<1x1x512xf32> to vector<8x8x512xf32>
    %11 = arith.addf %8, %10 : vector<8x8x512xf32>
    %c0_8 = arith.constant 0 : index
    %c0_9 = arith.constant 0 : index
    %c0_10 = arith.constant 0 : index
    %12 = vector.load %arg11[%c0_8, %c0_9, %c0_10] : memref<8x8x512xf32, #tpu.memory_space<vmem>>, vector<8x8x512xf32>
    tpu.vector_store %arg11[%c0_8, %c0_9, %c0_10], %11 {strides = array<i32>} : memref<8x8x512xf32, #tpu.memory_space<vmem>>, vector<8x8x512xf32>,
    %cst_11 = arith.constant 0.000000e+00 : f32
    %13 = vector.broadcast %cst_11 : f32 to vector<8x128xf32>
    %cst_12 = arith.constant 0.000000e+00 : f32
    %14 = vector.broadcast %cst_12 : f32 to vector<8x128xf32>
    %c0_i32 = arith.constant 0 : i32
    %15 = arith.index_cast %c0_i32 : i32 to index
    %c0_13 = arith.constant 0 : index
    %c0_14 = arith.constant 0 : index
    %16 = vector.load %arg11[%15, %c0_13, %c0_14] : memref<8x8x512xf32, #tpu.memory_space<vmem>>, vector<1x8x512xf32>
    %17 = vector.shape_cast %16 : vector<1x8x512xf32> to vector<8x512xf32>
    %18 = arith.truncf %13 : vector<8x128xf32> to vector<8x128xbf16>
    %cst_15 = arith.constant dense<0.000000e+00> : vector<8x512xf32>
    %19 = tpu.matmul %18, %0, %cst_15 {dimension_numbers = #tpu.dot_dimension_numbers<[1], [0], [0], [1], [0, 0, 1, 1], [], []>} : vector<8x128xbf16>, vector<128x512xbf16>, vector<8x512xf32> -> vector<8x512xf32>
    %20 = arith.addf %17, %19 : vector<8x512xf32>
    %21 = vector.extract_strided_slice %20 {offsets = [0, 0], sizes = [8, 384], strides = [1, 1]} : vector<8x512xf32> to vector<8x384xf32>
    %cst_16 = arith.constant 5.000000e-01 : f32
    %22 = vector.broadcast %cst_16 : f32 to vector<8x384xf32>
    %23 = arith.mulf %22, %21 : vector<8x384xf32>
    %24 = math.tanh %23 : vector<8x384xf32>
    %cst_17 = arith.constant 1.000000e+00 : f32
    %25 = vector.broadcast %cst_17 : f32 to vector<8x384xf32>
    %26 = arith.addf %24, %25 : vector<8x384xf32>
    %cst_18 = arith.constant 5.000000e-01 : f32
    %27 = vector.broadcast %cst_18 : f32 to vector<8x384xf32>
    %28 = arith.mulf %27, %26 : vector<8x384xf32>
    %29 = vector.extract_strided_slice %28 {offsets = [0, 0], sizes = [8, 128], strides = [1, 1]} : vector<8x384xf32> to vector<8x128xf32>
    %30 = vector.extract_strided_slice %28 {offsets = [0, 128], sizes = [8, 128], strides = [1, 1]} : vector<8x384xf32> to vector<8x128xf32>
    %31 = vector.extract_strided_slice %28 {offsets = [0, 256], sizes = [8, 128], strides = [1, 1]} : vector<8x384xf32> to vector<8x128xf32>
    %32 = vector.extract_strided_slice %20 {offsets = [0, 384], sizes = [8, 128], strides = [1, 1]} : vector<8x512xf32> to vector<8x128xf32>
    %33 = math.tanh %32 : vector<8x128xf32>
    %34 = arith.mulf %30, %14 : vector<8x128xf32>
    %35 = arith.mulf %29, %33 : vector<8x128xf32>
    %36 = arith.addf %34, %35 : vector<8x128xf32>
    %37 = math.tanh %36 : vector<8x128xf32>
    %38 = arith.mulf %31, %37 : vector<8x128xf32>
    %39 = arith.truncf %38 : vector<8x128xf32> to vector<8x128xbf16>
    %40 = arith.index_cast %c0_i32 : i32 to index
    %c0_19 = arith.constant 0 : index
    %c0_20 = arith.constant 0 : index
    %41 = vector.load %arg12[%40, %c0_19, %c0_20] : memref<8x8x128xbf16, #tpu.memory_space<vmem>>, vector<1x8x128xbf16>
    %42 = vector.shape_cast %41 : vector<1x8x128xbf16> to vector<8x128xbf16>
    %43 = vector.shape_cast %39 : vector<8x128xbf16> to vector<1x8x128xbf16>
    tpu.vector_store %arg12[%40, %c0_19, %c0_20], %43 {strides = array<i32>} : memref<8x8x128xbf16, #tpu.memory_space<vmem>>, vector<1x8x128xbf16>,
    %c1_i32 = arith.constant 1 : i32
    %44 = arith.index_cast %c1_i32 : i32 to index
    %c0_21 = arith.constant 0 : index
    %c0_22 = arith.constant 0 : index
    %45 = vector.load %arg11[%44, %c0_21, %c0_22] : memref<8x8x512xf32, #tpu.memory_space<vmem>>, vector<1x8x512xf32>
    %46 = vector.shape_cast %45 : vector<1x8x512xf32> to vector<8x512xf32>
    %47 = arith.truncf %38 : vector<8x128xf32> to vector<8x128xbf16>
    %cst_23 = arith.constant dense<0.000000e+00> : vector<8x512xf32>
    %48 = tpu.matmul %47, %0, %cst_23 {dimension_numbers = #tpu.dot_dimension_numbers<[1], [0], [0], [1], [0, 0, 1, 1], [], []>} : vector<8x128xbf16>, vector<128x512xbf16>, vector<8x512xf32> -> vector<8x512xf32>
    %49 = arith.addf %46, %48 : vector<8x512xf32>
    %50 = vector.extract_strided_slice %49 {offsets = [0, 0], sizes = [8, 384], strides = [1, 1]} : vector<8x512xf32> to vector<8x384xf32>
    %cst_24 = arith.constant 5.000000e-01 : f32
    %51 = vector.broadcast %cst_24 : f32 to vector<8x384xf32>
    %52 = arith.mulf %51, %50 : vector<8x384xf32>
    %53 = math.tanh %52 : vector<8x384xf32>
    %cst_25 = arith.constant 1.000000e+00 : f32
    %54 = vector.broadcast %cst_25 : f32 to vector<8x384xf32>
    %55 = arith.addf %53, %54 : vector<8x384xf32>
    %cst_26 = arith.constant 5.000000e-01 : f32
    %56 = vector.broadcast %cst_26 : f32 to vector<8x384xf32>
    %57 = arith.mulf %56, %55 : vector<8x384xf32>
    %58 = vector.extract_strided_slice %57 {offsets = [0, 0], sizes = [8, 128], strides = [1, 1]} : vector<8x384xf32> to vector<8x128xf32>
    %59 = vector.extract_strided_slice %57 {offsets = [0, 128], sizes = [8, 128], strides = [1, 1]} : vector<8x384xf32> to vector<8x128xf32>
    %60 = vector.extract_strided_slice %57 {offsets = [0, 256], sizes = [8, 128], strides = [1, 1]} : vector<8x384xf32> to vector<8x128xf32>
    %61 = vector.extract_strided_slice %49 {offsets = [0, 384], sizes = [8, 128], strides = [1, 1]} : vector<8x512xf32> to vector<8x128xf32>
    %62 = math.tanh %61 : vector<8x128xf32>
    %63 = arith.mulf %59, %36 : vector<8x128xf32>
    %64 = arith.mulf %58, %62 : vector<8x128xf32>
    %65 = arith.addf %63, %64 : vector<8x128xf32>
    %66 = math.tanh %65 : vector<8x128xf32>
    %67 = arith.mulf %60, %66 : vector<8x128xf32>
    %68 = arith.truncf %67 : vector<8x128xf32> to vector<8x128xbf16>
    %69 = arith.index_cast %c1_i32 : i32 to index
    %c0_27 = arith.constant 0 : index
    %c0_28 = arith.constant 0 : index
    %70 = vector.load %arg12[%69, %c0_27, %c0_28] : memref<8x8x128xbf16, #tpu.memory_space<vmem>>, vector<1x8x128xbf16>
    %71 = vector.shape_cast %70 : vector<1x8x128xbf16> to vector<8x128xbf16>
    %72 = vector.shape_cast %68 : vector<8x128xbf16> to vector<1x8x128xbf16>
    tpu.vector_store %arg12[%69, %c0_27, %c0_28], %72 {strides = array<i32>} : memref<8x8x128xbf16, #tpu.memory_space<vmem>>, vector<1x8x128xbf16>,
    %c2_i32 = arith.constant 2 : i32
    %73 = arith.index_cast %c2_i32 : i32 to index
    %c0_29 = arith.constant 0 : index
    %c0_30 = arith.constant 0 : index
    %74 = vector.load %arg11[%73, %c0_29, %c0_30] : memref<8x8x512xf32, #tpu.memory_space<vmem>>, vector<1x8x512xf32>
    %75 = vector.shape_cast %74 : vector<1x8x512xf32> to vector<8x512xf32>
    %76 = arith.truncf %67 : vector<8x128xf32> to vector<8x128xbf16>
    %cst_31 = arith.constant dense<0.000000e+00> : vector<8x512xf32>
    %77 = tpu.matmul %76, %0, %cst_31 {dimension_numbers = #tpu.dot_dimension_numbers<[1], [0], [0], [1], [0, 0, 1, 1], [], []>} : vector<8x128xbf16>, vector<128x512xbf16>, vector<8x512xf32> -> vector<8x512xf32>
    %78 = arith.addf %75, %77 : vector<8x512xf32>
    %79 = vector.extract_strided_slice %78 {offsets = [0, 0], sizes = [8, 384], strides = [1, 1]} : vector<8x512xf32> to vector<8x384xf32>
    %cst_32 = arith.constant 5.000000e-01 : f32
    %80 = vector.broadcast %cst_32 : f32 to vector<8x384xf32>
    %81 = arith.mulf %80, %79 : vector<8x384xf32>
    %82 = math.tanh %81 : vector<8x384xf32>
    %cst_33 = arith.constant 1.000000e+00 : f32
    %83 = vector.broadcast %cst_33 : f32 to vector<8x384xf32>
    %84 = arith.addf %82, %83 : vector<8x384xf32>
    %cst_34 = arith.constant 5.000000e-01 : f32
    %85 = vector.broadcast %cst_34 : f32 to vector<8x384xf32>
    %86 = arith.mulf %85, %84 : vector<8x384xf32>
    %87 = vector.extract_strided_slice %86 {offsets = [0, 0], sizes = [8, 128], strides = [1, 1]} : vector<8x384xf32> to vector<8x128xf32>
    %88 = vector.extract_strided_slice %86 {offsets = [0, 128], sizes = [8, 128], strides = [1, 1]} : vector<8x384xf32> to vector<8x128xf32>
    %89 = vector.extract_strided_slice %86 {offsets = [0, 256], sizes = [8, 128], strides = [1, 1]} : vector<8x384xf32> to vector<8x128xf32>
    %90 = vector.extract_strided_slice %78 {offsets = [0, 384], sizes = [8, 128], strides = [1, 1]} : vector<8x512xf32> to vector<8x128xf32>
    %91 = math.tanh %90 : vector<8x128xf32>
    %92 = arith.mulf %88, %65 : vector<8x128xf32>
    %93 = arith.mulf %87, %91 : vector<8x128xf32>
    %94 = arith.addf %92, %93 : vector<8x128xf32>
    %95 = math.tanh %94 : vector<8x128xf32>
    %96 = arith.mulf %89, %95 : vector<8x128xf32>
    %97 = arith.truncf %96 : vector<8x128xf32> to vector<8x128xbf16>
    %98 = arith.index_cast %c2_i32 : i32 to index
    %c0_35 = arith.constant 0 : index
    %c0_36 = arith.constant 0 : index
    %99 = vector.load %arg12[%98, %c0_35, %c0_36] : memref<8x8x128xbf16, #tpu.memory_space<vmem>>, vector<1x8x128xbf16>
    %100 = vector.shape_cast %99 : vector<1x8x128xbf16> to vector<8x128xbf16>
    %101 = vector.shape_cast %97 : vector<8x128xbf16> to vector<1x8x128xbf16>
    tpu.vector_store %arg12[%98, %c0_35, %c0_36], %101 {strides = array<i32>} : memref<8x8x128xbf16, #tpu.memory_space<vmem>>, vector<1x8x128xbf16>,
    %c3_i32 = arith.constant 3 : i32
    %102 = arith.index_cast %c3_i32 : i32 to index
    %c0_37 = arith.constant 0 : index
    %c0_38 = arith.constant 0 : index
    %103 = vector.load %arg11[%102, %c0_37, %c0_38] : memref<8x8x512xf32, #tpu.memory_space<vmem>>, vector<1x8x512xf32>
    %104 = vector.shape_cast %103 : vector<1x8x512xf32> to vector<8x512xf32>
    %105 = arith.truncf %96 : vector<8x128xf32> to vector<8x128xbf16>
    %cst_39 = arith.constant dense<0.000000e+00> : vector<8x512xf32>
    %106 = tpu.matmul %105, %0, %cst_39 {dimension_numbers = #tpu.dot_dimension_numbers<[1], [0], [0], [1], [0, 0, 1, 1], [], []>} : vector<8x128xbf16>, vector<128x512xbf16>, vector<8x512xf32> -> vector<8x512xf32>
    %107 = arith.addf %104, %106 : vector<8x512xf32>
    %108 = vector.extract_strided_slice %107 {offsets = [0, 0], sizes = [8, 384], strides = [1, 1]} : vector<8x512xf32> to vector<8x384xf32>
    %cst_40 = arith.constant 5.000000e-01 : f32
    %109 = vector.broadcast %cst_40 : f32 to vector<8x384xf32>
    %110 = arith.mulf %109, %108 : vector<8x384xf32>
    %111 = math.tanh %110 : vector<8x384xf32>
    %cst_41 = arith.constant 1.000000e+00 : f32
    %112 = vector.broadcast %cst_41 : f32 to vector<8x384xf32>
    %113 = arith.addf %111, %112 : vector<8x384xf32>
    %cst_42 = arith.constant 5.000000e-01 : f32
    %114 = vector.broadcast %cst_42 : f32 to vector<8x384xf32>
    %115 = arith.mulf %114, %113 : vector<8x384xf32>
    %116 = vector.extract_strided_slice %115 {offsets = [0, 0], sizes = [8, 128], strides = [1, 1]} : vector<8x384xf32> to vector<8x128xf32>
    %117 = vector.extract_strided_slice %115 {offsets = [0, 128], sizes = [8, 128], strides = [1, 1]} : vector<8x384xf32> to vector<8x128xf32>
    %118 = vector.extract_strided_slice %115 {offsets = [0, 256], sizes = [8, 128], strides = [1, 1]} : vector<8x384xf32> to vector<8x128xf32>
    %119 = vector.extract_strided_slice %107 {offsets = [0, 384], sizes = [8, 128], strides = [1, 1]} : vector<8x512xf32> to vector<8x128xf32>
    %120 = math.tanh %119 : vector<8x128xf32>
    %121 = arith.mulf %117, %94 : vector<8x128xf32>
    %122 = arith.mulf %116, %120 : vector<8x128xf32>
    %123 = arith.addf %121, %122 : vector<8x128xf32>
    %124 = math.tanh %123 : vector<8x128xf32>
    %125 = arith.mulf %118, %124 : vector<8x128xf32>
    %126 = arith.truncf %125 : vector<8x128xf32> to vector<8x128xbf16>
    %127 = arith.index_cast %c3_i32 : i32 to index
    %c0_43 = arith.constant 0 : index
    %c0_44 = arith.constant 0 : index
    %128 = vector.load %arg12[%127, %c0_43, %c0_44] : memref<8x8x128xbf16, #tpu.memory_space<vmem>>, vector<1x8x128xbf16>
    %129 = vector.shape_cast %128 : vector<1x8x128xbf16> to vector<8x128xbf16>
    %130 = vector.shape_cast %126 : vector<8x128xbf16> to vector<1x8x128xbf16>
    tpu.vector_store %arg12[%127, %c0_43, %c0_44], %130 {strides = array<i32>} : memref<8x8x128xbf16, #tpu.memory_space<vmem>>, vector<1x8x128xbf16>,
    %c4_i32 = arith.constant 4 : i32
    %131 = arith.index_cast %c4_i32 : i32 to index
    %c0_45 = arith.constant 0 : index
    %c0_46 = arith.constant 0 : index
    %132 = vector.load %arg11[%131, %c0_45, %c0_46] : memref<8x8x512xf32, #tpu.memory_space<vmem>>, vector<1x8x512xf32>
    %133 = vector.shape_cast %132 : vector<1x8x512xf32> to vector<8x512xf32>
    %134 = arith.truncf %125 : vector<8x128xf32> to vector<8x128xbf16>
    %cst_47 = arith.constant dense<0.000000e+00> : vector<8x512xf32>
    %135 = tpu.matmul %134, %0, %cst_47 {dimension_numbers = #tpu.dot_dimension_numbers<[1], [0], [0], [1], [0, 0, 1, 1], [], []>} : vector<8x128xbf16>, vector<128x512xbf16>, vector<8x512xf32> -> vector<8x512xf32>
    %136 = arith.addf %133, %135 : vector<8x512xf32>
    %137 = vector.extract_strided_slice %136 {offsets = [0, 0], sizes = [8, 384], strides = [1, 1]} : vector<8x512xf32> to vector<8x384xf32>
    %cst_48 = arith.constant 5.000000e-01 : f32
    %138 = vector.broadcast %cst_48 : f32 to vector<8x384xf32>
    %139 = arith.mulf %138, %137 : vector<8x384xf32>
    %140 = math.tanh %139 : vector<8x384xf32>
    %cst_49 = arith.constant 1.000000e+00 : f32
    %141 = vector.broadcast %cst_49 : f32 to vector<8x384xf32>
    %142 = arith.addf %140, %141 : vector<8x384xf32>
    %cst_50 = arith.constant 5.000000e-01 : f32
    %143 = vector.broadcast %cst_50 : f32 to vector<8x384xf32>
    %144 = arith.mulf %143, %142 : vector<8x384xf32>
    %145 = vector.extract_strided_slice %144 {offsets = [0, 0], sizes = [8, 128], strides = [1, 1]} : vector<8x384xf32> to vector<8x128xf32>
    %146 = vector.extract_strided_slice %144 {offsets = [0, 128], sizes = [8, 128], strides = [1, 1]} : vector<8x384xf32> to vector<8x128xf32>
    %147 = vector.extract_strided_slice %144 {offsets = [0, 256], sizes = [8, 128], strides = [1, 1]} : vector<8x384xf32> to vector<8x128xf32>
    %148 = vector.extract_strided_slice %136 {offsets = [0, 384], sizes = [8, 128], strides = [1, 1]} : vector<8x512xf32> to vector<8x128xf32>
    %149 = math.tanh %148 : vector<8x128xf32>
    %150 = arith.mulf %146, %123 : vector<8x128xf32>
    %151 = arith.mulf %145, %149 : vector<8x128xf32>
    %152 = arith.addf %150, %151 : vector<8x128xf32>
    %153 = math.tanh %152 : vector<8x128xf32>
    %154 = arith.mulf %147, %153 : vector<8x128xf32>
    %155 = arith.truncf %154 : vector<8x128xf32> to vector<8x128xbf16>
    %156 = arith.index_cast %c4_i32 : i32 to index
    %c0_51 = arith.constant 0 : index
    %c0_52 = arith.constant 0 : index
    %157 = vector.load %arg12[%156, %c0_51, %c0_52] : memref<8x8x128xbf16, #tpu.memory_space<vmem>>, vector<1x8x128xbf16>
    %158 = vector.shape_cast %157 : vector<1x8x128xbf16> to vector<8x128xbf16>
    %159 = vector.shape_cast %155 : vector<8x128xbf16> to vector<1x8x128xbf16>
    tpu.vector_store %arg12[%156, %c0_51, %c0_52], %159 {strides = array<i32>} : memref<8x8x128xbf16, #tpu.memory_space<vmem>>, vector<1x8x128xbf16>,
    %c5_i32 = arith.constant 5 : i32
    %160 = arith.index_cast %c5_i32 : i32 to index
    %c0_53 = arith.constant 0 : index
    %c0_54 = arith.constant 0 : index
    %161 = vector.load %arg11[%160, %c0_53, %c0_54] : memref<8x8x512xf32, #tpu.memory_space<vmem>>, vector<1x8x512xf32>
    %162 = vector.shape_cast %161 : vector<1x8x512xf32> to vector<8x512xf32>
    %163 = arith.truncf %154 : vector<8x128xf32> to vector<8x128xbf16>
    %cst_55 = arith.constant dense<0.000000e+00> : vector<8x512xf32>
    %164 = tpu.matmul %163, %0, %cst_55 {dimension_numbers = #tpu.dot_dimension_numbers<[1], [0], [0], [1], [0, 0, 1, 1], [], []>} : vector<8x128xbf16>, vector<128x512xbf16>, vector<8x512xf32> -> vector<8x512xf32>
    %165 = arith.addf %162, %164 : vector<8x512xf32>
    %166 = vector.extract_strided_slice %165 {offsets = [0, 0], sizes = [8, 384], strides = [1, 1]} : vector<8x512xf32> to vector<8x384xf32>
    %cst_56 = arith.constant 5.000000e-01 : f32
    %167 = vector.broadcast %cst_56 : f32 to vector<8x384xf32>
    %168 = arith.mulf %167, %166 : vector<8x384xf32>
    %169 = math.tanh %168 : vector<8x384xf32>
    %cst_57 = arith.constant 1.000000e+00 : f32
    %170 = vector.broadcast %cst_57 : f32 to vector<8x384xf32>
    %171 = arith.addf %169, %170 : vector<8x384xf32>
    %cst_58 = arith.constant 5.000000e-01 : f32
    %172 = vector.broadcast %cst_58 : f32 to vector<8x384xf32>
    %173 = arith.mulf %172, %171 : vector<8x384xf32>
    %174 = vector.extract_strided_slice %173 {offsets = [0, 0], sizes = [8, 128], strides = [1, 1]} : vector<8x384xf32> to vector<8x128xf32>
    %175 = vector.extract_strided_slice %173 {offsets = [0, 128], sizes = [8, 128], strides = [1, 1]} : vector<8x384xf32> to vector<8x128xf32>
    %176 = vector.extract_strided_slice %173 {offsets = [0, 256], sizes = [8, 128], strides = [1, 1]} : vector<8x384xf32> to vector<8x128xf32>
    %177 = vector.extract_strided_slice %165 {offsets = [0, 384], sizes = [8, 128], strides = [1, 1]} : vector<8x512xf32> to vector<8x128xf32>
    %178 = math.tanh %177 : vector<8x128xf32>
    %179 = arith.mulf %175, %152 : vector<8x128xf32>
    %180 = arith.mulf %174, %178 : vector<8x128xf32>
    %181 = arith.addf %179, %180 : vector<8x128xf32>
    %182 = math.tanh %181 : vector<8x128xf32>
    %183 = arith.mulf %176, %182 : vector<8x128xf32>
    %184 = arith.truncf %183 : vector<8x128xf32> to vector<8x128xbf16>
    %185 = arith.index_cast %c5_i32 : i32 to index
    %c0_59 = arith.constant 0 : index
    %c0_60 = arith.constant 0 : index
    %186 = vector.load %arg12[%185, %c0_59, %c0_60] : memref<8x8x128xbf16, #tpu.memory_space<vmem>>, vector<1x8x128xbf16>
    %187 = vector.shape_cast %186 : vector<1x8x128xbf16> to vector<8x128xbf16>
    %188 = vector.shape_cast %184 : vector<8x128xbf16> to vector<1x8x128xbf16>
    tpu.vector_store %arg12[%185, %c0_59, %c0_60], %188 {strides = array<i32>} : memref<8x8x128xbf16, #tpu.memory_space<vmem>>, vector<1x8x128xbf16>,
    %c6_i32 = arith.constant 6 : i32
    %189 = arith.index_cast %c6_i32 : i32 to index
    %c0_61 = arith.constant 0 : index
    %c0_62 = arith.constant 0 : index
    %190 = vector.load %arg11[%189, %c0_61, %c0_62] : memref<8x8x512xf32, #tpu.memory_space<vmem>>, vector<1x8x512xf32>
    %191 = vector.shape_cast %190 : vector<1x8x512xf32> to vector<8x512xf32>
    %192 = arith.truncf %183 : vector<8x128xf32> to vector<8x128xbf16>
    %cst_63 = arith.constant dense<0.000000e+00> : vector<8x512xf32>
    %193 = tpu.matmul %192, %0, %cst_63 {dimension_numbers = #tpu.dot_dimension_numbers<[1], [0], [0], [1], [0, 0, 1, 1], [], []>} : vector<8x128xbf16>, vector<128x512xbf16>, vector<8x512xf32> -> vector<8x512xf32>
    %194 = arith.addf %191, %193 : vector<8x512xf32>
    %195 = vector.extract_strided_slice %194 {offsets = [0, 0], sizes = [8, 384], strides = [1, 1]} : vector<8x512xf32> to vector<8x384xf32>
    %cst_64 = arith.constant 5.000000e-01 : f32
    %196 = vector.broadcast %cst_64 : f32 to vector<8x384xf32>
    %197 = arith.mulf %196, %195 : vector<8x384xf32>
    %198 = math.tanh %197 : vector<8x384xf32>
    %cst_65 = arith.constant 1.000000e+00 : f32
    %199 = vector.broadcast %cst_65 : f32 to vector<8x384xf32>
    %200 = arith.addf %198, %199 : vector<8x384xf32>
    %cst_66 = arith.constant 5.000000e-01 : f32
    %201 = vector.broadcast %cst_66 : f32 to vector<8x384xf32>
    %202 = arith.mulf %201, %200 : vector<8x384xf32>
    %203 = vector.extract_strided_slice %202 {offsets = [0, 0], sizes = [8, 128], strides = [1, 1]} : vector<8x384xf32> to vector<8x128xf32>
    %204 = vector.extract_strided_slice %202 {offsets = [0, 128], sizes = [8, 128], strides = [1, 1]} : vector<8x384xf32> to vector<8x128xf32>
    %205 = vector.extract_strided_slice %202 {offsets = [0, 256], sizes = [8, 128], strides = [1, 1]} : vector<8x384xf32> to vector<8x128xf32>
    %206 = vector.extract_strided_slice %194 {offsets = [0, 384], sizes = [8, 128], strides = [1, 1]} : vector<8x512xf32> to vector<8x128xf32>
    %207 = math.tanh %206 : vector<8x128xf32>
    %208 = arith.mulf %204, %181 : vector<8x128xf32>
    %209 = arith.mulf %203, %207 : vector<8x128xf32>
    %210 = arith.addf %208, %209 : vector<8x128xf32>
    %211 = math.tanh %210 : vector<8x128xf32>
    %212 = arith.mulf %205, %211 : vector<8x128xf32>
    %213 = arith.truncf %212 : vector<8x128xf32> to vector<8x128xbf16>
    %214 = arith.index_cast %c6_i32 : i32 to index
    %c0_67 = arith.constant 0 : index
    %c0_68 = arith.constant 0 : index
    %215 = vector.load %arg12[%214, %c0_67, %c0_68] : memref<8x8x128xbf16, #tpu.memory_space<vmem>>, vector<1x8x128xbf16>
    %216 = vector.shape_cast %215 : vector<1x8x128xbf16> to vector<8x128xbf16>
    %217 = vector.shape_cast %213 : vector<8x128xbf16> to vector<1x8x128xbf16>
    tpu.vector_store %arg12[%214, %c0_67, %c0_68], %217 {strides = array<i32>} : memref<8x8x128xbf16, #tpu.memory_space<vmem>>, vector<1x8x128xbf16>,
    %c7_i32 = arith.constant 7 : i32
    %218 = arith.index_cast %c7_i32 : i32 to index
    %c0_69 = arith.constant 0 : index
    %c0_70 = arith.constant 0 : index
    %219 = vector.load %arg11[%218, %c0_69, %c0_70] : memref<8x8x512xf32, #tpu.memory_space<vmem>>, vector<1x8x512xf32>
    %220 = vector.shape_cast %219 : vector<1x8x512xf32> to vector<8x512xf32>
    %221 = arith.truncf %212 : vector<8x128xf32> to vector<8x128xbf16>
    %cst_71 = arith.constant dense<0.000000e+00> : vector<8x512xf32>
    %222 = tpu.matmul %221, %0, %cst_71 {dimension_numbers = #tpu.dot_dimension_numbers<[1], [0], [0], [1], [0, 0, 1, 1], [], []>} : vector<8x128xbf16>, vector<128x512xbf16>, vector<8x512xf32> -> vector<8x512xf32>
    %223 = arith.addf %220, %222 : vector<8x512xf32>
    %224 = vector.extract_strided_slice %223 {offsets = [0, 0], sizes = [8, 384], strides = [1, 1]} : vector<8x512xf32> to vector<8x384xf32>
    %cst_72 = arith.constant 5.000000e-01 : f32
    %225 = vector.broadcast %cst_72 : f32 to vector<8x384xf32>
    %226 = arith.mulf %225, %224 : vector<8x384xf32>
    %227 = math.tanh %226 : vector<8x384xf32>
    %cst_73 = arith.constant 1.000000e+00 : f32
    %228 = vector.broadcast %cst_73 : f32 to vector<8x384xf32>
    %229 = arith.addf %227, %228 : vector<8x384xf32>
    %cst_74 = arith.constant 5.000000e-01 : f32
    %230 = vector.broadcast %cst_74 : f32 to vector<8x384xf32>
    %231 = arith.mulf %230, %229 : vector<8x384xf32>
    %232 = vector.extract_strided_slice %231 {offsets = [0, 0], sizes = [8, 128], strides = [1, 1]} : vector<8x384xf32> to vector<8x128xf32>
    %233 = vector.extract_strided_slice %231 {offsets = [0, 128], sizes = [8, 128], strides = [1, 1]} : vector<8x384xf32> to vector<8x128xf32>
    %234 = vector.extract_strided_slice %231 {offsets = [0, 256], sizes = [8, 128], strides = [1, 1]} : vector<8x384xf32> to vector<8x128xf32>
    %235 = vector.extract_strided_slice %223 {offsets = [0, 384], sizes = [8, 128], strides = [1, 1]} : vector<8x512xf32> to vector<8x128xf32>
    %236 = math.tanh %235 : vector<8x128xf32>
    %237 = arith.mulf %233, %210 : vector<8x128xf32>
    %238 = arith.mulf %232, %236 : vector<8x128xf32>
    %239 = arith.addf %237, %238 : vector<8x128xf32>
    %240 = math.tanh %239 : vector<8x128xf32>
    %241 = arith.mulf %234, %240 : vector<8x128xf32>
    %242 = arith.truncf %241 : vector<8x128xf32> to vector<8x128xbf16>
    %243 = arith.index_cast %c7_i32 : i32 to index
    %c0_75 = arith.constant 0 : index
    %c0_76 = arith.constant 0 : index
    %244 = vector.load %arg12[%243, %c0_75, %c0_76] : memref<8x8x128xbf16, #tpu.memory_space<vmem>>, vector<1x8x128xbf16>
    %245 = vector.shape_cast %244 : vector<1x8x128xbf16> to vector<8x128xbf16>
    %246 = vector.shape_cast %242 : vector<8x128xbf16> to vector<1x8x128xbf16>
    tpu.vector_store %arg12[%243, %c0_75, %c0_76], %246 {strides = array<i32>} : memref<8x8x128xbf16, #tpu.memory_space<vmem>>, vector<1x8x128xbf16>,
    %c8_i32 = arith.constant 8 : i32
    %c0_77 = arith.constant 0 : index
    %c0_78 = arith.constant 0 : index
    %247 = vector.load %arg6[%c0_77, %c0_78] : memref<128x512xbf16, #tpu.memory_space<vmem>>, vector<128x512xbf16>
    %c0_79 = arith.constant 0 : index
    %c0_80 = arith.constant 0 : index
    %248 = vector.load %arg7[%c0_79, %c0_80] : memref<1x512xf32, #tpu.memory_space<vmem>>, vector<1x512xf32>
    %c0_81 = arith.constant 0 : index
    %c0_82 = arith.constant 0 : index
    %c0_83 = arith.constant 0 : index
    %249 = vector.load %arg12[%c0_81, %c0_82, %c0_83] : memref<8x8x128xbf16, #tpu.memory_space<vmem>>, vector<8x8x128xbf16>
    %250 = vector.shape_cast %249 : vector<8x8x128xbf16> to vector<64x128xbf16>
    %c0_84 = arith.constant 0 : index
    %c0_85 = arith.constant 0 : index
    %251 = vector.load %arg5[%c0_84, %c0_85] : memref<128x512xbf16, #tpu.memory_space<vmem>>, vector<128x512xbf16>
    %cst_86 = arith.constant dense<0.000000e+00> : vector<64x512xf32>
    %252 = tpu.matmul %250, %251, %cst_86 {dimension_numbers = #tpu.dot_dimension_numbers<[1], [0], [0], [1], [0, 0, 1, 1], [], []>} : vector<64x128xbf16>, vector<128x512xbf16>, vector<64x512xf32> -> vector<64x512xf32>
    %253 = vector.shape_cast %252 : vector<64x512xf32> to vector<8x8x512xf32>
    %254 = vector.shape_cast %248 : vector<1x512xf32> to vector<1x1x512xf32>
    %255 = vector.broadcast %254 : vector<1x1x512xf32> to vector<8x8x512xf32>
    %256 = arith.addf %253, %255 : vector<8x8x512xf32>
    %c0_87 = arith.constant 0 : index
    %c0_88 = arith.constant 0 : index
    %c0_89 = arith.constant 0 : index
    %257 = vector.load %arg11[%c0_87, %c0_88, %c0_89] : memref<8x8x512xf32, #tpu.memory_space<vmem>>, vector<8x8x512xf32>
    tpu.vector_store %arg11[%c0_87, %c0_88, %c0_89], %256 {strides = array<i32>} : memref<8x8x512xf32, #tpu.memory_space<vmem>>, vector<8x8x512xf32>,
    %cst_90 = arith.constant 0.000000e+00 : f32
    %258 = vector.broadcast %cst_90 : f32 to vector<8x128xf32>
    %cst_91 = arith.constant 0.000000e+00 : f32
    %259 = vector.broadcast %cst_91 : f32 to vector<8x128xf32>
    %c0_i32_92 = arith.constant 0 : i32
    %260 = arith.index_cast %c0_i32_92 : i32 to index
    %c0_93 = arith.constant 0 : index
    %c0_94 = arith.constant 0 : index
    %261 = vector.load %arg11[%260, %c0_93, %c0_94] : memref<8x8x512xf32, #tpu.memory_space<vmem>>, vector<1x8x512xf32>
    %262 = vector.shape_cast %261 : vector<1x8x512xf32> to vector<8x512xf32>
    %263 = arith.truncf %258 : vector<8x128xf32> to vector<8x128xbf16>
    %cst_95 = arith.constant dense<0.000000e+00> : vector<8x512xf32>
    %264 = tpu.matmul %263, %247, %cst_95 {dimension_numbers = #tpu.dot_dimension_numbers<[1], [0], [0], [1], [0, 0, 1, 1], [], []>} : vector<8x128xbf16>, vector<128x512xbf16>, vector<8x512xf32> -> vector<8x512xf32>
    %265 = arith.addf %262, %264 : vector<8x512xf32>
    %266 = vector.extract_strided_slice %265 {offsets = [0, 0], sizes = [8, 384], strides = [1, 1]} : vector<8x512xf32> to vector<8x384xf32>
    %cst_96 = arith.constant 5.000000e-01 : f32
    %267 = vector.broadcast %cst_96 : f32 to vector<8x384xf32>
    %268 = arith.mulf %267, %266 : vector<8x384xf32>
    %269 = math.tanh %268 : vector<8x384xf32>
    %cst_97 = arith.constant 1.000000e+00 : f32
    %270 = vector.broadcast %cst_97 : f32 to vector<8x384xf32>
    %271 = arith.addf %269, %270 : vector<8x384xf32>
    %cst_98 = arith.constant 5.000000e-01 : f32
    %272 = vector.broadcast %cst_98 : f32 to vector<8x384xf32>
    %273 = arith.mulf %272, %271 : vector<8x384xf32>
    %274 = vector.extract_strided_slice %273 {offsets = [0, 0], sizes = [8, 128], strides = [1, 1]} : vector<8x384xf32> to vector<8x128xf32>
    %275 = vector.extract_strided_slice %273 {offsets = [0, 128], sizes = [8, 128], strides = [1, 1]} : vector<8x384xf32> to vector<8x128xf32>
    %276 = vector.extract_strided_slice %273 {offsets = [0, 256], sizes = [8, 128], strides = [1, 1]} : vector<8x384xf32> to vector<8x128xf32>
    %277 = vector.extract_strided_slice %265 {offsets = [0, 384], sizes = [8, 128], strides = [1, 1]} : vector<8x512xf32> to vector<8x128xf32>
    %278 = math.tanh %277 : vector<8x128xf32>
    %279 = arith.mulf %275, %259 : vector<8x128xf32>
    %280 = arith.mulf %274, %278 : vector<8x128xf32>
    %281 = arith.addf %279, %280 : vector<8x128xf32>
    %282 = math.tanh %281 : vector<8x128xf32>
    %283 = arith.mulf %276, %282 : vector<8x128xf32>
    %c1_i32_99 = arith.constant 1 : i32
    %284 = arith.index_cast %c1_i32_99 : i32 to index
    %c0_100 = arith.constant 0 : index
    %c0_101 = arith.constant 0 : index
    %285 = vector.load %arg11[%284, %c0_100, %c0_101] : memref<8x8x512xf32, #tpu.memory_space<vmem>>, vector<1x8x512xf32>
    %286 = vector.shape_cast %285 : vector<1x8x512xf32> to vector<8x512xf32>
    %287 = arith.truncf %283 : vector<8x128xf32> to vector<8x128xbf16>
    %cst_102 = arith.constant dense<0.000000e+00> : vector<8x512xf32>
    %288 = tpu.matmul %287, %247, %cst_102 {dimension_numbers = #tpu.dot_dimension_numbers<[1], [0], [0], [1], [0, 0, 1, 1], [], []>} : vector<8x128xbf16>, vector<128x512xbf16>, vector<8x512xf32> -> vector<8x512xf32>
    %289 = arith.addf %286, %288 : vector<8x512xf32>
    %290 = vector.extract_strided_slice %289 {offsets = [0, 0], sizes = [8, 384], strides = [1, 1]} : vector<8x512xf32> to vector<8x384xf32>
    %cst_103 = arith.constant 5.000000e-01 : f32
    %291 = vector.broadcast %cst_103 : f32 to vector<8x384xf32>
    %292 = arith.mulf %291, %290 : vector<8x384xf32>
    %293 = math.tanh %292 : vector<8x384xf32>
    %cst_104 = arith.constant 1.000000e+00 : f32
    %294 = vector.broadcast %cst_104 : f32 to vector<8x384xf32>
    %295 = arith.addf %293, %294 : vector<8x384xf32>
    %cst_105 = arith.constant 5.000000e-01 : f32
    %296 = vector.broadcast %cst_105 : f32 to vector<8x384xf32>
    %297 = arith.mulf %296, %295 : vector<8x384xf32>
    %298 = vector.extract_strided_slice %297 {offsets = [0, 0], sizes = [8, 128], strides = [1, 1]} : vector<8x384xf32> to vector<8x128xf32>
    %299 = vector.extract_strided_slice %297 {offsets = [0, 128], sizes = [8, 128], strides = [1, 1]} : vector<8x384xf32> to vector<8x128xf32>
    %300 = vector.extract_strided_slice %297 {offsets = [0, 256], sizes = [8, 128], strides = [1, 1]} : vector<8x384xf32> to vector<8x128xf32>
    %301 = vector.extract_strided_slice %289 {offsets = [0, 384], sizes = [8, 128], strides = [1, 1]} : vector<8x512xf32> to vector<8x128xf32>
    %302 = math.tanh %301 : vector<8x128xf32>
    %303 = arith.mulf %299, %281 : vector<8x128xf32>
    %304 = arith.mulf %298, %302 : vector<8x128xf32>
    %305 = arith.addf %303, %304 : vector<8x128xf32>
    %306 = math.tanh %305 : vector<8x128xf32>
    %307 = arith.mulf %300, %306 : vector<8x128xf32>
    %c2_i32_106 = arith.constant 2 : i32
    %308 = arith.index_cast %c2_i32_106 : i32 to index
    %c0_107 = arith.constant 0 : index
    %c0_108 = arith.constant 0 : index
    %309 = vector.load %arg11[%308, %c0_107, %c0_108] : memref<8x8x512xf32, #tpu.memory_space<vmem>>, vector<1x8x512xf32>
    %310 = vector.shape_cast %309 : vector<1x8x512xf32> to vector<8x512xf32>
    %311 = arith.truncf %307 : vector<8x128xf32> to vector<8x128xbf16>
    %cst_109 = arith.constant dense<0.000000e+00> : vector<8x512xf32>
    %312 = tpu.matmul %311, %247, %cst_109 {dimension_numbers = #tpu.dot_dimension_numbers<[1], [0], [0], [1], [0, 0, 1, 1], [], []>} : vector<8x128xbf16>, vector<128x512xbf16>, vector<8x512xf32> -> vector<8x512xf32>
    %313 = arith.addf %310, %312 : vector<8x512xf32>
    %314 = vector.extract_strided_slice %313 {offsets = [0, 0], sizes = [8, 384], strides = [1, 1]} : vector<8x512xf32> to vector<8x384xf32>
    %cst_110 = arith.constant 5.000000e-01 : f32
    %315 = vector.broadcast %cst_110 : f32 to vector<8x384xf32>
    %316 = arith.mulf %315, %314 : vector<8x384xf32>
    %317 = math.tanh %316 : vector<8x384xf32>
    %cst_111 = arith.constant 1.000000e+00 : f32
    %318 = vector.broadcast %cst_111 : f32 to vector<8x384xf32>
    %319 = arith.addf %317, %318 : vector<8x384xf32>
    %cst_112 = arith.constant 5.000000e-01 : f32
    %320 = vector.broadcast %cst_112 : f32 to vector<8x384xf32>
    %321 = arith.mulf %320, %319 : vector<8x384xf32>
    %322 = vector.extract_strided_slice %321 {offsets = [0, 0], sizes = [8, 128], strides = [1, 1]} : vector<8x384xf32> to vector<8x128xf32>
    %323 = vector.extract_strided_slice %321 {offsets = [0, 128], sizes = [8, 128], strides = [1, 1]} : vector<8x384xf32> to vector<8x128xf32>
    %324 = vector.extract_strided_slice %321 {offsets = [0, 256], sizes = [8, 128], strides = [1, 1]} : vector<8x384xf32> to vector<8x128xf32>
    %325 = vector.extract_strided_slice %313 {offsets = [0, 384], sizes = [8, 128], strides = [1, 1]} : vector<8x512xf32> to vector<8x128xf32>
    %326 = math.tanh %325 : vector<8x128xf32>
    %327 = arith.mulf %323, %305 : vector<8x128xf32>
    %328 = arith.mulf %322, %326 : vector<8x128xf32>
    %329 = arith.addf %327, %328 : vector<8x128xf32>
    %330 = math.tanh %329 : vector<8x128xf32>
    %331 = arith.mulf %324, %330 : vector<8x128xf32>
    %c3_i32_113 = arith.constant 3 : i32
    %332 = arith.index_cast %c3_i32_113 : i32 to index
    %c0_114 = arith.constant 0 : index
    %c0_115 = arith.constant 0 : index
    %333 = vector.load %arg11[%332, %c0_114, %c0_115] : memref<8x8x512xf32, #tpu.memory_space<vmem>>, vector<1x8x512xf32>
    %334 = vector.shape_cast %333 : vector<1x8x512xf32> to vector<8x512xf32>
    %335 = arith.truncf %331 : vector<8x128xf32> to vector<8x128xbf16>
    %cst_116 = arith.constant dense<0.000000e+00> : vector<8x512xf32>
    %336 = tpu.matmul %335, %247, %cst_116 {dimension_numbers = #tpu.dot_dimension_numbers<[1], [0], [0], [1], [0, 0, 1, 1], [], []>} : vector<8x128xbf16>, vector<128x512xbf16>, vector<8x512xf32> -> vector<8x512xf32>
    %337 = arith.addf %334, %336 : vector<8x512xf32>
    %338 = vector.extract_strided_slice %337 {offsets = [0, 0], sizes = [8, 384], strides = [1, 1]} : vector<8x512xf32> to vector<8x384xf32>
    %cst_117 = arith.constant 5.000000e-01 : f32
    %339 = vector.broadcast %cst_117 : f32 to vector<8x384xf32>
    %340 = arith.mulf %339, %338 : vector<8x384xf32>
    %341 = math.tanh %340 : vector<8x384xf32>
    %cst_118 = arith.constant 1.000000e+00 : f32
    %342 = vector.broadcast %cst_118 : f32 to vector<8x384xf32>
    %343 = arith.addf %341, %342 : vector<8x384xf32>
    %cst_119 = arith.constant 5.000000e-01 : f32
    %344 = vector.broadcast %cst_119 : f32 to vector<8x384xf32>
    %345 = arith.mulf %344, %343 : vector<8x384xf32>
    %346 = vector.extract_strided_slice %345 {offsets = [0, 0], sizes = [8, 128], strides = [1, 1]} : vector<8x384xf32> to vector<8x128xf32>
    %347 = vector.extract_strided_slice %345 {offsets = [0, 128], sizes = [8, 128], strides = [1, 1]} : vector<8x384xf32> to vector<8x128xf32>
    %348 = vector.extract_strided_slice %345 {offsets = [0, 256], sizes = [8, 128], strides = [1, 1]} : vector<8x384xf32> to vector<8x128xf32>
    %349 = vector.extract_strided_slice %337 {offsets = [0, 384], sizes = [8, 128], strides = [1, 1]} : vector<8x512xf32> to vector<8x128xf32>
    %350 = math.tanh %349 : vector<8x128xf32>
    %351 = arith.mulf %347, %329 : vector<8x128xf32>
    %352 = arith.mulf %346, %350 : vector<8x128xf32>
    %353 = arith.addf %351, %352 : vector<8x128xf32>
    %354 = math.tanh %353 : vector<8x128xf32>
    %355 = arith.mulf %348, %354 : vector<8x128xf32>
    %c4_i32_120 = arith.constant 4 : i32
    %356 = arith.index_cast %c4_i32_120 : i32 to index
    %c0_121 = arith.constant 0 : index
    %c0_122 = arith.constant 0 : index
    %357 = vector.load %arg11[%356, %c0_121, %c0_122] : memref<8x8x512xf32, #tpu.memory_space<vmem>>, vector<1x8x512xf32>
    %358 = vector.shape_cast %357 : vector<1x8x512xf32> to vector<8x512xf32>
    %359 = arith.truncf %355 : vector<8x128xf32> to vector<8x128xbf16>
    %cst_123 = arith.constant dense<0.000000e+00> : vector<8x512xf32>
    %360 = tpu.matmul %359, %247, %cst_123 {dimension_numbers = #tpu.dot_dimension_numbers<[1], [0], [0], [1], [0, 0, 1, 1], [], []>} : vector<8x128xbf16>, vector<128x512xbf16>, vector<8x512xf32> -> vector<8x512xf32>
    %361 = arith.addf %358, %360 : vector<8x512xf32>
    %362 = vector.extract_strided_slice %361 {offsets = [0, 0], sizes = [8, 384], strides = [1, 1]} : vector<8x512xf32> to vector<8x384xf32>
    %cst_124 = arith.constant 5.000000e-01 : f32
    %363 = vector.broadcast %cst_124 : f32 to vector<8x384xf32>
    %364 = arith.mulf %363, %362 : vector<8x384xf32>
    %365 = math.tanh %364 : vector<8x384xf32>
    %cst_125 = arith.constant 1.000000e+00 : f32
    %366 = vector.broadcast %cst_125 : f32 to vector<8x384xf32>
    %367 = arith.addf %365, %366 : vector<8x384xf32>
    %cst_126 = arith.constant 5.000000e-01 : f32
    %368 = vector.broadcast %cst_126 : f32 to vector<8x384xf32>
    %369 = arith.mulf %368, %367 : vector<8x384xf32>
    %370 = vector.extract_strided_slice %369 {offsets = [0, 0], sizes = [8, 128], strides = [1, 1]} : vector<8x384xf32> to vector<8x128xf32>
    %371 = vector.extract_strided_slice %369 {offsets = [0, 128], sizes = [8, 128], strides = [1, 1]} : vector<8x384xf32> to vector<8x128xf32>
    %372 = vector.extract_strided_slice %369 {offsets = [0, 256], sizes = [8, 128], strides = [1, 1]} : vector<8x384xf32> to vector<8x128xf32>
    %373 = vector.extract_strided_slice %361 {offsets = [0, 384], sizes = [8, 128], strides = [1, 1]} : vector<8x512xf32> to vector<8x128xf32>
    %374 = math.tanh %373 : vector<8x128xf32>
    %375 = arith.mulf %371, %353 : vector<8x128xf32>
    %376 = arith.mulf %370, %374 : vector<8x128xf32>
    %377 = arith.addf %375, %376 : vector<8x128xf32>
    %378 = math.tanh %377 : vector<8x128xf32>
    %379 = arith.mulf %372, %378 : vector<8x128xf32>
    %c5_i32_127 = arith.constant 5 : i32
    %380 = arith.index_cast %c5_i32_127 : i32 to index
    %c0_128 = arith.constant 0 : index
    %c0_129 = arith.constant 0 : index
    %381 = vector.load %arg11[%380, %c0_128, %c0_129] : memref<8x8x512xf32, #tpu.memory_space<vmem>>, vector<1x8x512xf32>
    %382 = vector.shape_cast %381 : vector<1x8x512xf32> to vector<8x512xf32>
    %383 = arith.truncf %379 : vector<8x128xf32> to vector<8x128xbf16>
    %cst_130 = arith.constant dense<0.000000e+00> : vector<8x512xf32>
    %384 = tpu.matmul %383, %247, %cst_130 {dimension_numbers = #tpu.dot_dimension_numbers<[1], [0], [0], [1], [0, 0, 1, 1], [], []>} : vector<8x128xbf16>, vector<128x512xbf16>, vector<8x512xf32> -> vector<8x512xf32>
    %385 = arith.addf %382, %384 : vector<8x512xf32>
    %386 = vector.extract_strided_slice %385 {offsets = [0, 0], sizes = [8, 384], strides = [1, 1]} : vector<8x512xf32> to vector<8x384xf32>
    %cst_131 = arith.constant 5.000000e-01 : f32
    %387 = vector.broadcast %cst_131 : f32 to vector<8x384xf32>
    %388 = arith.mulf %387, %386 : vector<8x384xf32>
    %389 = math.tanh %388 : vector<8x384xf32>
    %cst_132 = arith.constant 1.000000e+00 : f32
    %390 = vector.broadcast %cst_132 : f32 to vector<8x384xf32>
    %391 = arith.addf %389, %390 : vector<8x384xf32>
    %cst_133 = arith.constant 5.000000e-01 : f32
    %392 = vector.broadcast %cst_133 : f32 to vector<8x384xf32>
    %393 = arith.mulf %392, %391 : vector<8x384xf32>
    %394 = vector.extract_strided_slice %393 {offsets = [0, 0], sizes = [8, 128], strides = [1, 1]} : vector<8x384xf32> to vector<8x128xf32>
    %395 = vector.extract_strided_slice %393 {offsets = [0, 128], sizes = [8, 128], strides = [1, 1]} : vector<8x384xf32> to vector<8x128xf32>
    %396 = vector.extract_strided_slice %393 {offsets = [0, 256], sizes = [8, 128], strides = [1, 1]} : vector<8x384xf32> to vector<8x128xf32>
    %397 = vector.extract_strided_slice %385 {offsets = [0, 384], sizes = [8, 128], strides = [1, 1]} : vector<8x512xf32> to vector<8x128xf32>
    %398 = math.tanh %397 : vector<8x128xf32>
    %399 = arith.mulf %395, %377 : vector<8x128xf32>
    %400 = arith.mulf %394, %398 : vector<8x128xf32>
    %401 = arith.addf %399, %400 : vector<8x128xf32>
    %402 = math.tanh %401 : vector<8x128xf32>
    %403 = arith.mulf %396, %402 : vector<8x128xf32>
    %c6_i32_134 = arith.constant 6 : i32
    %404 = arith.index_cast %c6_i32_134 : i32 to index
    %c0_135 = arith.constant 0 : index
    %c0_136 = arith.constant 0 : index
    %405 = vector.load %arg11[%404, %c0_135, %c0_136] : memref<8x8x512xf32, #tpu.memory_space<vmem>>, vector<1x8x512xf32>
    %406 = vector.shape_cast %405 : vector<1x8x512xf32> to vector<8x512xf32>
    %407 = arith.truncf %403 : vector<8x128xf32> to vector<8x128xbf16>
    %cst_137 = arith.constant dense<0.000000e+00> : vector<8x512xf32>
    %408 = tpu.matmul %407, %247, %cst_137 {dimension_numbers = #tpu.dot_dimension_numbers<[1], [0], [0], [1], [0, 0, 1, 1], [], []>} : vector<8x128xbf16>, vector<128x512xbf16>, vector<8x512xf32> -> vector<8x512xf32>
    %409 = arith.addf %406, %408 : vector<8x512xf32>
    %410 = vector.extract_strided_slice %409 {offsets = [0, 0], sizes = [8, 384], strides = [1, 1]} : vector<8x512xf32> to vector<8x384xf32>
    %cst_138 = arith.constant 5.000000e-01 : f32
    %411 = vector.broadcast %cst_138 : f32 to vector<8x384xf32>
    %412 = arith.mulf %411, %410 : vector<8x384xf32>
    %413 = math.tanh %412 : vector<8x384xf32>
    %cst_139 = arith.constant 1.000000e+00 : f32
    %414 = vector.broadcast %cst_139 : f32 to vector<8x384xf32>
    %415 = arith.addf %413, %414 : vector<8x384xf32>
    %cst_140 = arith.constant 5.000000e-01 : f32
    %416 = vector.broadcast %cst_140 : f32 to vector<8x384xf32>
    %417 = arith.mulf %416, %415 : vector<8x384xf32>
    %418 = vector.extract_strided_slice %417 {offsets = [0, 0], sizes = [8, 128], strides = [1, 1]} : vector<8x384xf32> to vector<8x128xf32>
    %419 = vector.extract_strided_slice %417 {offsets = [0, 128], sizes = [8, 128], strides = [1, 1]} : vector<8x384xf32> to vector<8x128xf32>
    %420 = vector.extract_strided_slice %417 {offsets = [0, 256], sizes = [8, 128], strides = [1, 1]} : vector<8x384xf32> to vector<8x128xf32>
    %421 = vector.extract_strided_slice %409 {offsets = [0, 384], sizes = [8, 128], strides = [1, 1]} : vector<8x512xf32> to vector<8x128xf32>
    %422 = math.tanh %421 : vector<8x128xf32>
    %423 = arith.mulf %419, %401 : vector<8x128xf32>
    %424 = arith.mulf %418, %422 : vector<8x128xf32>
    %425 = arith.addf %423, %424 : vector<8x128xf32>
    %426 = math.tanh %425 : vector<8x128xf32>
    %427 = arith.mulf %420, %426 : vector<8x128xf32>
    %c7_i32_141 = arith.constant 7 : i32
    %428 = arith.index_cast %c7_i32_141 : i32 to index
    %c0_142 = arith.constant 0 : index
    %c0_143 = arith.constant 0 : index
    %429 = vector.load %arg11[%428, %c0_142, %c0_143] : memref<8x8x512xf32, #tpu.memory_space<vmem>>, vector<1x8x512xf32>
    %430 = vector.shape_cast %429 : vector<1x8x512xf32> to vector<8x512xf32>
    %431 = arith.truncf %427 : vector<8x128xf32> to vector<8x128xbf16>
    %cst_144 = arith.constant dense<0.000000e+00> : vector<8x512xf32>
    %432 = tpu.matmul %431, %247, %cst_144 {dimension_numbers = #tpu.dot_dimension_numbers<[1], [0], [0], [1], [0, 0, 1, 1], [], []>} : vector<8x128xbf16>, vector<128x512xbf16>, vector<8x512xf32> -> vector<8x512xf32>
    %433 = arith.addf %430, %432 : vector<8x512xf32>
    %434 = vector.extract_strided_slice %433 {offsets = [0, 0], sizes = [8, 384], strides = [1, 1]} : vector<8x512xf32> to vector<8x384xf32>
    %cst_145 = arith.constant 5.000000e-01 : f32
    %435 = vector.broadcast %cst_145 : f32 to vector<8x384xf32>
    %436 = arith.mulf %435, %434 : vector<8x384xf32>
    %437 = math.tanh %436 : vector<8x384xf32>
    %cst_146 = arith.constant 1.000000e+00 : f32
    %438 = vector.broadcast %cst_146 : f32 to vector<8x384xf32>
    %439 = arith.addf %437, %438 : vector<8x384xf32>
    %cst_147 = arith.constant 5.000000e-01 : f32
    %440 = vector.broadcast %cst_147 : f32 to vector<8x384xf32>
    %441 = arith.mulf %440, %439 : vector<8x384xf32>
    %442 = vector.extract_strided_slice %441 {offsets = [0, 0], sizes = [8, 128], strides = [1, 1]} : vector<8x384xf32> to vector<8x128xf32>
    %443 = vector.extract_strided_slice %441 {offsets = [0, 128], sizes = [8, 128], strides = [1, 1]} : vector<8x384xf32> to vector<8x128xf32>
    %444 = vector.extract_strided_slice %441 {offsets = [0, 256], sizes = [8, 128], strides = [1, 1]} : vector<8x384xf32> to vector<8x128xf32>
    %445 = vector.extract_strided_slice %433 {offsets = [0, 384], sizes = [8, 128], strides = [1, 1]} : vector<8x512xf32> to vector<8x128xf32>
    %446 = math.tanh %445 : vector<8x128xf32>
    %447 = arith.mulf %443, %425 : vector<8x128xf32>
    %448 = arith.mulf %442, %446 : vector<8x128xf32>
    %449 = arith.addf %447, %448 : vector<8x128xf32>
    %450 = math.tanh %449 : vector<8x128xf32>
    %451 = arith.mulf %444, %450 : vector<8x128xf32>
    %c8_i32_148 = arith.constant 8 : i32
    %452 = arith.truncf %451 : vector<8x128xf32> to vector<8x128xbf16>
    %c0_149 = arith.constant 0 : index
    %c0_150 = arith.constant 0 : index
    %453 = vector.load %arg8[%c0_149, %c0_150] : memref<128x128xbf16, #tpu.memory_space<vmem>>, vector<128x128xbf16>
    %cst_151 = arith.constant dense<0.000000e+00> : vector<8x128xf32>
    %454 = tpu.matmul %452, %453, %cst_151 {dimension_numbers = #tpu.dot_dimension_numbers<[1], [0], [0], [1], [0, 0, 1, 1], [], []>} : vector<8x128xbf16>, vector<128x128xbf16>, vector<8x128xf32> -> vector<8x128xf32>
    %c0_152 = arith.constant 0 : index
    %c0_153 = arith.constant 0 : index
    %455 = vector.load %arg9[%c0_152, %c0_153] : memref<1x128xf32, #tpu.memory_space<vmem>>, vector<1x128xf32>
    %456 = vector.broadcast %455 : vector<1x128xf32> to vector<8x128xf32>
    %457 = arith.addf %454, %456 : vector<8x128xf32>
    %c0_154 = arith.constant 0 : index
    %c0_155 = arith.constant 0 : index
    %458 = vector.load %arg10[%c0_154, %c0_155] : memref<8x128xf32, #tpu.memory_space<vmem>>, vector<8x128xf32>
    tpu.vector_store %arg10[%c0_154, %c0_155], %457 {strides = array<i32>} : memref<8x128xf32, #tpu.memory_space<vmem>>, vector<8x128xf32>,
    return
  }
  func.func @transform_0(%arg0: i32) -> (i32, i32, i32) {
    %c0_i32 = arith.constant 0 : i32
    %c0_i32_0 = arith.constant 0 : i32
    %c0_i32_1 = arith.constant 0 : i32
    return %arg0, %c0_i32, %c0_i32_0 : i32, i32, i32
  }
  func.func @transform_1(%arg0: i32) -> (i32, i32) {
    %c0_i32 = arith.constant 0 : i32
    %c0_i32_0 = arith.constant 0 : i32
    %c0_i32_1 = arith.constant 0 : i32
    return %c0_i32, %c0_i32_0 : i32, i32
  }
  func.func @transform_2(%arg0: i32) -> (i32, i32) {
    %c0_i32 = arith.constant 0 : i32
    %c0_i32_0 = arith.constant 0 : i32
    %c0_i32_1 = arith.constant 0 : i32
    return %c0_i32, %c0_i32_0 : i32, i32
  }
  func.func @transform_3(%arg0: i32) -> (i32, i32) {
    %c0_i32 = arith.constant 0 : i32
    %c0_i32_0 = arith.constant 0 : i32
    %c0_i32_1 = arith.constant 0 : i32
    return %c0_i32, %c0_i32_0 : i32, i32
  }
  func.func @transform_4(%arg0: i32) -> (i32, i32) {
    %c0_i32 = arith.constant 0 : i32
    %c0_i32_0 = arith.constant 0 : i32
    %c0_i32_1 = arith.constant 0 : i32
    return %c0_i32, %c0_i32_0 : i32, i32
  }
  func.func @transform_5(%arg0: i32) -> (i32, i32) {
    %c0_i32 = arith.constant 0 : i32
    %c0_i32_0 = arith.constant 0 : i32
    %c0_i32_1 = arith.constant 0 : i32
    return %c0_i32, %c0_i32_0 : i32, i32
  }
  func.func @transform_6(%arg0: i32) -> (i32, i32) {
    %c0_i32 = arith.constant 0 : i32
    %c0_i32_0 = arith.constant 0 : i32
    %c0_i32_1 = arith.constant 0 : i32
    return %c0_i32, %c0_i32_0 : i32, i32
  }
  func.func @transform_7(%arg0: i32) -> (i32, i32) {
    %c0_i32 = arith.constant 0 : i32
    %c0_i32_0 = arith.constant 0 : i32
    %c0_i32_1 = arith.constant 0 : i32
    return %c0_i32, %c0_i32_0 : i32, i32
  }
  func.func @transform_8(%arg0: i32) -> (i32, i32) {
    %c0_i32 = arith.constant 0 : i32
    %c0_i32_0 = arith.constant 0 : i32
    %c0_i32_1 = arith.constant 0 : i32
    return %c0_i32, %c0_i32_0 : i32, i32
  }
  func.func @transform_9(%arg0: i32) -> (i32, i32) {
    %c0_i32 = arith.constant 0 : i32
    %c0_i32_0 = arith.constant 0 : i32
    return %arg0, %c0_i32 : i32, i32
  }
}

</mosaic_0001>

<bundles_post_ra>
// kernel: tpu_custom_call.1
= control target key start
LH: loop header
LB: loop body
LE: loop exit
PB: predicated region body
PF: predicated region fallthrough
CT: control target
= control target key end

     0   :  { %s6786_s0 = inlined_call_operand.hbm [shape: f32[16,8,28], index: 0, kind: input, shape index: {}]   ;;  %s6787_s1 = inlined_call_operand.hbm [shape: bf16[28,512], index: 1, kind: input, shape index: {}]   ;;  %s6788_s2 = inlined_call_operand.hbm [shape: bf16[128,512], index: 2, kind: input, shape index: {}]   ;;  %s6789_s3 = inlined_call_operand.vmem [shape: f32[1,512], index: 3, kind: input, shape index: {}]   ;;  %s6790_s4 = inlined_call_operand.hbm [shape: bf16[128,512], index: 4, kind: input, shape index: {}]   ;;  %s6791_s5 = inlined_call_operand.hbm [shape: bf16[128,512], index: 5, kind: input, shape index: {}]   ;;  %s6792_s6 = inlined_call_operand.vmem [shape: f32[1,512], index: 6, kind: input, shape index: {}]   ;;  %s6793_s7 = inlined_call_operand.hbm [shape: bf16[128,128], index: 7, kind: input, shape index: {}]   ;;  %s6794_s8 = inlined_call_operand.vmem [shape: f32[1,128], index: 8, kind: input, shape index: {}]   ;;  %s6795_s9 = inlined_call_operand.hbm [shape: f32[16,128], index: 9, kind: output, shape index: {}]  }
   0x1   :  { %6830 = sst [smem:[#allocation49_spill]] %s6787_s1 }
   0x2   :  { %6831 = sst [smem:[#allocation50_spill]] %s6795_s9 }
   0x3   :  { %14 = vsyncpa [#allocation5], 0 }
   0x4   :  { %16 = vsyncpa [#allocation5 + $0x1], 0 }
   0x5   :  { %17 = vsyncpa [#allocation8], 0 }
   0x6   :  { %18 = vsyncpa [#allocation11], 0 }
   0x7   :  { %19 = vsyncpa [#allocation14], 0 }
   0x8   :  { %20 = vsyncpa [#allocation6], 0 }
   0x9   :  { %22 = vsyncpa [#allocation6 + $0x1], 0  ;;  %s5132_s30 = smov 0   ;;  %s5134_s10 = smov 0  }
   0xa   :  { %s5136_s11 = smov 0   ;;  %s5138_s12 = smov 0  }
   0xb LB: > { %s5064_s13 = smov [#allocation7]   ;;  %s5153_s15 = sadd.s32 4294967295, %s5062_s12   ;;  %s5062_s12 = sphi %s5138_s12, %s6971_s12   ;;  %s5058_s11 = sphi %s5136_s11, %s6970_s11   ;;  %s5054_s10 = sphi %s5134_s10, %s6969_s10   ;;  %s5050_s30 = sphi %s5132_s30, %s6968_s30  }
   0xc   : > { %s265_s14 = sshll.u32 %s5064_s13, 4  ;;  %p4135_p0 = scmp.ge.s32.totalorder %s5062_s12, 1  ;;  %s5158_s14 = int_to_ptr.vmem [resolvable:$true] %s265_s14 }
   0xd   : > { %p6797_p1 = scmp.eq.s32.totalorder %s5153_s15, 0  ;;  %p253_p2 = scmp.lt.s32.totalorder %s5062_s12, 3 }
   0xe   : > { %s5065_s17 = smov [#allocation10]   ;;  %s5066_s20 = smov [#allocation9]  }
   0xf   : > { %p5160_p3 = pnand %p4135_p0, %p253_p2  ;;  %s294_s18 = sshll.u32 %s5065_s17, 4  ;;  %s5173_s18 = int_to_ptr.vmem [resolvable:$true] %s294_s18 }
  0x10   : > { %s278_s21 = sshll.u32 %s5066_s20, 4  ;;  %s6834_s1 = sld [smem:[#allocation49_spill]]  ;;  %s5175_s21 = int_to_ptr.vmem [resolvable:$true] %s278_s21 }
  0x11   : > { %s6832_s16 = scalar_select %p5160_p3, 1, 0 }
  0x12   : > { %p4338_p5 = pneg %p5160_p3 }
  0x14   : > { %p5169_p6 = pnand %p4338_p5, %p6797_p1 }
  0x16   : > { %s4814_s24 = scalar_lea.hbm %s6834_s1, 1024  ;;  %p5185_p8 = pneg %p5169_p6 }
  0x17   : > { %p4815_p7 = scmp.ne.s32.totalorder %s6834_s1, %s4814_s24  ;;  %p4821_p11 = scmp.lt.u32.totalorder %s4814_s24, %s6834_s1 }
  0x19   : > { %p4817_p9 = pnand %p5185_p8, %p4815_p7 }
  0x1b   : > { %p4818_p10 = pneg %p4817_p9 }
  0x1d   : > { %p4823_p12 = pnand %p4821_p11, %p4818_p10 }
  0x1f   : > { %4826 = shalt.err (!%p4823_p12)
}
  0x20   : > { %s4827_s13 = scalar_lea.vmem %s5158_s14, 1024  ;;  %p4835_p5 = scmp.lt.s32.totalorder %s5158_s14, %s5158_s14 }
  0x21   : > { %p4828_p13 = scmp.ne.s32.totalorder %s5158_s14, %s4827_s13  ;;  %p4836_p4 = scmp.lt.s32.totalorder %s4827_s13, %s4827_s13 }
  0x23   : > { %p4830_p0 = pnand %p4828_p13, %p5185_p8  ;;  %p4837_p7 = por %p4836_p4, %p4835_p5 }
  0x25   : > { %p4831_p2 = pneg %p4830_p0 }
  0x27   : > { %p4838_p9 = pnand %p4837_p7, %p4831_p2 }
  0x29   : > { %4841 = shalt.err (!%p4838_p9)
}
  0x2a   : > { %s5067_s17 = smov 256   ;;  %s5068_s20 = smov 16  }
  0x2b   : > { %4341 = dma.hbm_to_vmem [thread:$0]  (!%p5169_p6), %s6834_s1, 1024, %s5158_s14, [#allocation8], %s5067_s17, %s5067_s17, %s5068_s20  }
  0x2c   : > { %s4842_s26 = scalar_lea.hbm %s6790_s4, 4096 }
  0x2d   : > { %p4843_p4 = scmp.ne.s32.totalorder %s6790_s4, %s4842_s26  ;;  %p4849_p12 = scmp.lt.u32.totalorder %s4842_s26, %s6790_s4 }
  0x2f   : > { %p4845_p10 = pnand %p4843_p4, %p5185_p8 }
  0x31   : > { %p4846_p11 = pneg %p4845_p10 }
  0x33   : > { %p4851_p13 = pnand %p4849_p12, %p4846_p11 }
  0x35   : > { %4854 = shalt.err (!%p4851_p13)
}
  0x36   : > { %s4855_s14 = scalar_lea.vmem %s5173_s18, 4096  ;;  %p4863_p7 = scmp.lt.s32.totalorder %s5173_s18, %s5173_s18 }
  0x37   : > { %p4856_p0 = scmp.ne.s32.totalorder %s5173_s18, %s4855_s14  ;;  %p4864_p9 = scmp.lt.s32.totalorder %s4855_s14, %s4855_s14 }
  0x39   : > { %p4858_p2 = pnand %p4856_p0, %p5185_p8  ;;  %p4865_p4 = por %p4864_p9, %p4863_p7 }
  0x3b   : > { %p4859_p5 = pneg %p4858_p2 }
  0x3d   : > { %p4866_p10 = pnand %p4865_p4, %p4859_p5 }
  0x3f   : > { %4869 = shalt.err (!%p4866_p10)
}
  0x40   : > { %4347 = dma.hbm_to_vmem [thread:$0]  (!%p5169_p6), %s6790_s4, 4096, %s5173_s18, [#allocation11], %s5067_s17, %s5067_s17, %s5068_s20  }
  0x41   : > { %s4870_s25 = scalar_lea.hbm %s6788_s2, 4096 }
  0x42   : > { %p4871_p11 = scmp.ne.s32.totalorder %s6788_s2, %s4870_s25  ;;  %p4877_p0 = scmp.lt.u32.totalorder %s4870_s25, %s6788_s2 }
  0x44   : > { %p4873_p12 = pnand %p4871_p11, %p5185_p8 }
  0x46   : > { %p4874_p13 = pneg %p4873_p12 }
  0x48   : > { %p4879_p2 = pnand %p4877_p0, %p4874_p13 }
  0x4a   : > { %4882 = shalt.err (!%p4879_p2)
}
  0x4b   : > { %s4883_s18 = scalar_lea.vmem %s5175_s21, 4096  ;;  %p4891_p4 = scmp.lt.s32.totalorder %s5175_s21, %s5175_s21 }
  0x4c   : > { %p4884_p5 = scmp.ne.s32.totalorder %s5175_s21, %s4883_s18  ;;  %p4892_p10 = scmp.lt.s32.totalorder %s4883_s18, %s4883_s18 }
  0x4e   : > { %p4886_p7 = pnand %p4884_p5, %p5185_p8  ;;  %p4893_p11 = por %p4892_p10, %p4891_p4 }
  0x50   : > { %p4887_p9 = pneg %p4886_p7 }
  0x52   : > { %p4894_p12 = pnand %p4893_p11, %p4887_p9 }
  0x54   : > { %4897 = shalt.err (!%p4894_p12)
}
  0x55   : > { %4344 = dma.hbm_to_vmem [thread:$0]  (!%p5169_p6), %s6788_s2, 4096, %s5175_s21, [#allocation8], %s5067_s17, %s5067_s17, %s5068_s20  }
  0x56   : > { %s5069_s22 = smov [#allocation12]   ;;  %s5070_s24 = smov [#allocation13]  }
  0x57   : > { %s307_s23 = sshll.u32 %s5069_s22, 4  ;;  %s323_s25 = sshll.u32 %s5070_s24, 4  ;;  %s308_s23 = int_to_ptr.vmem [resolvable:$true] %s307_s23  ;;  %s324_s25 = int_to_ptr.vmem [resolvable:$true] %s323_s25 }
  0x58   : > { %s4898_s29 = scalar_lea.hbm %s6791_s5, 4096 }
  0x59   : > { %p4899_p13 = scmp.ne.s32.totalorder %s6791_s5, %s4898_s29  ;;  %p4905_p5 = scmp.lt.u32.totalorder %s4898_s29, %s6791_s5 }
  0x5b   : > { %p4901_p0 = pnand %p4899_p13, %p5185_p8 }
  0x5d   : > { %p4902_p2 = pneg %p4901_p0 }
  0x5f   : > { %p4907_p7 = pnand %p4905_p5, %p4902_p2 }
  0x61   : > { %4910 = shalt.err (!%p4907_p7)
}
  0x62   : > { %s4911_s21 = scalar_lea.vmem %s308_s23, 4096  ;;  %p4919_p11 = scmp.lt.s32.totalorder %s308_s23, %s308_s23 }
  0x63   : > { %p4912_p9 = scmp.ne.s32.totalorder %s308_s23, %s4911_s21  ;;  %p4920_p12 = scmp.lt.s32.totalorder %s4911_s21, %s4911_s21 }
  0x65   : > { %p4914_p4 = pnand %p4912_p9, %p5185_p8  ;;  %p4921_p1 = por %p4920_p12, %p4919_p11 }
  0x67   : > { %p4915_p10 = pneg %p4914_p4 }
  0x69   : > { %p4922_p3 = pnand %p4921_p1, %p4915_p10 }
  0x6b   : > { %4925 = shalt.err (!%p4922_p3)
}
  0x6c   : > { %4350 = dma.hbm_to_vmem [thread:$0]  (!%p5169_p6), %s6791_s5, 4096, %s308_s23, [#allocation11], %s5067_s17, %s5067_s17, %s5068_s20  }
  0x6d   : > { %s4926_s26 = scalar_lea.hbm %s6793_s7, 1024 }
  0x6e   : > { %p4927_p1 = scmp.ne.s32.totalorder %s6793_s7, %s4926_s26  ;;  %p4933_p0 = scmp.lt.u32.totalorder %s4926_s26, %s6793_s7 }
  0x70   : > { %p4929_p3 = pnand %p4927_p1, %p5185_p8 }
  0x72   : > { %p4930_p13 = pneg %p4929_p3 }
  0x74   : > { %p4935_p2 = pnand %p4933_p0, %p4930_p13 }
  0x76   : > { %4938 = shalt.err (!%p4935_p2)
}
  0x77   : > { %s4939_s14 = scalar_lea.vmem %s324_s25, 1024  ;;  %p4947_p4 = scmp.lt.s32.totalorder %s324_s25, %s324_s25 }
  0x78   : > { %p4940_p5 = scmp.ne.s32.totalorder %s324_s25, %s4939_s14  ;;  %p4948_p10 = scmp.lt.s32.totalorder %s4939_s14, %s4939_s14 }
  0x7a   : > { %p4942_p7 = pnand %p4940_p5, %p5185_p8  ;;  %p4949_p11 = por %p4948_p10, %p4947_p4 }
  0x7c   : > { %p4943_p9 = pneg %p4942_p7 }
  0x7e   : > { %p4950_p12 = pnand %p4949_p11, %p4943_p9 }
  0x80   : > { %4953 = shalt.err (!%p4950_p12)
}
  0x81   : > { %s5071_s17 = smov 64   ;;  %s5072_s27 = smov 4  }
  0x82   : > { %4353 = dma.hbm_to_vmem [thread:$0]  (!%p5169_p6), %s6793_s7, 1024, %s324_s25, [#allocation14], %s5071_s17, %s5071_s17, %s5072_s27  }
  0x83   : > { %s4134_s21 = sadd.s32 4294967294, %s5062_s12   ;;  %s5302_s1 = sadd.s32 1, %s5062_s12  }
  0x84   : > { %s35_s9 = sadd.s32 1, %s5058_s11  ;;  %s32_s22 = ssub.s32 %s5062_s12, %s5302_s1 }
  0x85   : > { %p42_p8 = scmp.ne.s32.totalorder %s5058_s11, %s5054_s10  ;;  %p33_p1 = scmp.eq.s32.totalorder %s32_s22, 0 }
  0x86   : > { %p43_p3 = scmp.eq.s32.totalorder %s5062_s12, 0  ;;  %p48_p13 = scmp.ne.s32.totalorder %s5054_s10, %s5050_s30 }
  0x87   : > { %p240_p0 = scmp.eq.s32.totalorder %s5153_s15, 1  ;;  %p6836_p5 = scmp.eq.s32.totalorder %s5153_s15, 0 }
  0x88   : > { %s5314_s24 = scalar_select %p33_p1, %s5058_s11, %s35_s9  }
  0x89   : > { %p44_p2 = por %p43_p3, %p42_p8  ;;  %p5318_p7 = por %p6836_p5, %p48_p13 }
  0x8a   : > { %p5322_p6 = por %p240_p0, %p42_p8  ;;  %p246_p9 = scmp.eq.s32.totalorder %s4134_s21, 1 }
  0x8b   : > { %p4367_p4 = scmp.lt.s32.totalorder %s5062_s12, 2  ;;  %s340_s26 = sand.u32 1, %s5058_s11  }
  0x8c   : > { %s6838_s25 = scalar_select %p5322_p6, 1, 0 }
  0x8d   : > { %p5328_p10 = por %p246_p9, %p48_p13  ;;  %s4142_s29 = sshll.u32 %s340_s26, 6 }
  0x8e   : > { %s4284_s13 = sshll.u32 %s5062_s12, 10  ;;  %s344_s27 = scalar_lea.vmem [#allocation4], %s4142_s29 }
  0x8f   : > { %s6839_s28 = scalar_select %p5328_p10, 1, 0 }
  0x90   : > { %s5336_s17 = scalar_lea.hbm %s6786_s0, %s4284_s13  ;;  %s351_s20 = sshll.u32 %s344_s27, 4  ;;  %s5342_s20 = int_to_ptr.vmem [resolvable:$true] %s351_s20 }
  0x91   : > { %p5338_p11 = pnand %p4367_p4, %p44_p2  ;;  %s5344_s21 = scalar_lea.sflag [#allocation5], %s340_s26 }
  0x92   : > { %s4954_s9 = scalar_lea.hbm %s5336_s17, 1024  ;;  %s4959_s13 = scalar_lea.hbm %s6786_s0, 2048 }
  0x93   : > { %p4955_p12 = scmp.ne.s32.totalorder %s5336_s17, %s4954_s9  ;;  %p4956_p8 = pneg %p5338_p11 }
  0x94   : > { %p4960_p13 = scmp.lt.u32.totalorder %s5336_s17, %s6786_s0  ;;  %p4961_p0 = scmp.lt.u32.totalorder %s4959_s13, %s4954_s9 }
  0x95   : > { %p4957_p1 = pnand %p4956_p8, %p4955_p12  ;;  %p4963_p5 = scmp.lt.u32.totalorder %s4954_s9, %s5336_s17 }
  0x96   : > { %p4962_p2 = por %p4961_p0, %p4960_p13 }
  0x97   : > { %p4958_p3 = pneg %p4957_p1 }
  0x98   : > { %p4964_p9 = por %p4963_p5, %p4962_p2 }
  0x9a   : > { %p4965_p4 = pnand %p4964_p9, %p4958_p3 }
  0x9c   : > { %4968 = shalt.err (!%p4965_p4)
}
  0x9d   : > { %s4969_s26 = scalar_lea.vmem %s5342_s20, 1024  ;;  %s5073_s27 = smov [#allocation4]  }
  0x9e   : > { %p4970_p12 = scmp.ne.s32.totalorder %s5342_s20, %s4969_s26  ;;  %s4974_s22 = sshll.u32 %s5073_s27, 4  ;;  %s4975_s22 = int_to_ptr.vmem [resolvable:$false] %s4974_s22 }
  0x9f   : > { %s4976_s29 = scalar_lea.vmem %s4975_s22, 2048  ;;  %p4977_p6 = scmp.lt.s32.totalorder %s5342_s20, %s4975_s22 }
  0xa0   : > { %p4972_p1 = pnand %p4970_p12, %p4956_p8  ;;  %p4978_p13 = scmp.lt.s32.totalorder %s4976_s29, %s4969_s26 }
  0xa2   : > { %p4973_p10 = pneg %p4972_p1  ;;  %p4979_p0 = por %p4978_p13, %p4977_p6 }
  0xa4   : > { %p4980_p2 = pnand %p4979_p0, %p4973_p10 }
  0xa6   : > { %4983 = shalt.err (!%p4980_p2)
}
  0xa7   : > { %s5074_s9 = smov 128   ;;  %s5075_s13 = smov 8  }
  0xa8   : > { %4357 = dma.hbm_to_vmem [thread:$0]  (!%p5338_p11), %s5336_s17, 1024, %s5342_s20, %s5344_s21, %s5074_s9, %s5074_s9, %s5075_s13  }
  0xa9   : > { %p6841_p8 = scmp.ne.s32.totalorder %s6832_s16, 0 }
  0xab   : > { %363 = sbr.rel (%p6841_p8) target bundleno = 4505 (0x1199), region = 56 }
  0xb2   : > { %s5375_s18 = sand.u32 1, %s5054_s10  }
  0xb3   : > { %s4146_s14 = sshll.u32 %s5375_s18, 6  ;;  %s366_s26 = scalar_lea.sflag [#allocation5], %s5375_s18 }
  0xb4   : > { %s5379_s27 = scalar_lea.vmem [#allocation4], %s4146_s14 }
  0xb5   : > { %5029 = dma.done.wait (%p5318_p7), %s366_s26, 1024  }
  0xb6   : > { %5031 = vsyncadd (%p5318_p7), %s366_s26, 4294966272  ;;  %p6842_p6 = scmp.eq.s32.totalorder %s5153_s15, 0 }
  0xb8   : > { %5033 = dma.done.wait (%p6842_p6), [#allocation8], 5120   ;;  %p6843_p10 = pmov %p6842_p6 }
  0xb9   : > { %p6844_p11 = pmov %p6842_p6 }
  0xba   : > { %5035 = vsyncadd (%p6843_p10), [#allocation8], 4294962176 }
  0xbb   : > { %5037 = dma.done.wait (%p6844_p11), [#allocation11], 8192   ;;  %p6845_p3 = pmov %p6842_p6 }
  0xbd   : > { %5039 = vsyncadd (%p6845_p3), [#allocation11], 4294959104  ;;  %p6846_p5 = pmov %p6845_p3 }
  0xbe   : > { %p6847_p9 = pmov %p6845_p3 }
  0xbf   : > { %5041 = dma.done.wait (%p6846_p5), [#allocation14], 1024  }
  0xc0   : > { %5043 = vsyncadd (%p6847_p9), [#allocation14], 4294966272  ;;  %v6804_v0 = vmov 0   ;;  %v4422_v1 = vld [vmem:[#allocation7 + $0x4] ss:$16 sps:$4 sm:$0xff]   ;;  %vm528_vm0 = vcmask 1045504   ;;  %v692_v55 = vlaneseq }
  0xc1   : > { %573 = vmatprep.mubr.bf16.mxu0 %v6804_v0  ;;  %646 = vmatprep.mubr.bf16.mxu1 %v6804_v0  ;;  %v4424_v2 = vld [vmem:[#allocation7 + $0xc] ss:$16 sps:$4 sm:$0xff]   ;;  %v4426_v3 = vld [vmem:[#allocation7] ss:$16 sps:$4 sm:$0xff]   ;;  %v4427_v4 = vld [vmem:[#allocation7 + $0x8] ss:$16 sps:$4 sm:$0xff]  }
  0xc2   : > { %541 = vmatprep.subr.bf16.mxu0 %v4422_v1  ;;  %614 = vmatprep.subr.bf16.mxu1 %v4424_v2  ;;  %v4428_v5 = vld [vmem:[#allocation7 + $0x24] ss:$16 sps:$4 sm:$0x3f]   ;;  %v4430_v6 = vld [vmem:[#allocation7 + $0x2c] ss:$16 sps:$4 sm:$0x3f]  }
  0xc3   : > { %542 = vmatpush1.bf16.msra.mxu0 %v4426_v3  ;;  %615 = vmatpush1.bf16.msra.mxu1 %v4427_v4  ;;  %v459_v7 = vld [vmem:[%s5379_s27] sm:$0xff]  ;;  %v4433_v9 = vld [vmem:[#allocation7 + $0x28] ss:$16 sps:$4 sm:$0x3f]   ;;  %vm515_vm1 = vcmask 228352   ;;  %v461_v19 = vld [vmem:[%s5379_s27 + $0x10] sm:$0xff] }
  0xc4   : > { %4161 = vmatprep.subr.msk.bf16.mxu0 %vm528_vm0, %v4428_v5  ;;  %v4432_v8 = vld [vmem:[#allocation7 + $0x20] ss:$16 sps:$4 sm:$0x3f]   ;;  %4166 = vmatprep.subr.msk.bf16.mxu1 %vm528_vm0, %v4430_v6  ;;  %v460_v10 = vld [vmem:[%s5379_s27 + $0x8] sm:$0xff]  ;;  %v536_v12 = vsel %vm528_vm0, %v4433_v9, 0  ;;  %v462_v20 = vld [vmem:[%s5379_s27 + $0x18] sm:$0xff] }
  0xc5   : > { %v530_v11 = vsel %vm528_vm0, %v4432_v8, 0  ;;  %v467_v13 = vpack.c.bf16 %v460_v10, %v459_v7  ;;  %v5401_v14 = vld [vmem:[#allocation9 + $0x4] ss:$16 sps:$4 sm:$0xff]   ;;  %v5403_v15 = vld [vmem:[#allocation9] ss:$16 sps:$4 sm:$0xff]   ;;  %v468_v25 = vpack.c.bf16 %v462_v20, %v461_v19  ;;  %v464_v31 = vld [vmem:[%s5379_s27 + $0x28] sm:$0xff] }
  0xc6   : > { %v5405_v16 = vld [vmem:[#allocation9 + $0xc] ss:$16 sps:$4 sm:$0xff]   ;;  %v5408_v17 = vld [vmem:[#allocation9 + $0x24] ss:$16 sps:$4 sm:$0xff]   ;;  %v5411_v18 = vld [vmem:[#allocation9 + $0x8] ss:$16 sps:$4 sm:$0xff]  }
  0xc7   : > { %544 = vmatpush1.bf16.msra.mxu0 %v530_v11  ;;  %617 = vmatpush1.bf16.msra.mxu1 %v536_v12  ;;  %v5417_v21 = vld [vmem:[#allocation9 + $0x20] ss:$16 sps:$4 sm:$0xff]   ;;  %v5421_v22 = vld [vmem:[#allocation9 + $0x2c] ss:$16 sps:$4 sm:$0xff]   ;;  %v5425_v23 = vld [vmem:[#allocation9 + $0x44] ss:$16 sps:$4 sm:$0xff]  }
  0xc8   : > { %1480 = vmatprep.subr.bf16.mxu0 %v5401_v14  ;;  %1521 = vmatprep.subr.bf16.mxu1 %v5405_v16  ;;  %v5428_v24 = vld [vmem:[#allocation9 + $0x28] ss:$16 sps:$4 sm:$0xff]   ;;  %v5432_v26 = vld [vmem:[#allocation9 + $0x40] ss:$16 sps:$4 sm:$0xff]   ;;  %v5434_v27 = vld [vmem:[#allocation9 + $0x4c] ss:$16 sps:$4 sm:$0xff]  }
  0xc9   : > { %v5437_v28 = vld [vmem:[#allocation9 + $0x64] ss:$16 sps:$4 sm:$0xff]   ;;  %v5440_v29 = vld [vmem:[#allocation9 + $0x48] ss:$16 sps:$4 sm:$0xff]   ;;  %v5446_v32 = vld [vmem:[#allocation9 + $0x6c] ss:$16 sps:$4 sm:$0xff]  }
  0xca   : > { %4162 = vmatmul.mubr.msk.bf16.vlgmr.msra.gmra.mrb[0].mxu0 %vm515_vm1, %v467_v13  ;;  %4167 = vmatmul.mubr.msk.bf16.vlgmr.msra.gmra.mrb[0].mxu1 %vm515_vm1, %v467_v13  ;;  %v463_v30 = vld [vmem:[%s5379_s27 + $0x20] sm:$0xff]  ;;  %6848 = vst [vmem:[#allocation21_spill] sm:$0xff] %v5446_v32  ;;  %v5458_v35 = vld [vmem:[#allocation9 + $0x68] ss:$16 sps:$4 sm:$0xff]   ;;  %v5464_v38 = vld [vmem:[#allocation9 + $0x8c] ss:$16 sps:$4 sm:$0xff]  }
  0xcb   : > { %1481 = vmatpush1.bf16.msra.mxu0 %v5403_v15  ;;  %583 = vmatprep.mubr.bf16.mxu0 %v6804_v0  ;;  %v5450_v33 = vld [vmem:[#allocation9 + $0x60] ss:$16 sps:$4 sm:$0xff]   ;;  %v5454_v34 = vld [vmem:[#allocation9 + $0x84] ss:$16 sps:$4 sm:$0xff]   ;;  %6851 = vst [vmem:[#allocation24_spill] sm:$0xff] %v5458_v35  ;;  %v469_v36 = vpack.c.bf16 %v464_v31, %v463_v30  ;;  %6853 = vst [vmem:[#allocation26_spill] sm:$0xff] %v5464_v38 }
  0xcc   : > { %656 = vmatprep.mubr.bf16.mxu1 %v6804_v0  ;;  %1482 = vmatprep.subr.bf16.mxu0 %v5408_v17  ;;  %6849 = vst [vmem:[#allocation22_spill] sm:$0xff] %v5450_v33  ;;  %6850 = vst [vmem:[#allocation23_spill] sm:$0xff] %v5454_v34  ;;  %v5461_v37 = vld [vmem:[#allocation9 + $0x80] ss:$16 sps:$4 sm:$0xff]   ;;  %v5467_v39 = vld [vmem:[#allocation9 + $0xa4] ss:$16 sps:$4 sm:$0xff]  }
  0xcd   : > { %1522 = vmatpush1.bf16.msra.mxu1 %v5411_v18  ;;  %6852 = vst [vmem:[#allocation25_spill] sm:$0xff] %v5461_v37  ;;  %6854 = vst [vmem:[#allocation27_spill] sm:$0xff] %v5467_v39  ;;  %v5469_v40 = vld [vmem:[#allocation9 + $0x88] ss:$16 sps:$4 sm:$0xff]   ;;  %v465_v41 = vld [vmem:[%s5379_s27 + $0x30] sm:$0xff]  ;;  %v5557_v3 = vshrl.u32 %v692_v55, 7 }
  0xce   : > { %1523 = vmatprep.subr.bf16.mxu1 %v5421_v22  ;;  %6855 = vst [vmem:[#allocation28_spill] sm:$0xff] %v5469_v40  ;;  %v5475_v42 = vld [vmem:[#allocation9 + $0xac] ss:$16 sps:$4 sm:$0xff]   ;;  %v5480_v44 = vld [vmem:[#allocation9 + $0xa0] ss:$16 sps:$4 sm:$0xff]   ;;  %vm5080_vm2 = vmmov 0  }
  0xcf   : > { %1483 = vmatpush1.bf16.msra.mxu0 %v5417_v21  ;;  %6856 = vst [vmem:[#allocation29_spill] sm:$0xff] %v5475_v42  ;;  %v466_v43 = vld [vmem:[%s5379_s27 + $0x38] sm:$0xff]  ;;  %6857 = vst [vmem:[#allocation30_spill] sm:$0xff] %v5480_v44  ;;  %v5484_v45 = vld [vmem:[#allocation9 + $0xc4] ss:$16 sps:$4 sm:$0xff]   ;;  %v6803_v8 = vsub.s32 0, %v5557_v3 }
  0xd0   : > { %1484 = vmatprep.subr.bf16.mxu0 %v5425_v23  ;;  %6858 = vst [vmem:[#allocation31_spill] sm:$0xff] %v5484_v45  ;;  %v5486_v46 = vld [vmem:[#allocation9 + $0xa8] ss:$16 sps:$4 sm:$0xff]   ;;  %v5490_v47 = vld [vmem:[#allocation9 + $0xc0] ss:$16 sps:$4 sm:$0xff]   ;;  %v470_v49 = vpack.c.bf16 %v466_v43, %v465_v41  ;;  %6867 = vst [vmem:[#allocation40_spill] sm:$0xff] %v5557_v3 }
  0xd1   : > { %1524 = vmatpush1.bf16.msra.mxu1 %v5428_v24  ;;  %6859 = vst [vmem:[#allocation32_spill] sm:$0xff] %v5486_v46  ;;  %6860 = vst [vmem:[#allocation33_spill] sm:$0xff] %v5490_v47  ;;  %v5492_v48 = vld [vmem:[#allocation9 + $0xcc] ss:$16 sps:$4 sm:$0xff]   ;;  %v5495_v50 = vld [vmem:[#allocation9 + $0xe4] ss:$16 sps:$4 sm:$0xff]  }
  0xd2   : > { %4163 = vmatmul.mubr.msk.bf16.gmra.mrb[4].mxu0 %vm515_vm1, %v468_v25  ;;  %4168 = vmatmul.mubr.msk.bf16.gmra.mrb[4].mxu1 %vm515_vm1, %v468_v25  ;;  %6861 = vst [vmem:[#allocation34_spill] sm:$0xff] %v5492_v48  ;;  %6862 = vst [vmem:[#allocation35_spill] sm:$0xff] %v5495_v50  ;;  %v5498_v51 = vld [vmem:[#allocation9 + $0xc8] ss:$16 sps:$4 sm:$0xff]   ;;  %v5501_v52 = vld [vmem:[#allocation9 + $0xec] ss:$16 sps:$4 sm:$0xff]  }
  0xd3   : > { %1485 = vmatpush1.bf16.msra.mxu0 %v5432_v26  ;;  %1525 = vmatprep.subr.bf16.mxu1 %v5434_v27  ;;  %6863 = vst [vmem:[#allocation36_spill] sm:$0xff] %v5498_v51  ;;  %6864 = vst [vmem:[#allocation37_spill] sm:$0xff] %v5501_v52  ;;  %v5504_v53 = vld [vmem:[#allocation9 + $0xe0] ss:$16 sps:$4 sm:$0xff]   ;;  %v5510_v54 = vld [vmem:[#allocation9 + $0xe8] ss:$16 sps:$4 sm:$0xff]  }
  0xd4   : > { %593 = vmatprep.mubr.bf16.mxu0 %v6804_v0  ;;  %666 = vmatprep.mubr.bf16.mxu1 %v6804_v0  ;;  %6865 = vst [vmem:[#allocation38_spill] sm:$0xff] %v5504_v53  ;;  %6866 = vst [vmem:[#allocation39_spill] sm:$0xff] %v5510_v54  ;;  %v5077_v56 = vmov 1983009808   ;;  %v5078_v58 = vmov 1934713408  }
  0xd5   : > { %1486 = vmatprep.subr.bf16.mxu0 %v5437_v28  ;;  %1526 = vmatpush1.bf16.msra.mxu1 %v5440_v29  ;;  %v690_v57 = vunpack.c.l.s4 %v5077_v56  ;;  %v754_v59 = vunpack.c.l.s4 %v5078_v58  ;;  %v6800_v9 = vsub.s32 1, %v5557_v3  ;;  %v6802_v10 = vsub.s32 2, %v5557_v3  ;;  %v458_v12 = vld [vmem:[%s6789_s3] sm:$0xf]  ;;  %s4152_s23 = sshll.u32 %s5375_s18, 3  ;;  %s4281_s29 = sshll.u32 %s5153_s15, 7 }
  0xd6   : > { %1527 = vmatprep.subr.bf16.mxu1 %v5446_v32  ;;  %v6801_v11 = vsub.s32 3, %v5557_v3  ;;  %s423_s9 = scalar_lea.vmem [#allocation15], %s4152_s23  ;;  %s6964_s27 = sld [smem:[#allocation50_spill]] }
  0xd7   : > { %1487 = vmatpush1.bf16.msra.mxu0 %v5450_v33  ;;  %v691_v6 = vunpack.c.0.s8 %v690_v57  ;;  %v755_v7 = vunpack.c.0.s8 %v754_v59  ;;  %v5578_v19 = vrot.slane %v458_v12, %v6800_v9  ;;  %v5582_v20 = vrot.slane %v458_v12, %v6802_v10  ;;  %s4016_s13 = sshll.u32 %s423_s9, 4  ;;  %s4003_s19 = scalar_lea.sflag [#allocation6], %s5375_s18  ;;  %s6744_s13 = int_to_ptr.vmem [resolvable:$true] %s4016_s13 }
  0xd8   : > { %1488 = vmatprep.subr.bf16.mxu0 %v5454_v34  ;;  %v5586_v25 = vrot.slane %v458_v12, %v6801_v11  ;;  %s4984_s15 = scalar_lea.vmem %s6744_s13, 128  ;;  %p6965_p4 = scmp.ne.s32.totalorder %s6838_s25, 0 }
  0xd9   : > { %1528 = vmatpush1.bf16.msra.mxu1 %v5458_v35  ;;  %v5567_v13 = vsub.s32 %v691_v6, %v5557_v3  ;;  %p4985_p7 = scmp.ne.s32.totalorder %s6744_s13, %s4984_s15  ;;  %s5081_s17 = smov [#allocation15]  }
  0xda   : > { %4164 = vmatmul.mubr.msk.bf16.gmra.mrb[8].mxu0 %vm515_vm1, %v469_v36  ;;  %4169 = vmatmul.mubr.msk.bf16.gmra.mrb[8].mxu1 %vm515_vm1, %v469_v36  ;;  %s4988_s20 = sshll.u32 %s5081_s17, 4  ;;  %s4989_s20 = int_to_ptr.vmem [resolvable:$false] %s4988_s20 }
  0xdb   : > { %1489 = vmatpush1.bf16.msra.mxu0 %v5461_v37  ;;  %1529 = vmatprep.subr.bf16.mxu1 %v5464_v38  ;;  %p4986_p12 = pnand %p4985_p7, %p6965_p4  ;;  %s4990_s23 = scalar_lea.vmem %s4989_s20, 256 }
  0xdc   : > { %603 = vmatprep.mubr.bf16.mxu0 %v6804_v0  ;;  %676 = vmatprep.mubr.bf16.mxu1 %v6804_v0  ;;  %s6742_s16 = scalar_lea.hbm %s6964_s27, %s4281_s29  ;;  %p4991_p13 = scmp.lt.s32.totalorder %s6744_s13, %s4989_s20 }
  0xdd   : > { %1490 = vmatprep.subr.bf16.mxu0 %v5467_v39  ;;  %1530 = vmatpush1.bf16.msra.mxu1 %v5469_v40  ;;  %p4987_p1 = pneg %p4986_p12  ;;  %p4992_p0 = scmp.lt.s32.totalorder %s4990_s23, %s4984_s15 }
  0xde   : > { %1531 = vmatprep.subr.bf16.mxu1 %v5475_v42 }
  0xdf   : > { %1491 = vmatpush1.bf16.msra.mxu0 %v5480_v44  ;;  %p4993_p2 = por %p4992_p0, %p4991_p13 }
  0xe0   : > { %1492 = vmatprep.subr.bf16.mxu0 %v5484_v45 }
  0xe1   : > { %1532 = vmatpush1.bf16.msra.mxu1 %v5486_v46  ;;  %p4994_p8 = pnand %p4993_p2, %p4987_p1 }
  0xe2   : > { %4165 = vmatmul.mubr.msk.bf16.gmra.mrb[12].mxu0 %vm515_vm1, %v470_v49  ;;  %4170 = vmatmul.mubr.msk.bf16.gmra.mrb[12].mxu1 %vm515_vm1, %v470_v49 }
  0xe3   : > { %1493 = vmatpush1.bf16.msra.mxu0 %v5490_v47  ;;  %1533 = vmatprep.subr.bf16.mxu1 %v5492_v48 }
  0xe4   : > { %1494 = vmatprep.subr.bf16.mxu0 %v5495_v50  ;;  %1512 = vmatprep.mubr.bf16.mxu0 %v6804_v0 }
  0xe5   : > { %1534 = vmatpush1.bf16.msra.mxu1 %v5498_v51  ;;  %1553 = vmatprep.mubr.bf16.mxu1 %v6804_v0 }
  0xe6   : > { %1535 = vmatprep.subr.bf16.mxu1 %v5501_v52 }
  0xe7   : > { %1495 = vmatpush1.bf16.msra.mxu0 %v5504_v53 }
  0xe8   : > { %1591 = vmatprep.subr.bf16.mxu0 %v5401_v14 }
  0xe9   : > { %1536 = vmatpush1.bf16.msra.mxu1 %v5510_v54 }
  0xea   : > { %1513 = vmatmul.mubr.bf16.vlgmr.msra.gmra.mrb[16].mxu0 %v6804_v0  ;;  %1632 = vmatprep.subr.bf16.mxu1 %v5405_v16 }
  0xeb   : > { %1592 = vmatpush1.bf16.msra.mxu0 %v5403_v15  ;;  %1623 = vmatprep.mubr.bf16.mxu0 %v6804_v0 }
  0xec   : > { %1554 = vmatmul.mubr.bf16.vlgmr.msra.gmra.mrb[16].mxu1 %v6804_v0  ;;  %1593 = vmatprep.subr.bf16.mxu0 %v5408_v17  ;;  %v5574_v17 = vrot.slane %v458_v12, %v6803_v8 }
  0xed   : > { %1633 = vmatpush1.bf16.msra.mxu1 %v5411_v18  ;;  %1664 = vmatprep.mubr.bf16.mxu1 %v6804_v0 }
  0xee   : > { %1634 = vmatprep.subr.bf16.mxu1 %v5421_v22 }
  0xef   : > { %1594 = vmatpush1.bf16.msra.mxu0 %v5417_v21 }
  0xf0   : > { %1595 = vmatprep.subr.bf16.mxu0 %v5425_v23 }
  0xf1   : > { %1635 = vmatpush1.bf16.msra.mxu1 %v5428_v24 }
  0xf2   : > { %1636 = vmatprep.subr.bf16.mxu1 %v5434_v27 }
  0xf3   : > { %1596 = vmatpush1.bf16.msra.mxu0 %v5432_v26 }
  0xf4   : > { %1597 = vmatprep.subr.bf16.mxu0 %v5437_v28 }
  0xf5   : > { %1637 = vmatpush1.bf16.msra.mxu1 %v5440_v29 }
  0xf6   : > { %1638 = vmatprep.subr.bf16.mxu1 %v5446_v32 }
  0xf7   : > { %1598 = vmatpush1.bf16.msra.mxu0 %v5450_v33 }
  0xf8   : > { %1599 = vmatprep.subr.bf16.mxu0 %v5454_v34 }
  0xf9   : > { %1639 = vmatpush1.bf16.msra.mxu1 %v5458_v35 }
  0xfa   : > { %1640 = vmatprep.subr.bf16.mxu1 %v5464_v38 }
  0xfb   : > { %1600 = vmatpush1.bf16.msra.mxu0 %v5461_v37 }
  0xfc   : > { %1601 = vmatprep.subr.bf16.mxu0 %v5467_v39 }
  0xfd   : > { %1641 = vmatpush1.bf16.msra.mxu1 %v5469_v40 }
  0xfe   : > { %1642 = vmatprep.subr.bf16.mxu1 %v5475_v42 }
  0xff   : > { %1602 = vmatpush1.bf16.msra.mxu0 %v5480_v44 }
 0x100   : > { %1603 = vmatprep.subr.bf16.mxu0 %v5484_v45 }
 0x101   : > { %1643 = vmatpush1.bf16.msra.mxu1 %v5486_v46 }
 0x102   : > { %1644 = vmatprep.subr.bf16.mxu1 %v5492_v48 }
 0x103   : > { %1604 = vmatpush1.bf16.msra.mxu0 %v5490_v47 }
 0x104   : > { %1605 = vmatprep.subr.bf16.mxu0 %v5495_v50 }
 0x105   : > { %1645 = vmatpush1.bf16.msra.mxu1 %v5498_v51 }
 0x106   : > { %1646 = vmatprep.subr.bf16.mxu1 %v5501_v52 }
 0x107   : > { %1606 = vmatpush1.bf16.msra.mxu0 %v5504_v53 }
 0x108   : > { %1703 = vmatprep.subr.bf16.mxu0 %v5401_v14  ;;  %v5570_v14 = vsub.s32 %v755_v7, %v5557_v3 }
 0x109   : > { %1647 = vmatpush1.bf16.msra.mxu1 %v5510_v54 }
 0x10a   : > { %1744 = vmatprep.subr.bf16.mxu1 %v5405_v16 }
 0x19d   : > { %v575_v60 = vpop.f32.mrb[0].mxu0  ;;  %v648_v61 = vpop.f32.mrb[0].mxu1 }
 0x19e   : > { %v577_v62 = vpop.f32.mrb[1].mxu0  ;;  %v650_v63 = vpop.f32.mrb[1].mxu1 }
 0x19f   : > { %v579_v1 = vpop.f32.mrb[2].mxu0  ;;  %v652_v2 = vpop.f32.mrb[2].mxu1 }
 0x1a0   : > { %v581_v4 = vpop.f32.mrb[3].mxu0  ;;  %v654_v5 = vpop.f32.mrb[3].mxu1 }
 0x1a5   : > { %v585_v15 = vpop.f32.mrb[4].mxu0  ;;  %v658_v16 = vpop.f32.mrb[4].mxu1 }
 0x1a6   : > { %v687_v30 = vcombine.low %v575_v60, %v585_v15  ;;  %v688_v31 = vcombine.high %v575_v60, %v585_v15  ;;  %v959_v36 = vcombine.low %v648_v61, %v658_v16  ;;  %v960_v41 = vcombine.high %v648_v61, %v658_v16  ;;  %v587_v43 = vpop.f32.mrb[5].mxu0  ;;  %v660_v49 = vpop.f32.mrb[5].mxu1 }
 0x1a7   : > { %v823_v55 = vcombine.low %v577_v62, %v587_v43  ;;  %v824_v56 = vcombine.high %v577_v62, %v587_v43  ;;  %v1095_v57 = vcombine.low %v650_v63, %v660_v49  ;;  %v1096_v58 = vcombine.high %v650_v63, %v660_v49  ;;  %v589_v59 = vpop.f32.mrb[6].mxu0  ;;  %v662_v6 = vpop.f32.mrb[6].mxu1 }
 0x1a8   : > { %v695_v7 = vrot.slane %v687_v30, %v5567_v13  ;;  %v5590_v9 = vrot.slane %v688_v31, %v5567_v13  ;;  %v967_v12 = vrot.slane %v959_v36, %v5567_v13  ;;  %v5594_v11 = vrot.slane %v960_v41, %v5567_v13  ;;  %v591_v60 = vpop.f32.mrb[7].mxu0  ;;  %v664_v61 = vpop.f32.mrb[7].mxu1 }
 0x1a9   : > { %v831_v15 = vrot.slane %v823_v55, %v5567_v13  ;;  %v838_v62 = vrot.slane %v824_v56, %v5567_v13  ;;  %v1103_v63 = vrot.slane %v1095_v57, %v5567_v13  ;;  %v1110_v16 = vrot.slane %v1096_v58, %v5567_v13 }
 0x1aa   : > { %v703_v43 = vcombine.low %v579_v1, %v589_v59  ;;  %v704_v30 = vcombine.high %v579_v1, %v589_v59  ;;  %v975_v49 = vcombine.low %v652_v2, %v662_v6  ;;  %v976_v31 = vcombine.high %v652_v2, %v662_v6 }
 0x1ab   : > { %v839_v10 = vcombine.low %v581_v4, %v591_v60  ;;  %v840_v8 = vcombine.high %v581_v4, %v591_v60  ;;  %v1111_v36 = vcombine.low %v654_v5, %v664_v61  ;;  %v1112_v0 = vcombine.high %v654_v5, %v664_v61 }
 0x1ac   : > { %v711_v41 = vrot.slane %v703_v43, %v5567_v13  ;;  %v718_v3 = vrot.slane %v704_v30, %v5567_v13  ;;  %v983_v55 = vrot.slane %v975_v49, %v5567_v13  ;;  %v990_v56 = vrot.slane %v976_v31, %v5567_v13 }
 0x1ad   : > { %v847_v57 = vrot.slane %v839_v10, %v5567_v13  ;;  %v854_v58 = vrot.slane %v840_v8, %v5567_v13  ;;  %v1119_v1 = vrot.slane %v1111_v36, %v5567_v13  ;;  %v1126_v2 = vrot.slane %v1112_v0, %v5567_v13  ;;  %v595_v59 = vpop.f32.mrb[8].mxu0  ;;  %v668_v4 = vpop.f32.mrb[8].mxu1 }
 0x1ae   : > { %v751_v6 = vcombine.low %v695_v7, %v711_v41  ;;  %v752_v5 = vcombine.high %v695_v7, %v711_v41  ;;  %v767_v60 = vcombine.low %v5590_v9, %v718_v3  ;;  %v768_v61 = vcombine.high %v5590_v9, %v718_v3  ;;  %v597_v43 = vpop.f32.mrb[9].mxu0  ;;  %v670_v30 = vpop.f32.mrb[9].mxu1 }
 0x1af   : > { %v1023_v49 = vcombine.low %v967_v12, %v983_v55  ;;  %v1024_v31 = vcombine.high %v967_v12, %v983_v55  ;;  %v1039_v10 = vcombine.low %v5594_v11, %v990_v56  ;;  %v1040_v8 = vcombine.high %v5594_v11, %v990_v56  ;;  %v599_v54 = vpop.f32.mrb[10].mxu0  ;;  %v5612_v36 = vpop.f32.mrb[10].mxu1 }
 0x1b0   : > { %v887_v0 = vcombine.low %v831_v15, %v847_v57  ;;  %v888_v53 = vcombine.high %v831_v15, %v847_v57  ;;  %v903_v52 = vcombine.low %v838_v62, %v854_v58  ;;  %v904_v50 = vcombine.high %v838_v62, %v854_v58  ;;  %v601_v7 = vpop.f32.mrb[11].mxu0  ;;  %v674_v41 = vpop.f32.mrb[11].mxu1 }
 0x1b1   : > { %v1159_v51 = vcombine.low %v1103_v63, %v1119_v1  ;;  %v1160_v47 = vcombine.high %v1103_v63, %v1119_v1  ;;  %v1175_v3 = vcombine.low %v1110_v16, %v1126_v2  ;;  %v1176_v9 = vcombine.high %v1110_v16, %v1126_v2 }
 0x1b2   : > { %v5615_v48 = vrot.slane %v751_v6, %v5570_v14  ;;  %v5618_v12 = vrot.slane %v887_v0, %v5570_v14  ;;  %v5621_v11 = vrot.slane %v1023_v49, %v5570_v14  ;;  %v5624_v55 = vrot.slane %v752_v5, %v5570_v14 }
 0x1b3   : > { %v5627_v15 = vrot.slane %v1159_v51, %v5570_v14  ;;  %v5630_v62 = vrot.slane %v1024_v31, %v5570_v14  ;;  %v5633_v63 = vrot.slane %v888_v53, %v5570_v14  ;;  %v5636_v16 = vrot.slane %v1160_v47, %v5570_v14 }
 0x1b4   : > { %v5639_v56 = vrot.slane %v767_v60, %v5570_v14  ;;  %v5642_v57 = vrot.slane %v1039_v10, %v5570_v14  ;;  %v5645_v58 = vrot.slane %v903_v52, %v5570_v14  ;;  %v5648_v51 = vrot.slane %v1175_v3, %v5570_v14 }
 0x1b5   : > { %v605_v1 = vpop.f32.mrb[12].mxu0  ;;  %v678_v2 = vpop.f32.mrb[12].mxu1  ;;  %v5651_v53 = vrot.slane %v768_v61, %v5570_v14  ;;  %v5654_v47 = vrot.slane %v1040_v8, %v5570_v14  ;;  %v5657_v6 = vrot.slane %v904_v50, %v5570_v14  ;;  %v5660_v5 = vrot.slane %v1176_v9, %v5570_v14 }
 0x1b6   : > { %v719_v60 = vcombine.low %v595_v59, %v605_v1  ;;  %v720_v52 = vcombine.high %v595_v59, %v605_v1  ;;  %v991_v49 = vcombine.low %v668_v4, %v678_v2  ;;  %v992_v31 = vcombine.high %v668_v4, %v678_v2  ;;  %v607_v10 = vpop.f32.mrb[13].mxu0  ;;  %v680_v0 = vpop.f32.mrb[13].mxu1 }
 0x1b7   : > { %v855_v3 = vcombine.low %v597_v43, %v607_v10  ;;  %v856_v45 = vcombine.high %v597_v43, %v607_v10  ;;  %v1127_v46 = vcombine.low %v670_v30, %v680_v0  ;;  %v1128_v61 = vcombine.high %v670_v30, %v680_v0  ;;  %v609_v44 = vpop.f32.mrb[14].mxu0  ;;  %v682_v42 = vpop.f32.mrb[14].mxu1 }
 0x1b8   : > { %v727_v8 = vrot.slane %v719_v60, %v5567_v13  ;;  %v5664_v50 = vrot.slane %v720_v52, %v5567_v13  ;;  %v999_v9 = vrot.slane %v991_v49, %v5567_v13  ;;  %v5668_v39 = vrot.slane %v992_v31, %v5567_v13  ;;  %v611_v59 = vpop.f32.mrb[15].mxu0  ;;  %v684_v4 = vpop.f32.mrb[15].mxu1 }
 0x1b9   : > { %v863_v1 = vrot.slane %v855_v3, %v5567_v13  ;;  %v5672_v43 = vrot.slane %v856_v45, %v5567_v13  ;;  %v1135_v30 = vrot.slane %v1127_v46, %v5567_v13  ;;  %v5676_v2 = vrot.slane %v1128_v61, %v5567_v13 }
 0x1ba   : > { %v735_v60 = vcombine.low %v599_v54, %v609_v44  ;;  %v736_v52 = vcombine.high %v599_v54, %v609_v44  ;;  %v1007_v10 = vcombine.low %v5612_v36, %v682_v42  ;;  %v1008_v49 = vcombine.high %v5612_v36, %v682_v42 }
 0x1bb   : > { %v871_v31 = vcombine.low %v601_v7, %v611_v59  ;;  %v872_v0 = vcombine.high %v601_v7, %v611_v59  ;;  %v1143_v40 = vcombine.low %v674_v41, %v684_v4  ;;  %v1144_v37 = vcombine.high %v674_v41, %v684_v4 }
 0x1bc   : > { %v743_v3 = vrot.slane %v735_v60, %v5567_v13  ;;  %v5682_v45 = vrot.slane %v736_v52, %v5567_v13  ;;  %v1015_v46 = vrot.slane %v1007_v10, %v5567_v13  ;;  %v5686_v61 = vrot.slane %v1008_v49, %v5567_v13 }
 0x1bd   : > { %v879_v44 = vrot.slane %v871_v31, %v5567_v13  ;;  %v5690_v54 = vrot.slane %v872_v0, %v5567_v13  ;;  %v1151_v42 = vrot.slane %v1143_v40, %v5567_v13  ;;  %v5694_v36 = vrot.slane %v1144_v37, %v5567_v13  ;;  %v1514_v7 = vpop.f32.mrb[16].mxu0 }
 0x1be   : > { %v783_v41 = vcombine.low %v727_v8, %v743_v3  ;;  %v784_v59 = vcombine.high %v727_v8, %v743_v3  ;;  %v1516_v52 = vpop.f32.mrb[17].mxu0  ;;  %v1055_v10 = vcombine.low %v999_v9, %v1015_v46  ;;  %v1056_v49 = vcombine.high %v999_v9, %v1015_v46 }
 0x1bf   : > { %v1518_v37 = vpop.f32.mrb[18].mxu0  ;;  %v1555_v13 = vpop.f32.mrb[16].mxu1  ;;  %v919_v0 = vcombine.low %v863_v1, %v879_v44  ;;  %v920_v38 = vcombine.high %v863_v1, %v879_v44  ;;  %v1191_v34 = vcombine.low %v1135_v30, %v1151_v42  ;;  %v1192_v9 = vcombine.high %v1135_v30, %v1151_v42 }
 0x1c0   : > { %v1519_v60 = vpop.f32.mrb[19].mxu0  ;;  %v1557_v4 = vpop.f32.mrb[17].mxu1  ;;  %v1207_v46 = vcombine.low %v5676_v2, %v5694_v36  ;;  %v791_v31 = vrot.slane %v783_v41, %v5570_v14  ;;  %v1063_v44 = vrot.slane %v1055_v10, %v5570_v14  ;;  %v798_v3 = vrot.slane %v784_v59, %v5570_v14 }
 0x1c1   : > { %v1559_v37 = vpop.f32.mrb[18].mxu1  ;;  %v927_v1 = vrot.slane %v919_v0, %v5570_v14  ;;  %v1199_v60 = vrot.slane %v1191_v34, %v5570_v14  ;;  %v1070_v30 = vrot.slane %v1056_v49, %v5570_v14  ;;  %v934_v42 = vrot.slane %v920_v38, %v5570_v14 }
 0x1c2   : > { %v1560_v8 = vpop.f32.mrb[19].mxu1  ;;  %v1206_v35 = vrot.slane %v1192_v9, %v5570_v14  ;;  %v815_v40 = vcombine.low %v5615_v48, %v791_v31  ;;  %v1087_v41 = vcombine.low %v5621_v11, %v1063_v44  ;;  %v816_v0 = vcombine.high %v5615_v48, %v791_v31 }
 0x1c3   : > { %v951_v37 = vcombine.low %v5618_v12, %v927_v1  ;;  %v1223_v10 = vcombine.low %v5627_v15, %v1199_v60  ;;  %v1088_v59 = vcombine.high %v5621_v11, %v1063_v44  ;;  %v952_v34 = vcombine.high %v5618_v12, %v927_v1 }
 0x1c4   : > { %v1224_v49 = vcombine.high %v5627_v15, %v1199_v60  ;;  %v1252_v38 = vadd.f32 %v5574_v17, %v815_v40  ;;  %v1254_v9 = vadd.f32 %v5582_v20, %v1087_v41  ;;  %v5732_v33 = vadd.f32 %v5574_v17, %v816_v0 }
 0x1c5   : > { %v1253_v8 = vadd.f32 %v5578_v19, %v951_v37  ;;  %v1255_v32 = vadd.f32 %v5586_v25, %v1223_v10  ;;  %v5736_v48 = vadd.f32 %v5582_v20, %v1088_v59  ;;  %v5739_v11 = vadd.f32 %v5578_v19, %v952_v34 }
 0x1c6   : > { %v5742_v12 = vadd.f32 %v5586_v25, %v1224_v49  ;;  %v1562_v15 = vadd.f32 %v1514_v7, %v1252_v38  ;;  %v1564_v40 = vadd.f32 %v1555_v13, %v1254_v9  ;;  %v817_v1 = vcombine.low %v5624_v55, %v798_v3 }
 0x1c7   : > { %v1563_v31 = vadd.f32 %v1516_v52, %v1253_v8  ;;  %v1565_v44 = vadd.f32 %v1557_v4, %v1255_v32  ;;  %v1089_v60 = vcombine.low %v5630_v62, %v1070_v30  ;;  %v953_v37 = vcombine.low %v5633_v63, %v934_v42 }
 0x1c8   : > { %v1225_v41 = vcombine.low %v5636_v16, %v1206_v35  ;;  %v1566_v0 = vmul.f32 0.5, %v1562_v15  ;;  %v1568_v59 = vmul.f32 0.5, %v1564_v40  ;;  %v5749_v34 = vadd.f32 %v5574_v17, %v817_v1 }
 0x1c9   : > { %v1567_v10 = vmul.f32 0.5, %v1563_v31  ;;  %4590 = vtanh.f32 %v1565_v44  ;;  %v5752_v7 = vadd.f32 %v5582_v20, %v1089_v60  ;;  %v5755_v52 = vadd.f32 %v5578_v19, %v953_v37 }
 0x1ca   : > { %v5758_v32 = vadd.f32 %v5586_v25, %v1225_v41  ;;  %4592 = vtanh.f32 %v1566_v0  ;;  %v818_v4 = vcombine.high %v5624_v55, %v798_v3  ;;  %v1090_v13 = vcombine.high %v5630_v62, %v1070_v30 }
 0x1cb   : > { %v954_v49 = vcombine.high %v5633_v63, %v934_v42  ;;  %4594 = vtanh.f32 %v1567_v10  ;;  %v1226_v38 = vcombine.high %v5636_v16, %v1206_v35  ;;  %v6868_v8 = vcombine.low %v5664_v50, %v5682_v45 }
 0x1cc   : > { %v6869_v15 = vcombine.low %v5668_v39, %v5686_v61  ;;  %4596 = vtanh.f32 %v1568_v59  ;;  %v5773_v55 = vadd.f32 %v5574_v17, %v818_v4  ;;  %v5776_v62 = vadd.f32 %v5582_v20, %v1090_v13 }
 0x1cd   : > { %v807_v9 = vrot.slane %v6868_v8, %v5570_v14  ;;  %v5779_v63 = vadd.f32 %v5578_v19, %v954_v49  ;;  %v5782_v35 = vadd.f32 %v5586_v25, %v1226_v38  ;;  %v6870_v30 = vcombine.low %v5672_v43, %v5690_v54 }
 0x1ce   : > { %v1079_v31 = vrot.slane %v6869_v15, %v5570_v14  ;;  %v1215_v40 = vrot.slane %v1207_v46, %v5570_v14  ;;  %v6871_v60 = vcombine.high %v5664_v50, %v5682_v45  ;;  %v6874_v15 = vcombine.high %v5676_v2, %v5694_v36 }
 0x1cf   : > { %v819_v16 = vcombine.low %v5639_v56, %v807_v9  ;;  %v943_v42 = vrot.slane %v6870_v30, %v5570_v14  ;;  %v820_v1 = vcombine.high %v5639_v56, %v807_v9 }
 0x1d0   : > { %v1091_v3 = vcombine.low %v5642_v57, %v1079_v31  ;;  %v1092_v44 = vcombine.high %v5642_v57, %v1079_v31  ;;  %v814_v37 = vrot.slane %v6871_v60, %v5570_v14  ;;  %v1227_v46 = vcombine.low %v5648_v51, %v1215_v40 }
 0x1d1   : > { %v5798_v41 = vadd.f32 %v5574_v17, %v819_v16  ;;  %v955_v10 = vcombine.low %v5645_v58, %v943_v42  ;;  %v956_v59 = vcombine.high %v5645_v58, %v943_v42  ;;  %v5807_v56 = vadd.f32 %v5574_v17, %v820_v1 }
 0x1d2   : > { %v5801_v0 = vadd.f32 %v5582_v20, %v1091_v3  ;;  %v5810_v57 = vadd.f32 %v5582_v20, %v1092_v44  ;;  %v1228_v50 = vcombine.high %v5648_v51, %v1215_v40  ;;  %v821_v13 = vcombine.low %v5651_v53, %v814_v37 }
 0x1d3   : > { %v5814_v45 = vadd.f32 %v5578_v19, %v955_v10  ;;  %v5817_v4 = vadd.f32 %v5578_v19, %v956_v59  ;;  %v6872_v58 = vcombine.high %v5668_v39, %v5686_v61  ;;  %v5825_v38 = vadd.f32 %v5586_v25, %v1227_v46  ;;  %v4591_v16 = vpop.eup %4590 }
 0x1d4   : > { %v5828_v8 = vadd.f32 %v5586_v25, %v1228_v50  ;;  %v6873_v51 = vcombine.high %v5672_v43, %v5690_v54  ;;  %v1222_v31 = vrot.slane %v6874_v15, %v5570_v14  ;;  %v5839_v39 = vadd.f32 %v5574_v17, %v821_v13  ;;  %v4593_v42 = vpop.eup %4592 }
 0x1d5   : > { %v1086_v49 = vrot.slane %v6872_v58, %v5570_v14  ;;  %v822_v3 = vcombine.high %v5651_v53, %v814_v37  ;;  %v1572_v36 = vadd.f32 1.0, %v4593_v42  ;;  %v6883_v15 = vmov 0   ;;  %v6898_v42 = vld [vmem:[#allocation36_spill] sm:$0xff] }
 0x1d6   : > { %v950_v9 = vrot.slane %v6873_v51, %v5570_v14  ;;  %6875 = vst [vmem:[#allocation41_spill] sm:$0xff] %v5839_v39  ;;  %v1229_v43 = vcombine.low %v5660_v5, %v1222_v31  ;;  %v1230_v2 = vcombine.high %v5660_v5, %v1222_v31  ;;  %v4595_v14 = vpop.eup %4594  ;;  %v6886_v31 = vld [vmem:[#allocation24_spill] sm:$0xff] }
 0x1d7   : > { %v1093_v61 = vcombine.low %v5654_v47, %v1086_v49  ;;  %v1094_v30 = vcombine.high %v5654_v47, %v1086_v49  ;;  %v5852_v44 = vadd.f32 %v5574_v17, %v822_v3  ;;  %v4597_v47 = vpop.eup %4596  ;;  %v1573_v60 = vadd.f32 1.0, %v4595_v14  ;;  %v6896_v3 = vld [vmem:[#allocation34_spill] sm:$0xff]  ;;  %v5908_v14 = vld [vmem:[#allocation9 + $0x4] ss:$16 sps:$4 sm:$0xff]  }
 0x1d8   : > { %v957_v40 = vcombine.low %v5657_v6, %v950_v9  ;;  %v958_v54 = vcombine.high %v5657_v6, %v950_v9  ;;  %v5861_v6 = vadd.f32 %v5586_v25, %v1229_v43  ;;  %v1575_v10 = vmul.f32 0.5, %v1572_v36  ;;  %v6900_v43 = vld [vmem:[#allocation37_spill] sm:$0xff]  ;;  %v5911_v36 = vld [vmem:[#allocation9 + $0xc] ss:$16 sps:$4 sm:$0xff]  }
 0x1d9   : > { %v5849_v1 = vadd.f32 %v5582_v20, %v1093_v61  ;;  %6877 = vst [vmem:[#allocation43_spill] sm:$0xff] %v5852_v44  ;;  %v5855_v53 = vadd.f32 %v5582_v20, %v1094_v30  ;;  %v5867_v59 = vadd.f32 %v5586_v25, %v1230_v2  ;;  %v1576_v17 = vmul.f32 0.5, %v1573_v60  ;;  %v5876_v25 = vld [vmem:[#allocation9 + $0x24] ss:$16 sps:$4 sm:$0xff]  }
 0x1da   : > { %v5858_v37 = vadd.f32 %v5578_v19, %v957_v40  ;;  %6880 = vst [vmem:[#allocation46_spill] sm:$0xff] %v5861_v6  ;;  %v5864_v5 = vadd.f32 %v5578_v19, %v958_v54  ;;  %v1580_v46 = vmul.f32 %v4591_v16, %v1575_v10  ;;  %v1574_v13 = vadd.f32 1.0, %v4597_v47  ;;  %v5872_v19 = vld [vmem:[#allocation9] ss:$16 sps:$4 sm:$0xff]   ;;  %v6901_v54 = vld [vmem:[#allocation38_spill] sm:$0xff] }
 0x1db   : > { %6876 = vst [vmem:[#allocation42_spill] sm:$0xff] %v5849_v1  ;;  %6878 = vst [vmem:[#allocation44_spill] sm:$0xff] %v5855_v53  ;;  %v1579_v50 = vmul.f32 0.0, %v1576_v17  ;;  %v6887_v16 = vld [vmem:[#allocation23_spill] sm:$0xff]  ;;  %v6897_v30 = vld [vmem:[#allocation33_spill] sm:$0xff] }
 0x1dc   : > { %6879 = vst [vmem:[#allocation45_spill] sm:$0xff] %v5858_v37  ;;  %6881 = vst [vmem:[#allocation47_spill] sm:$0xff] %v5864_v5  ;;  %v1577_v58 = vmul.f32 0.5, %v1574_v13  ;;  %v6895_v61 = vld [vmem:[#allocation31_spill] sm:$0xff] }
 0x1dd   : > { %6882 = vst [vmem:[#allocation48_spill] sm:$0xff] %v5867_v59  ;;  %v5869_v20 = vadd.f32 %v1580_v46, %v1579_v50  ;;  %v6899_v40 = vld [vmem:[#allocation35_spill] sm:$0xff] }
 0x1de   : > { %v6902_v2 = vld [vmem:[#allocation39_spill] sm:$0xff] }
 0x1df   : > { %4598 = vtanh.f32 %v5869_v20 }
 0x1e9   : > { %v4599_v49 = vpop.eup %4598 }
 0x1ea   : > { %v1583_v51 = vmul.f32 %v4599_v49, %v1577_v58 }
 0x1ec   : > { %v1584_v9 = vpack.c.bf16 %v1583_v51, %v1583_v51 }
 0x1ee   : > { %1585 = vst [vmem:[#allocation3] sm:$0xf] %v1584_v9  ;;  %1624 = vmatmul.mubr.bf16.vlgmr.msra.gmra.mrb[20].mxu0 %v1584_v9  ;;  %1665 = vmatmul.mubr.bf16.vlgmr.msra.gmra.mrb[20].mxu1 %v1584_v9 }
 0x1ef   : > { %1704 = vmatpush1.bf16.msra.mxu0 %v5872_v19  ;;  %1745 = vmatpush1.bf16.msra.mxu1 %v5411_v18  ;;  %v6884_v18 = vld [vmem:[#allocation21_spill] sm:$0xff] }
 0x1f0   : > { %1705 = vmatprep.subr.bf16.mxu0 %v5876_v25  ;;  %1746 = vmatprep.subr.bf16.mxu1 %v5421_v22  ;;  %v6885_v22 = vld [vmem:[#allocation22_spill] sm:$0xff] }
 0x1f1   : > { %1735 = vmatprep.mubr.bf16.mxu0 %v6883_v15  ;;  %1776 = vmatprep.mubr.bf16.mxu1 %v6883_v15 }
 0x1f3   : > { %1706 = vmatpush1.bf16.msra.mxu0 %v5417_v21  ;;  %1747 = vmatpush1.bf16.msra.mxu1 %v5428_v24  ;;  %v6888_v21 = vld [vmem:[#allocation26_spill] sm:$0xff]  ;;  %v6889_v24 = vld [vmem:[#allocation25_spill] sm:$0xff] }
 0x1f4   : > { %1707 = vmatprep.subr.bf16.mxu0 %v5425_v23  ;;  %1748 = vmatprep.subr.bf16.mxu1 %v5434_v27  ;;  %v6890_v23 = vld [vmem:[#allocation28_spill] sm:$0xff]  ;;  %v6891_v27 = vld [vmem:[#allocation27_spill] sm:$0xff] }
 0x1f7   : > { %1708 = vmatpush1.bf16.msra.mxu0 %v5432_v26  ;;  %1749 = vmatpush1.bf16.msra.mxu1 %v5440_v29  ;;  %v6892_v26 = vld [vmem:[#allocation29_spill] sm:$0xff]  ;;  %v6893_v29 = vld [vmem:[#allocation30_spill] sm:$0xff] }
 0x1f8   : > { %1709 = vmatprep.subr.bf16.mxu0 %v5437_v28  ;;  %1750 = vmatprep.subr.bf16.mxu1 %v6884_v18  ;;  %v6894_v28 = vld [vmem:[#allocation32_spill] sm:$0xff] }
 0x1fb   : > { %1710 = vmatpush1.bf16.msra.mxu0 %v6885_v22  ;;  %1751 = vmatpush1.bf16.msra.mxu1 %v6886_v31 }
 0x1fc   : > { %1711 = vmatprep.subr.bf16.mxu0 %v6887_v16  ;;  %1752 = vmatprep.subr.bf16.mxu1 %v6888_v21 }
 0x1ff   : > { %1712 = vmatpush1.bf16.msra.mxu0 %v6889_v24  ;;  %1753 = vmatpush1.bf16.msra.mxu1 %v6890_v23 }
 0x200   : > { %1713 = vmatprep.subr.bf16.mxu0 %v6891_v27  ;;  %1754 = vmatprep.subr.bf16.mxu1 %v6892_v26 }
 0x203   : > { %1714 = vmatpush1.bf16.msra.mxu0 %v6893_v29  ;;  %1755 = vmatpush1.bf16.msra.mxu1 %v6894_v28 }
 0x204   : > { %1715 = vmatprep.subr.bf16.mxu0 %v6895_v61  ;;  %1756 = vmatprep.subr.bf16.mxu1 %v6896_v3 }
 0x207   : > { %1716 = vmatpush1.bf16.msra.mxu0 %v6897_v30  ;;  %1757 = vmatpush1.bf16.msra.mxu1 %v6898_v42 }
 0x208   : > { %1717 = vmatprep.subr.bf16.mxu0 %v6899_v40  ;;  %1758 = vmatprep.subr.bf16.mxu1 %v6900_v43 }
 0x20b   : > { %1718 = vmatpush1.bf16.msra.mxu0 %v6901_v54  ;;  %1759 = vmatpush1.bf16.msra.mxu1 %v6902_v2 }
 0x20c   : > { %1815 = vmatprep.subr.bf16.mxu0 %v5908_v14  ;;  %1856 = vmatprep.subr.bf16.mxu1 %v5911_v36 }
 0x2c1   : > { %v1625_v47 = vpop.f32.mrb[20].mxu0  ;;  %v1666_v60 = vpop.f32.mrb[20].mxu1 }
 0x2c2   : > { %v1673_v10 = vadd.f32 %v1625_v47, %v5732_v33  ;;  %v1675_v17 = vadd.f32 %v1666_v60, %v5736_v48  ;;  %v1627_v46 = vpop.f32.mrb[21].mxu0  ;;  %v1668_v50 = vpop.f32.mrb[21].mxu1  ;;  %v5923_v47 = vld [vmem:[#allocation9 + $0x8] ss:$16 sps:$4 sm:$0xff]   ;;  %v5932_v60 = vld [vmem:[#allocation9 + $0x20] ss:$16 sps:$4 sm:$0xff]  }
 0x2c3   : > { %v1674_v13 = vadd.f32 %v1627_v46, %v5739_v11  ;;  %v1676_v58 = vadd.f32 %v1668_v50, %v5742_v12  ;;  %v1629_v49 = vpop.f32.mrb[22].mxu0  ;;  %v1670_v51 = vpop.f32.mrb[22].mxu1  ;;  %v5941_v46 = vld [vmem:[#allocation9 + $0x4c] ss:$16 sps:$4 sm:$0xff]   ;;  %v5944_v50 = vld [vmem:[#allocation9 + $0x40] ss:$16 sps:$4 sm:$0xff]  }
 0x2c4   : > { %v1677_v9 = vmul.f32 0.5, %v1673_v10  ;;  %v1630_v18 = vpop.f32.mrb[23].mxu0  ;;  %v1671_v22 = vpop.f32.mrb[23].mxu1  ;;  %v1679_v16 = vmul.f32 0.5, %v1675_v17  ;;  %v5935_v10 = vld [vmem:[#allocation9 + $0x28] ss:$16 sps:$4 sm:$0xff]  }
 0x2c5   : > { %v1678_v31 = vmul.f32 0.5, %v1674_v13  ;;  %v5938_v17 = vld [vmem:[#allocation9 + $0x44] ss:$16 sps:$4 sm:$0xff]   ;;  %v5947_v13 = vld [vmem:[#allocation9 + $0x48] ss:$16 sps:$4 sm:$0xff]  }
 0x2c6   : > { %4600 = vtanh.f32 %v1677_v9  ;;  %v5953_v49 = vld [vmem:[#allocation9 + $0x6c] ss:$16 sps:$4 sm:$0xff]   ;;  %v5956_v51 = vld [vmem:[#allocation9 + $0x60] ss:$16 sps:$4 sm:$0xff]   ;;  %v5959_v9 = vld [vmem:[#allocation9 + $0x68] ss:$16 sps:$4 sm:$0xff]  }
 0x2c7   : > { %4602 = vtanh.f32 %v1678_v31  ;;  %v5962_v18 = vld [vmem:[#allocation9 + $0x84] ss:$16 sps:$4 sm:$0xff]   ;;  %v5965_v22 = vld [vmem:[#allocation9 + $0x8c] ss:$16 sps:$4 sm:$0xff]   ;;  %v5968_v31 = vld [vmem:[#allocation9 + $0x80] ss:$16 sps:$4 sm:$0xff]  }
 0x2c8   : > { %4604 = vtanh.f32 %v1676_v58  ;;  %v5950_v58 = vld [vmem:[#allocation9 + $0x64] ss:$16 sps:$4 sm:$0xff]  }
 0x2c9   : > { %4606 = vtanh.f32 %v1679_v16  ;;  %v5971_v16 = vld [vmem:[#allocation9 + $0x88] ss:$16 sps:$4 sm:$0xff]  }
 0x2d0   : > { %v4601_v21 = vpop.eup %4600 }
 0x2d1   : > { %v1683_v33 = vadd.f32 1.0, %v4601_v21  ;;  %v4603_v24 = vpop.eup %4602  ;;  %v5974_v21 = vld [vmem:[#allocation9 + $0xa4] ss:$16 sps:$4 sm:$0xff]  }
 0x2d2   : > { %v1684_v23 = vadd.f32 1.0, %v4603_v24  ;;  %v4605_v27 = vpop.eup %4604  ;;  %v5980_v24 = vld [vmem:[#allocation9 + $0xa0] ss:$16 sps:$4 sm:$0xff]  }
 0x2d3   : > { %v1686_v48 = vmul.f32 0.5, %v1683_v33  ;;  %v4607_v28 = vpop.eup %4606  ;;  %v5977_v33 = vld [vmem:[#allocation9 + $0xac] ss:$16 sps:$4 sm:$0xff]  }
 0x2d4   : > { %v1687_v11 = vmul.f32 0.5, %v1684_v23  ;;  %v1685_v61 = vadd.f32 1.0, %v4607_v28  ;;  %v5986_v23 = vld [vmem:[#allocation9 + $0xc4] ss:$16 sps:$4 sm:$0xff]  }
 0x2d5   : > { %v1691_v26 = vmul.f32 %v4605_v27, %v1686_v48  ;;  %v5983_v48 = vld [vmem:[#allocation9 + $0xa8] ss:$16 sps:$4 sm:$0xff]   ;;  %v5989_v27 = vld [vmem:[#allocation9 + $0xcc] ss:$16 sps:$4 sm:$0xff]  }
 0x2d6   : > { %v1690_v12 = vmul.f32 %v1687_v11, %v5869_v20  ;;  %v1688_v3 = vmul.f32 0.5, %v1685_v61  ;;  %v5927_v20 = vld [vmem:[#allocation9 + $0x2c] ss:$16 sps:$4 sm:$0xff]   ;;  %v5992_v11 = vld [vmem:[#allocation9 + $0xc0] ss:$16 sps:$4 sm:$0xff]  }
 0x2d8   : > { %v5919_v29 = vadd.f32 %v1691_v26, %v1690_v12  ;;  %v5995_v26 = vld [vmem:[#allocation9 + $0xc8] ss:$16 sps:$4 sm:$0xff]   ;;  %v5998_v12 = vld [vmem:[#allocation9 + $0xe4] ss:$16 sps:$4 sm:$0xff]  }
 0x2da   : > { %4608 = vtanh.f32 %v5919_v29 }
 0x2e4   : > { %v4609_v30 = vpop.eup %4608 }
 0x2e5   : > { %v1694_v42 = vmul.f32 %v4609_v30, %v1688_v3 }
 0x2e7   : > { %v1695_v40 = vpack.c.bf16 %v1694_v42, %v1694_v42 }
 0x2e9   : > { %1697 = vst [vmem:[#allocation3 + $0x4] sm:$0xf] %v1695_v40  ;;  %1736 = vmatmul.mubr.bf16.vlgmr.msra.gmra.mrb[24].mxu0 %v1695_v40  ;;  %1777 = vmatmul.mubr.bf16.vlgmr.msra.gmra.mrb[24].mxu1 %v1695_v40 }
 0x2ea   : > { %1816 = vmatpush1.bf16.msra.mxu0 %v5872_v19  ;;  %1857 = vmatpush1.bf16.msra.mxu1 %v5923_v47 }
 0x2eb   : > { %1817 = vmatprep.subr.bf16.mxu0 %v5876_v25  ;;  %1858 = vmatprep.subr.bf16.mxu1 %v5927_v20 }
 0x2ec   : > { %1847 = vmatprep.mubr.bf16.mxu0 %v6883_v15  ;;  %1888 = vmatprep.mubr.bf16.mxu1 %v6883_v15 }
 0x2ee   : > { %1818 = vmatpush1.bf16.msra.mxu0 %v5932_v60  ;;  %1859 = vmatpush1.bf16.msra.mxu1 %v5935_v10 }
 0x2ef   : > { %1819 = vmatprep.subr.bf16.mxu0 %v5938_v17  ;;  %1860 = vmatprep.subr.bf16.mxu1 %v5941_v46 }
 0x2f2   : > { %1820 = vmatpush1.bf16.msra.mxu0 %v5944_v50  ;;  %1861 = vmatpush1.bf16.msra.mxu1 %v5947_v13 }
 0x2f3   : > { %1821 = vmatprep.subr.bf16.mxu0 %v5950_v58  ;;  %1862 = vmatprep.subr.bf16.mxu1 %v5953_v49 }
 0x2f6   : > { %1822 = vmatpush1.bf16.msra.mxu0 %v5956_v51  ;;  %1863 = vmatpush1.bf16.msra.mxu1 %v5959_v9 }
 0x2f7   : > { %1823 = vmatprep.subr.bf16.mxu0 %v5962_v18  ;;  %1864 = vmatprep.subr.bf16.mxu1 %v5965_v22 }
 0x2fa   : > { %1824 = vmatpush1.bf16.msra.mxu0 %v5968_v31  ;;  %1865 = vmatpush1.bf16.msra.mxu1 %v5971_v16 }
 0x2fb   : > { %1825 = vmatprep.subr.bf16.mxu0 %v5974_v21  ;;  %1866 = vmatprep.subr.bf16.mxu1 %v5977_v33 }
 0x2fe   : > { %1826 = vmatpush1.bf16.msra.mxu0 %v5980_v24  ;;  %1867 = vmatpush1.bf16.msra.mxu1 %v5983_v48 }
 0x2ff   : > { %1827 = vmatprep.subr.bf16.mxu0 %v5986_v23  ;;  %1868 = vmatprep.subr.bf16.mxu1 %v5989_v27 }
 0x302   : > { %1828 = vmatpush1.bf16.msra.mxu0 %v5992_v11  ;;  %1869 = vmatpush1.bf16.msra.mxu1 %v5995_v26 }
 0x303   : > { %1829 = vmatprep.subr.bf16.mxu0 %v5998_v12  ;;  %1870 = vmatprep.subr.bf16.mxu1 %v6900_v43 }
 0x306   : > { %1830 = vmatpush1.bf16.msra.mxu0 %v6901_v54  ;;  %1871 = vmatpush1.bf16.msra.mxu1 %v6902_v2 }
 0x307   : > { %1927 = vmatprep.subr.bf16.mxu0 %v5908_v14  ;;  %1968 = vmatprep.subr.bf16.mxu1 %v5911_v36 }
 0x3bc   : > { %v1737_v28 = vpop.f32.mrb[24].mxu0  ;;  %v1778_v61 = vpop.f32.mrb[24].mxu1 }
 0x3bd   : > { %v1785_v3 = vadd.f32 %v1737_v28, %v5749_v34  ;;  %v1787_v30 = vadd.f32 %v1778_v61, %v5752_v7  ;;  %v1739_v42 = vpop.f32.mrb[25].mxu0  ;;  %v1780_v40 = vpop.f32.mrb[25].mxu1 }
 0x3be   : > { %v1786_v59 = vadd.f32 %v1739_v42, %v5755_v52  ;;  %v1788_v43 = vadd.f32 %v1780_v40, %v5758_v32  ;;  %v1741_v5 = vpop.f32.mrb[26].mxu0  ;;  %v1782_v54 = vpop.f32.mrb[26].mxu1 }
 0x3bf   : > { %v1789_v53 = vmul.f32 0.5, %v1785_v3  ;;  %v1742_v2 = vpop.f32.mrb[27].mxu0  ;;  %v1783_v44 = vpop.f32.mrb[27].mxu1  ;;  %v1791_v37 = vmul.f32 0.5, %v1787_v30 }
 0x3c0   : > { %v1790_v6 = vmul.f32 0.5, %v1786_v59 }
 0x3c1   : > { %4610 = vtanh.f32 %v1789_v53 }
 0x3c2   : > { %4612 = vtanh.f32 %v1790_v6 }
 0x3c3   : > { %4614 = vtanh.f32 %v1788_v43 }
 0x3c4   : > { %4616 = vtanh.f32 %v1791_v37  ;;  %v6049_v37 = vld [vmem:[#allocation9 + $0xe8] ss:$16 sps:$4 sm:$0xff]  }
 0x3cb   : > { %v4611_v1 = vpop.eup %4610 }
 0x3cc   : > { %v1795_v34 = vadd.f32 1.0, %v4611_v1  ;;  %v4613_v28 = vpop.eup %4612  ;;  %v6046_v1 = vld [vmem:[#allocation9 + $0xe0] ss:$16 sps:$4 sm:$0xff]  }
 0x3cd   : > { %v1796_v61 = vadd.f32 1.0, %v4613_v28  ;;  %v4615_v39 = vpop.eup %4614 }
 0x3ce   : > { %v1798_v7 = vmul.f32 0.5, %v1795_v34  ;;  %v4617_v44 = vpop.eup %4616 }
 0x3cf   : > { %v1799_v52 = vmul.f32 0.5, %v1796_v61  ;;  %v1797_v53 = vadd.f32 1.0, %v4617_v44 }
 0x3d0   : > { %v1803_v42 = vmul.f32 %v4615_v39, %v1798_v7  ;;  %v6043_v39 = vld [vmem:[#allocation9 + $0xec] ss:$16 sps:$4 sm:$0xff]  }
 0x3d1   : > { %v1802_v32 = vmul.f32 %v1799_v52, %v5919_v29  ;;  %v1800_v6 = vmul.f32 0.5, %v1797_v53 }
 0x3d3   : > { %v6011_v5 = vadd.f32 %v1803_v42, %v1802_v32 }
 0x3d5   : > { %4618 = vtanh.f32 %v6011_v5 }
 0x3df   : > { %v4619_v59 = vpop.eup %4618 }
 0x3e0   : > { %v1806_v3 = vmul.f32 %v4619_v59, %v1800_v6 }
 0x3e2   : > { %v1807_v30 = vpack.c.bf16 %v1806_v3, %v1806_v3 }
 0x3e4   : > { %1809 = vst [vmem:[#allocation3 + $0x8] sm:$0xf] %v1807_v30  ;;  %1848 = vmatmul.mubr.bf16.vlgmr.msra.gmra.mrb[28].mxu0 %v1807_v30  ;;  %1889 = vmatmul.mubr.bf16.vlgmr.msra.gmra.mrb[28].mxu1 %v1807_v30 }
 0x3e5   : > { %1928 = vmatpush1.bf16.msra.mxu0 %v5872_v19  ;;  %1969 = vmatpush1.bf16.msra.mxu1 %v5923_v47 }
 0x3e6   : > { %1929 = vmatprep.subr.bf16.mxu0 %v5876_v25  ;;  %1970 = vmatprep.subr.bf16.mxu1 %v5927_v20 }
 0x3e7   : > { %1959 = vmatprep.mubr.bf16.mxu0 %v6883_v15  ;;  %2000 = vmatprep.mubr.bf16.mxu1 %v6883_v15 }
 0x3e9   : > { %1930 = vmatpush1.bf16.msra.mxu0 %v5932_v60  ;;  %1971 = vmatpush1.bf16.msra.mxu1 %v5935_v10 }
 0x3ea   : > { %1931 = vmatprep.subr.bf16.mxu0 %v5938_v17  ;;  %1972 = vmatprep.subr.bf16.mxu1 %v5941_v46 }
 0x3ed   : > { %1932 = vmatpush1.bf16.msra.mxu0 %v5944_v50  ;;  %1973 = vmatpush1.bf16.msra.mxu1 %v5947_v13 }
 0x3ee   : > { %1933 = vmatprep.subr.bf16.mxu0 %v5950_v58  ;;  %1974 = vmatprep.subr.bf16.mxu1 %v5953_v49 }
 0x3f1   : > { %1934 = vmatpush1.bf16.msra.mxu0 %v5956_v51  ;;  %1975 = vmatpush1.bf16.msra.mxu1 %v5959_v9 }
 0x3f2   : > { %1935 = vmatprep.subr.bf16.mxu0 %v5962_v18  ;;  %1976 = vmatprep.subr.bf16.mxu1 %v5965_v22 }
 0x3f5   : > { %1936 = vmatpush1.bf16.msra.mxu0 %v5968_v31  ;;  %1977 = vmatpush1.bf16.msra.mxu1 %v5971_v16 }
 0x3f6   : > { %1937 = vmatprep.subr.bf16.mxu0 %v5974_v21  ;;  %1978 = vmatprep.subr.bf16.mxu1 %v5977_v33 }
 0x3f9   : > { %1938 = vmatpush1.bf16.msra.mxu0 %v5980_v24  ;;  %1979 = vmatpush1.bf16.msra.mxu1 %v5983_v48 }
 0x3fa   : > { %1939 = vmatprep.subr.bf16.mxu0 %v5986_v23  ;;  %1980 = vmatprep.subr.bf16.mxu1 %v5989_v27 }
 0x3fd   : > { %1940 = vmatpush1.bf16.msra.mxu0 %v5992_v11  ;;  %1981 = vmatpush1.bf16.msra.mxu1 %v5995_v26 }
 0x3fe   : > { %1941 = vmatprep.subr.bf16.mxu0 %v5998_v12  ;;  %1982 = vmatprep.subr.bf16.mxu1 %v6043_v39 }
 0x401   : > { %1942 = vmatpush1.bf16.msra.mxu0 %v6046_v1  ;;  %1983 = vmatpush1.bf16.msra.mxu1 %v6049_v37 }
 0x402   : > { %2039 = vmatprep.subr.bf16.mxu0 %v5908_v14  ;;  %2080 = vmatprep.subr.bf16.mxu1 %v5911_v36 }
 0x4b7   : > { %v1849_v29 = vpop.f32.mrb[28].mxu0  ;;  %v1890_v40 = vpop.f32.mrb[28].mxu1 }
 0x4b8   : > { %v1897_v43 = vadd.f32 %v1849_v29, %v5773_v55  ;;  %v1899_v54 = vadd.f32 %v1890_v40, %v5776_v62  ;;  %v1851_v2 = vpop.f32.mrb[29].mxu0  ;;  %v1892_v34 = vpop.f32.mrb[29].mxu1 }
 0x4b9   : > { %v1898_v28 = vadd.f32 %v1851_v2, %v5779_v63  ;;  %v1900_v7 = vadd.f32 %v1892_v34, %v5782_v35  ;;  %v1853_v61 = vpop.f32.mrb[30].mxu0  ;;  %v1894_v52 = vpop.f32.mrb[30].mxu1 }
 0x4ba   : > { %v1901_v42 = vmul.f32 0.5, %v1897_v43  ;;  %v1854_v32 = vpop.f32.mrb[31].mxu0  ;;  %v1895_v44 = vpop.f32.mrb[31].mxu1  ;;  %v1903_v6 = vmul.f32 0.5, %v1899_v54 }
 0x4bb   : > { %v1902_v53 = vmul.f32 0.5, %v1898_v28 }
 0x4bc   : > { %4620 = vtanh.f32 %v1901_v42 }
 0x4bd   : > { %4622 = vtanh.f32 %v1902_v53 }
 0x4be   : > { %4624 = vtanh.f32 %v1900_v7 }
 0x4bf   : > { %4626 = vtanh.f32 %v1903_v6 }
 0x4c6   : > { %v4621_v59 = vpop.eup %4620 }
 0x4c7   : > { %v1907_v55 = vadd.f32 1.0, %v4621_v59  ;;  %v4623_v3 = vpop.eup %4622 }
 0x4c8   : > { %v1908_v30 = vadd.f32 1.0, %v4623_v3  ;;  %v4625_v29 = vpop.eup %4624 }
 0x4c9   : > { %v1910_v62 = vmul.f32 0.5, %v1907_v55  ;;  %v4627_v43 = vpop.eup %4626 }
 0x4ca   : > { %v1911_v63 = vmul.f32 0.5, %v1908_v30  ;;  %v1909_v34 = vadd.f32 1.0, %v4627_v43 }
 0x4cb   : > { %v1915_v40 = vmul.f32 %v4625_v29, %v1910_v62 }
 0x4cc   : > { %v1914_v35 = vmul.f32 %v1911_v63, %v6011_v5  ;;  %v1912_v28 = vmul.f32 0.5, %v1909_v34 }
 0x4ce   : > { %v6059_v2 = vadd.f32 %v1915_v40, %v1914_v35 }
 0x4d0   : > { %4628 = vtanh.f32 %v6059_v2 }
 0x4da   : > { %v4629_v7 = vpop.eup %4628 }
 0x4db   : > { %v1918_v54 = vmul.f32 %v4629_v7, %v1912_v28 }
 0x4dd   : > { %v1919_v61 = vpack.c.bf16 %v1918_v54, %v1918_v54 }
 0x4df   : > { %1921 = vst [vmem:[#allocation3 + $0xc] sm:$0xf] %v1919_v61  ;;  %1960 = vmatmul.mubr.bf16.vlgmr.msra.gmra.mrb[32].mxu0 %v1919_v61  ;;  %2001 = vmatmul.mubr.bf16.vlgmr.msra.gmra.mrb[32].mxu1 %v1919_v61 }
 0x4e0   : > { %2040 = vmatpush1.bf16.msra.mxu0 %v5872_v19  ;;  %2081 = vmatpush1.bf16.msra.mxu1 %v5923_v47 }
 0x4e1   : > { %2041 = vmatprep.subr.bf16.mxu0 %v5876_v25  ;;  %2082 = vmatprep.subr.bf16.mxu1 %v5927_v20 }
 0x4e2   : > { %2071 = vmatprep.mubr.bf16.mxu0 %v6883_v15  ;;  %2112 = vmatprep.mubr.bf16.mxu1 %v6883_v15 }
 0x4e4   : > { %2042 = vmatpush1.bf16.msra.mxu0 %v5932_v60  ;;  %2083 = vmatpush1.bf16.msra.mxu1 %v5935_v10 }
 0x4e5   : > { %2043 = vmatprep.subr.bf16.mxu0 %v5938_v17  ;;  %2084 = vmatprep.subr.bf16.mxu1 %v5941_v46 }
 0x4e8   : > { %2044 = vmatpush1.bf16.msra.mxu0 %v5944_v50  ;;  %2085 = vmatpush1.bf16.msra.mxu1 %v5947_v13 }
 0x4e9   : > { %2045 = vmatprep.subr.bf16.mxu0 %v5950_v58  ;;  %2086 = vmatprep.subr.bf16.mxu1 %v5953_v49 }
 0x4ec   : > { %2046 = vmatpush1.bf16.msra.mxu0 %v5956_v51  ;;  %2087 = vmatpush1.bf16.msra.mxu1 %v5959_v9 }
 0x4ed   : > { %2047 = vmatprep.subr.bf16.mxu0 %v5962_v18  ;;  %2088 = vmatprep.subr.bf16.mxu1 %v5965_v22 }
 0x4f0   : > { %2048 = vmatpush1.bf16.msra.mxu0 %v5968_v31  ;;  %2089 = vmatpush1.bf16.msra.mxu1 %v5971_v16 }
 0x4f1   : > { %2049 = vmatprep.subr.bf16.mxu0 %v5974_v21  ;;  %2090 = vmatprep.subr.bf16.mxu1 %v5977_v33 }
 0x4f4   : > { %2050 = vmatpush1.bf16.msra.mxu0 %v5980_v24  ;;  %2091 = vmatpush1.bf16.msra.mxu1 %v5983_v48 }
 0x4f5   : > { %2051 = vmatprep.subr.bf16.mxu0 %v5986_v23  ;;  %2092 = vmatprep.subr.bf16.mxu1 %v5989_v27 }
 0x4f8   : > { %2052 = vmatpush1.bf16.msra.mxu0 %v5992_v11  ;;  %2093 = vmatpush1.bf16.msra.mxu1 %v5995_v26 }
 0x4f9   : > { %2053 = vmatprep.subr.bf16.mxu0 %v5998_v12  ;;  %2094 = vmatprep.subr.bf16.mxu1 %v6043_v39 }
 0x4fc   : > { %2054 = vmatpush1.bf16.msra.mxu0 %v6046_v1  ;;  %2095 = vmatpush1.bf16.msra.mxu1 %v6049_v37 }
 0x4fd   : > { %2151 = vmatprep.subr.bf16.mxu0 %v5908_v14  ;;  %2192 = vmatprep.subr.bf16.mxu1 %v5911_v36 }
 0x5b2   : > { %v1961_v5 = vpop.f32.mrb[32].mxu0  ;;  %v2002_v52 = vpop.f32.mrb[32].mxu1 }
 0x5b3   : > { %v2009_v42 = vadd.f32 %v1961_v5, %v5798_v41  ;;  %v2011_v32 = vadd.f32 %v2002_v52, %v5801_v0  ;;  %v1963_v44 = vpop.f32.mrb[33].mxu0  ;;  %v2004_v53 = vpop.f32.mrb[33].mxu1 }
 0x5b4   : > { %v2010_v6 = vadd.f32 %v1963_v44, %v5814_v45  ;;  %v2012_v59 = vadd.f32 %v2004_v53, %v5825_v38  ;;  %v1965_v55 = vpop.f32.mrb[34].mxu0  ;;  %v2006_v3 = vpop.f32.mrb[34].mxu1 }
 0x5b5   : > { %v2013_v62 = vmul.f32 0.5, %v2009_v42  ;;  %v1966_v30 = vpop.f32.mrb[35].mxu0  ;;  %v2007_v29 = vpop.f32.mrb[35].mxu1  ;;  %v2015_v40 = vmul.f32 0.5, %v2011_v32 }
 0x5b6   : > { %v2014_v63 = vmul.f32 0.5, %v2010_v6 }
 0x5b7   : > { %4630 = vtanh.f32 %v2013_v62 }
 0x5b8   : > { %4632 = vtanh.f32 %v2014_v63 }
 0x5b9   : > { %4634 = vtanh.f32 %v2012_v59 }
 0x5ba   : > { %4636 = vtanh.f32 %v2015_v40 }
 0x5c1   : > { %v4631_v35 = vpop.eup %4630 }
 0x5c2   : > { %v2019_v41 = vadd.f32 1.0, %v4631_v35  ;;  %v4633_v43 = vpop.eup %4632 }
 0x5c3   : > { %v2020_v34 = vadd.f32 1.0, %v4633_v43  ;;  %v4635_v28 = vpop.eup %4634 }
 0x5c4   : > { %v2022_v0 = vmul.f32 0.5, %v2019_v41  ;;  %v4637_v61 = vpop.eup %4636 }
 0x5c5   : > { %v2023_v45 = vmul.f32 0.5, %v2020_v34  ;;  %v2021_v5 = vadd.f32 1.0, %v4637_v61 }
 0x5c6   : > { %v2027_v7 = vmul.f32 %v4635_v28, %v2022_v0 }
 0x5c7   : > { %v2026_v38 = vmul.f32 %v2023_v45, %v6059_v2  ;;  %v2024_v52 = vmul.f32 0.5, %v2021_v5 }
 0x5c9   : > { %v6101_v54 = vadd.f32 %v2027_v7, %v2026_v38 }
 0x5cb   : > { %4638 = vtanh.f32 %v6101_v54 }
 0x5d5   : > { %v4639_v42 = vpop.eup %4638 }
 0x5d6   : > { %v2030_v32 = vmul.f32 %v4639_v42, %v2024_v52 }
 0x5d8   : > { %v2031_v44 = vpack.c.bf16 %v2030_v32, %v2030_v32 }
 0x5da   : > { %2033 = vst [vmem:[#allocation3 + $0x10] sm:$0xf] %v2031_v44  ;;  %2072 = vmatmul.mubr.bf16.vlgmr.msra.gmra.mrb[36].mxu0 %v2031_v44  ;;  %2113 = vmatmul.mubr.bf16.vlgmr.msra.gmra.mrb[36].mxu1 %v2031_v44 }
 0x5db   : > { %2152 = vmatpush1.bf16.msra.mxu0 %v5872_v19  ;;  %2193 = vmatpush1.bf16.msra.mxu1 %v5923_v47 }
 0x5dc   : > { %2153 = vmatprep.subr.bf16.mxu0 %v5876_v25  ;;  %2194 = vmatprep.subr.bf16.mxu1 %v5927_v20 }
 0x5dd   : > { %2183 = vmatprep.mubr.bf16.mxu0 %v6883_v15  ;;  %2224 = vmatprep.mubr.bf16.mxu1 %v6883_v15 }
 0x5df   : > { %2154 = vmatpush1.bf16.msra.mxu0 %v5932_v60  ;;  %2195 = vmatpush1.bf16.msra.mxu1 %v5935_v10 }
 0x5e0   : > { %2155 = vmatprep.subr.bf16.mxu0 %v5938_v17  ;;  %2196 = vmatprep.subr.bf16.mxu1 %v5941_v46 }
 0x5e3   : > { %2156 = vmatpush1.bf16.msra.mxu0 %v5944_v50  ;;  %2197 = vmatpush1.bf16.msra.mxu1 %v5947_v13 }
 0x5e4   : > { %2157 = vmatprep.subr.bf16.mxu0 %v5950_v58  ;;  %2198 = vmatprep.subr.bf16.mxu1 %v5953_v49 }
 0x5e7   : > { %2158 = vmatpush1.bf16.msra.mxu0 %v5956_v51  ;;  %2199 = vmatpush1.bf16.msra.mxu1 %v5959_v9 }
 0x5e8   : > { %2159 = vmatprep.subr.bf16.mxu0 %v5962_v18  ;;  %2200 = vmatprep.subr.bf16.mxu1 %v5965_v22 }
 0x5eb   : > { %2160 = vmatpush1.bf16.msra.mxu0 %v5968_v31  ;;  %2201 = vmatpush1.bf16.msra.mxu1 %v5971_v16 }
 0x5ec   : > { %2161 = vmatprep.subr.bf16.mxu0 %v5974_v21  ;;  %2202 = vmatprep.subr.bf16.mxu1 %v5977_v33 }
 0x5ef   : > { %2162 = vmatpush1.bf16.msra.mxu0 %v5980_v24  ;;  %2203 = vmatpush1.bf16.msra.mxu1 %v5983_v48 }
 0x5f0   : > { %2163 = vmatprep.subr.bf16.mxu0 %v5986_v23  ;;  %2204 = vmatprep.subr.bf16.mxu1 %v5989_v27 }
 0x5f3   : > { %2164 = vmatpush1.bf16.msra.mxu0 %v5992_v11  ;;  %2205 = vmatpush1.bf16.msra.mxu1 %v5995_v26 }
 0x5f4   : > { %2165 = vmatprep.subr.bf16.mxu0 %v5998_v12  ;;  %2206 = vmatprep.subr.bf16.mxu1 %v6043_v39 }
 0x5f7   : > { %2166 = vmatpush1.bf16.msra.mxu0 %v6046_v1  ;;  %2207 = vmatpush1.bf16.msra.mxu1 %v6049_v37 }
 0x5f8   : > { %2263 = vmatprep.subr.bf16.mxu0 %v5908_v14  ;;  %2304 = vmatprep.subr.bf16.mxu1 %v5911_v36 }
 0x6ad   : > { %v2073_v2 = vpop.f32.mrb[36].mxu0  ;;  %v2114_v53 = vpop.f32.mrb[36].mxu1 }
 0x6ae   : > { %v2121_v6 = vadd.f32 %v2073_v2, %v5807_v56  ;;  %v2123_v59 = vadd.f32 %v2114_v53, %v5810_v57  ;;  %v2075_v55 = vpop.f32.mrb[37].mxu0  ;;  %v2116_v3 = vpop.f32.mrb[37].mxu1 }
 0x6af   : > { %v2122_v62 = vadd.f32 %v2075_v55, %v5817_v4  ;;  %v2124_v30 = vadd.f32 %v2116_v3, %v5828_v8  ;;  %v2077_v29 = vpop.f32.mrb[38].mxu0  ;;  %v2118_v63 = vpop.f32.mrb[38].mxu1  ;;  %v4482_v55 = vld [vmem:[#allocation10] ss:$16 sps:$4 sm:$0xff]   ;;  %v4485_v3 = vld [vmem:[#allocation10 + $0x8] ss:$16 sps:$4 sm:$0xff]  }
 0x6b0   : > { %v2125_v40 = vmul.f32 0.5, %v2121_v6  ;;  %v2078_v35 = vpop.f32.mrb[39].mxu0  ;;  %v2119_v41 = vpop.f32.mrb[39].mxu1  ;;  %v2127_v36 = vmul.f32 0.5, %v2123_v59  ;;  %v4493_v29 = vld [vmem:[#allocation10 + $0x2c] ss:$16 sps:$4 sm:$0xff]  }
 0x6b1   : > { %v2126_v14 = vmul.f32 0.5, %v2122_v62  ;;  %v4488_v63 = vld [vmem:[#allocation10 + $0x20] ss:$16 sps:$4 sm:$0xff]   ;;  %v4496_v35 = vld [vmem:[#allocation10 + $0x44] ss:$16 sps:$4 sm:$0xff]  }
 0x6b2   : > { %4640 = vtanh.f32 %v2125_v40  ;;  %v4491_v40 = vld [vmem:[#allocation10 + $0x28] ss:$16 sps:$4 sm:$0xff]   ;;  %v4499_v41 = vld [vmem:[#allocation10 + $0x4c] ss:$16 sps:$4 sm:$0xff]  }
 0x6b3   : > { %4642 = vtanh.f32 %v2126_v14  ;;  %v4494_v14 = vld [vmem:[#allocation10 + $0x40] ss:$16 sps:$4 sm:$0xff]  }
 0x6b4   : > { %4644 = vtanh.f32 %v2124_v30  ;;  %v4490_v30 = vld [vmem:[#allocation10 + $0x24] ss:$16 sps:$4 sm:$0xff]  }
 0x6b5   : > { %4646 = vtanh.f32 %v2127_v36  ;;  %v4497_v36 = vld [vmem:[#allocation10 + $0x48] ss:$16 sps:$4 sm:$0xff]  }
 0x6bc   : > { %v4641_v43 = vpop.eup %4640 }
 0x6bd   : > { %v2131_v56 = vadd.f32 1.0, %v4641_v43  ;;  %v4643_v0 = vpop.eup %4642  ;;  %v4502_v43 = vld [vmem:[#allocation10 + $0x64] ss:$16 sps:$4 sm:$0xff]  }
 0x6be   : > { %v2132_v34 = vadd.f32 1.0, %v4643_v0  ;;  %v4645_v28 = vpop.eup %4644  ;;  %v4500_v0 = vld [vmem:[#allocation10 + $0x60] ss:$16 sps:$4 sm:$0xff]  }
 0x6bf   : > { %v2134_v57 = vmul.f32 0.5, %v2131_v56  ;;  %v4647_v38 = vpop.eup %4646  ;;  %v4505_v56 = vld [vmem:[#allocation10 + $0x6c] ss:$16 sps:$4 sm:$0xff]  }
 0x6c0   : > { %v2135_v4 = vmul.f32 0.5, %v2132_v34  ;;  %v2133_v61 = vadd.f32 1.0, %v4647_v38  ;;  %v4508_v34 = vld [vmem:[#allocation10 + $0x84] ss:$16 sps:$4 sm:$0xff]   ;;  %v4512_v38 = vld [vmem:[#allocation10 + $0xa0] ss:$16 sps:$4 sm:$0xff]  }
 0x6c1   : > { %v2139_v45 = vmul.f32 %v4645_v28, %v2134_v57  ;;  %v4503_v57 = vld [vmem:[#allocation10 + $0x68] ss:$16 sps:$4 sm:$0xff]   ;;  %v4511_v28 = vld [vmem:[#allocation10 + $0x8c] ss:$16 sps:$4 sm:$0xff]  }
 0x6c2   : > { %v2138_v8 = vmul.f32 %v2135_v4, %v6101_v54  ;;  %v2136_v5 = vmul.f32 0.5, %v2133_v61  ;;  %v4506_v4 = vld [vmem:[#allocation10 + $0x80] ss:$16 sps:$4 sm:$0xff]   ;;  %v4515_v61 = vld [vmem:[#allocation10 + $0xa8] ss:$16 sps:$4 sm:$0xff]  }
 0x6c4   : > { %v6143_v7 = vadd.f32 %v2139_v45, %v2138_v8  ;;  %v4509_v45 = vld [vmem:[#allocation10 + $0x88] ss:$16 sps:$4 sm:$0xff]   ;;  %v4514_v8 = vld [vmem:[#allocation10 + $0xa4] ss:$16 sps:$4 sm:$0xff]  }
 0x6c6   : > { %4648 = vtanh.f32 %v6143_v7 }
 0x6d0   : > { %v4649_v52 = vpop.eup %4648 }
 0x6d1   : > { %v2142_v42 = vmul.f32 %v4649_v52, %v2136_v5  ;;  %v4520_v5 = vld [vmem:[#allocation10 + $0xc4] ss:$16 sps:$4 sm:$0xff]   ;;  %v4523_v52 = vld [vmem:[#allocation10 + $0xcc] ss:$16 sps:$4 sm:$0xff]  }
 0x6d3   : > { %v2143_v32 = vpack.c.bf16 %v2142_v42, %v2142_v42  ;;  %v4518_v42 = vld [vmem:[#allocation10 + $0xc0] ss:$16 sps:$4 sm:$0xff]  }
 0x6d5   : > { %2145 = vst [vmem:[#allocation3 + $0x14] sm:$0xf] %v2143_v32  ;;  %2184 = vmatmul.mubr.bf16.vlgmr.msra.gmra.mrb[40].mxu0 %v2143_v32  ;;  %2225 = vmatmul.mubr.bf16.vlgmr.msra.gmra.mrb[40].mxu1 %v2143_v32  ;;  %v4521_v32 = vld [vmem:[#allocation10 + $0xc8] ss:$16 sps:$4 sm:$0xff]  }
 0x6d6   : > { %2264 = vmatpush1.bf16.msra.mxu0 %v5872_v19  ;;  %2305 = vmatpush1.bf16.msra.mxu1 %v5923_v47  ;;  %v4484_v19 = vld [vmem:[#allocation10 + $0x4] ss:$16 sps:$4 sm:$0xff]  }
 0x6d7   : > { %2265 = vmatprep.subr.bf16.mxu0 %v5876_v25  ;;  %2306 = vmatprep.subr.bf16.mxu1 %v5927_v20  ;;  %v4487_v25 = vld [vmem:[#allocation10 + $0xc] ss:$16 sps:$4 sm:$0xff]  }
 0x6d8   : > { %2295 = vmatprep.mubr.bf16.mxu0 %v6883_v15  ;;  %2336 = vmatprep.mubr.bf16.mxu1 %v6883_v15 }
 0x6da   : > { %2266 = vmatpush1.bf16.msra.mxu0 %v5932_v60  ;;  %2307 = vmatpush1.bf16.msra.mxu1 %v5935_v10  ;;  %v6903_v60 = vld [vmem:[#allocation41_spill] sm:$0xff] }
 0x6db   : > { %2267 = vmatprep.subr.bf16.mxu0 %v5938_v17  ;;  %2308 = vmatprep.subr.bf16.mxu1 %v5941_v46  ;;  %v6904_v17 = vld [vmem:[#allocation42_spill] sm:$0xff] }
 0x6de   : > { %2268 = vmatpush1.bf16.msra.mxu0 %v5944_v50  ;;  %2309 = vmatpush1.bf16.msra.mxu1 %v5947_v13 }
 0x6df   : > { %2269 = vmatprep.subr.bf16.mxu0 %v5950_v58  ;;  %2310 = vmatprep.subr.bf16.mxu1 %v5953_v49  ;;  %v6905_v58 = vld [vmem:[#allocation45_spill] sm:$0xff] }
 0x6e2   : > { %2270 = vmatpush1.bf16.msra.mxu0 %v5956_v51  ;;  %2311 = vmatpush1.bf16.msra.mxu1 %v5959_v9  ;;  %v6906_v51 = vld [vmem:[#allocation46_spill] sm:$0xff] }
 0x6e3   : > { %2271 = vmatprep.subr.bf16.mxu0 %v5962_v18  ;;  %2312 = vmatprep.subr.bf16.mxu1 %v5965_v22 }
 0x6e6   : > { %2272 = vmatpush1.bf16.msra.mxu0 %v5968_v31  ;;  %2313 = vmatpush1.bf16.msra.mxu1 %v5971_v16 }
 0x6e7   : > { %2273 = vmatprep.subr.bf16.mxu0 %v5974_v21  ;;  %2314 = vmatprep.subr.bf16.mxu1 %v5977_v33 }
 0x6ea   : > { %2274 = vmatpush1.bf16.msra.mxu0 %v5980_v24  ;;  %2315 = vmatpush1.bf16.msra.mxu1 %v5983_v48 }
 0x6eb   : > { %2275 = vmatprep.subr.bf16.mxu0 %v5986_v23  ;;  %2316 = vmatprep.subr.bf16.mxu1 %v5989_v27 }
 0x6ee   : > { %2276 = vmatpush1.bf16.msra.mxu0 %v5992_v11  ;;  %2317 = vmatpush1.bf16.msra.mxu1 %v5995_v26 }
 0x6ef   : > { %2277 = vmatprep.subr.bf16.mxu0 %v5998_v12  ;;  %2318 = vmatprep.subr.bf16.mxu1 %v6043_v39 }
 0x6f2   : > { %2278 = vmatpush1.bf16.msra.mxu0 %v6046_v1  ;;  %2319 = vmatpush1.bf16.msra.mxu1 %v6049_v37 }
 0x6f3   : > { %2627 = vmatprep.subr.bf16.mxu0 %v4484_v19  ;;  %2700 = vmatprep.subr.bf16.mxu1 %v4487_v25  ;;  %v4526_v19 = vld [vmem:[#allocation10 + $0xe4] ss:$16 sps:$4 sm:$0xff]   ;;  %v4529_v25 = vld [vmem:[#allocation10 + $0xec] ss:$16 sps:$4 sm:$0xff]  }
 0x7a8   : > { %v2185_v47 = vpop.f32.mrb[40].mxu0  ;;  %v2226_v20 = vpop.f32.mrb[40].mxu1 }
 0x7a9   : > { %v2233_v10 = vadd.f32 %v2185_v47, %v6903_v60  ;;  %v2235_v46 = vadd.f32 %v2226_v20, %v6904_v17  ;;  %v2187_v50 = vpop.f32.mrb[41].mxu0  ;;  %v2228_v13 = vpop.f32.mrb[41].mxu1  ;;  %v4524_v47 = vld [vmem:[#allocation10 + $0xe0] ss:$16 sps:$4 sm:$0xff]   ;;  %v4527_v20 = vld [vmem:[#allocation10 + $0xe8] ss:$16 sps:$4 sm:$0xff]  }
 0x7aa   : > { %v2234_v49 = vadd.f32 %v2187_v50, %v6905_v58  ;;  %v2236_v9 = vadd.f32 %v2228_v13, %v6906_v51  ;;  %v2189_v18 = vpop.f32.mrb[42].mxu0  ;;  %v2230_v22 = vpop.f32.mrb[42].mxu1  ;;  %v4530_v60 = vld [vmem:[#allocation3] sm:$0xff]   ;;  %v4532_v17 = vld [vmem:[#allocation3 + $0x10] sm:$0xff]   ;;  %v6196_v50 = vld [vmem:[#allocation12 + $0xc] ss:$16 sps:$4 sm:$0xff]  }
 0x7ab   : > { %v2237_v31 = vmul.f32 0.5, %v2233_v10  ;;  %v2190_v16 = vpop.f32.mrb[43].mxu0  ;;  %v2231_v21 = vpop.f32.mrb[43].mxu1  ;;  %v2239_v24 = vmul.f32 0.5, %v2235_v46  ;;  %v4531_v10 = vld [vmem:[#allocation3 + $0x8] sm:$0xff]  }
 0x7ac   : > { %v2238_v33 = vmul.f32 0.5, %v2234_v49  ;;  %v6194_v46 = vld [vmem:[#allocation12 + $0x4] ss:$16 sps:$4 sm:$0xff]   ;;  %v6198_v13 = vld [vmem:[#allocation12] ss:$16 sps:$4 sm:$0xff]  }
 0x7ad   : > { %4650 = vtanh.f32 %v2237_v31  ;;  %v6200_v58 = vld [vmem:[#allocation12 + $0x8] ss:$16 sps:$4 sm:$0xff]   ;;  %v6206_v49 = vld [vmem:[#allocation12 + $0x24] ss:$16 sps:$4 sm:$0xff]   ;;  %v6208_v51 = vld [vmem:[#allocation12 + $0x2c] ss:$16 sps:$4 sm:$0xff]  }
 0x7ae   : > { %4652 = vtanh.f32 %v2238_v33  ;;  %v6212_v18 = vld [vmem:[#allocation12 + $0x28] ss:$16 sps:$4 sm:$0xff]   ;;  %v6216_v22 = vld [vmem:[#allocation12 + $0x44] ss:$16 sps:$4 sm:$0xff]   ;;  %v6220_v31 = vld [vmem:[#allocation12 + $0x40] ss:$16 sps:$4 sm:$0xff]  }
 0x7af   : > { %4654 = vtanh.f32 %v2236_v9  ;;  %v6210_v9 = vld [vmem:[#allocation12 + $0x20] ss:$16 sps:$4 sm:$0xff]   ;;  %v6222_v16 = vld [vmem:[#allocation12 + $0x4c] ss:$16 sps:$4 sm:$0xff]   ;;  %v6224_v21 = vld [vmem:[#allocation12 + $0x48] ss:$16 sps:$4 sm:$0xff]  }
 0x7b0   : > { %4656 = vtanh.f32 %v2239_v24  ;;  %v6227_v33 = vld [vmem:[#allocation12 + $0x64] ss:$16 sps:$4 sm:$0xff]   ;;  %v6229_v24 = vld [vmem:[#allocation12 + $0x6c] ss:$16 sps:$4 sm:$0xff]  }
 0x7b7   : > { %v4651_v48 = vpop.eup %4650 }
 0x7b8   : > { %v2243_v23 = vadd.f32 1.0, %v4651_v48  ;;  %v4653_v27 = vpop.eup %4652  ;;  %v6234_v48 = vld [vmem:[#allocation12 + $0x60] ss:$16 sps:$4 sm:$0xff]  }
 0x7b9   : > { %v2244_v26 = vadd.f32 1.0, %v4653_v27  ;;  %v4655_v12 = vpop.eup %4654  ;;  %v6240_v27 = vld [vmem:[#allocation12 + $0x84] ss:$16 sps:$4 sm:$0xff]  }
 0x7ba   : > { %v2246_v11 = vmul.f32 0.5, %v2243_v23  ;;  %v4657_v44 = vpop.eup %4656  ;;  %v6236_v23 = vld [vmem:[#allocation12 + $0x68] ss:$16 sps:$4 sm:$0xff]  }
 0x7bb   : > { %v2247_v39 = vmul.f32 0.5, %v2244_v26  ;;  %v2245_v2 = vadd.f32 1.0, %v4657_v44  ;;  %v6246_v26 = vld [vmem:[#allocation12 + $0x80] ss:$16 sps:$4 sm:$0xff]   ;;  %v6260_v44 = vld [vmem:[#allocation12 + $0xa8] ss:$16 sps:$4 sm:$0xff]  }
 0x7bc   : > { %v2251_v1 = vmul.f32 %v4655_v12, %v2246_v11  ;;  %v6242_v11 = vld [vmem:[#allocation12 + $0x8c] ss:$16 sps:$4 sm:$0xff]   ;;  %v6248_v12 = vld [vmem:[#allocation12 + $0x88] ss:$16 sps:$4 sm:$0xff]  }
 0x7bd   : > { %v2250_v37 = vmul.f32 %v2247_v39, %v6143_v7  ;;  %v2248_v53 = vmul.f32 0.5, %v2245_v2  ;;  %v4517_v7 = vld [vmem:[#allocation10 + $0xac] ss:$16 sps:$4 sm:$0xff]   ;;  %v6252_v39 = vld [vmem:[#allocation12 + $0xa4] ss:$16 sps:$4 sm:$0xff]  }
 0x7be   : > { %v6264_v2 = vld [vmem:[#allocation12 + $0xc4] ss:$16 sps:$4 sm:$0xff]  }
 0x7bf   : > { %v6183_v54 = vadd.f32 %v2251_v1, %v2250_v37  ;;  %v6254_v1 = vld [vmem:[#allocation12 + $0xac] ss:$16 sps:$4 sm:$0xff]   ;;  %v6258_v37 = vld [vmem:[#allocation12 + $0xa0] ss:$16 sps:$4 sm:$0xff]  }
 0x7c1   : > { %4658 = vtanh.f32 %v6183_v54 }
 0x7cb   : > { %v4659_v6 = vpop.eup %4658 }
 0x7cc   : > { %v2254_v59 = vmul.f32 %v4659_v6, %v2248_v53  ;;  %v6266_v53 = vld [vmem:[#allocation12 + $0xcc] ss:$16 sps:$4 sm:$0xff]   ;;  %v6270_v6 = vld [vmem:[#allocation12 + $0xc0] ss:$16 sps:$4 sm:$0xff]  }
 0x7ce   : > { %v2255_v62 = vpack.c.bf16 %v2254_v59, %v2254_v59  ;;  %v6272_v59 = vld [vmem:[#allocation12 + $0xc8] ss:$16 sps:$4 sm:$0xff]  }
 0x7d0   : > { %2257 = vst [vmem:[#allocation3 + $0x18] sm:$0xf] %v2255_v62  ;;  %2296 = vmatmul.mubr.bf16.vlgmr.msra.gmra.mrb[44].mxu0 %v2255_v62  ;;  %2337 = vmatmul.mubr.bf16.vlgmr.msra.gmra.mrb[44].mxu1 %v2255_v62  ;;  %v6282_v62 = vld [vmem:[#allocation12 + $0xe0] ss:$16 sps:$4 sm:$0xff]  }
 0x7d1   : > { %2628 = vmatpush1.bf16.msra.mxu0 %v4482_v55  ;;  %2701 = vmatpush1.bf16.msra.mxu1 %v4485_v3  ;;  %v6276_v55 = vld [vmem:[#allocation12 + $0xe4] ss:$16 sps:$4 sm:$0xff]   ;;  %v6278_v3 = vld [vmem:[#allocation12 + $0xec] ss:$16 sps:$4 sm:$0xff]  }
 0x7d2   : > { %2629 = vmatprep.subr.bf16.mxu0 %v4490_v30  ;;  %2702 = vmatprep.subr.bf16.mxu1 %v4493_v29  ;;  %v6284_v30 = vld [vmem:[#allocation12 + $0xe8] ss:$16 sps:$4 sm:$0xff]  }
 0x7d3   : > { %2659 = vmatprep.mubr.bf16.mxu0 %v6883_v15  ;;  %2732 = vmatprep.mubr.bf16.mxu1 %v6883_v15 }
 0x7d5   : > { %2630 = vmatpush1.bf16.msra.mxu0 %v4488_v63  ;;  %2703 = vmatpush1.bf16.msra.mxu1 %v4491_v40  ;;  %v6907_v40 = vld [vmem:[#allocation43_spill] sm:$0xff] }
 0x7d6   : > { %2631 = vmatprep.subr.bf16.mxu0 %v4496_v35  ;;  %2704 = vmatprep.subr.bf16.mxu1 %v4499_v41  ;;  %v6908_v41 = vld [vmem:[#allocation44_spill] sm:$0xff] }
 0x7d9   : > { %2632 = vmatpush1.bf16.msra.mxu0 %v4494_v14  ;;  %2705 = vmatpush1.bf16.msra.mxu1 %v4497_v36 }
 0x7da   : > { %2633 = vmatprep.subr.bf16.mxu0 %v4502_v43  ;;  %2706 = vmatprep.subr.bf16.mxu1 %v4505_v56  ;;  %v6909_v56 = vld [vmem:[#allocation47_spill] sm:$0xff] }
 0x7dd   : > { %2634 = vmatpush1.bf16.msra.mxu0 %v4500_v0  ;;  %2707 = vmatpush1.bf16.msra.mxu1 %v4503_v57  ;;  %v6910_v57 = vld [vmem:[#allocation48_spill] sm:$0xff] }
 0x7de   : > { %2635 = vmatprep.subr.bf16.mxu0 %v4508_v34  ;;  %2708 = vmatprep.subr.bf16.mxu1 %v4511_v28 }
 0x7e1   : > { %2636 = vmatpush1.bf16.msra.mxu0 %v4506_v4  ;;  %2709 = vmatpush1.bf16.msra.mxu1 %v4509_v45 }
 0x7e2   : > { %2637 = vmatprep.subr.bf16.mxu0 %v4514_v8  ;;  %2710 = vmatprep.subr.bf16.mxu1 %v4517_v7 }
 0x7e5   : > { %2638 = vmatpush1.bf16.msra.mxu0 %v4512_v38  ;;  %2711 = vmatpush1.bf16.msra.mxu1 %v4515_v61 }
 0x7e6   : > { %2639 = vmatprep.subr.bf16.mxu0 %v4520_v5  ;;  %2712 = vmatprep.subr.bf16.mxu1 %v4523_v52 }
 0x7e9   : > { %2640 = vmatpush1.bf16.msra.mxu0 %v4518_v42  ;;  %2713 = vmatpush1.bf16.msra.mxu1 %v4521_v32 }
 0x7ea   : > { %2641 = vmatprep.subr.bf16.mxu0 %v4526_v19  ;;  %2714 = vmatprep.subr.bf16.mxu1 %v4529_v25 }
 0x7ed   : > { %2642 = vmatpush1.bf16.msra.mxu0 %v4524_v47  ;;  %2715 = vmatpush1.bf16.msra.mxu1 %v4527_v20 }
 0x7ee   : > { %3022 = vmatprep.subr.bf16.mxu0 %v6194_v46  ;;  %3063 = vmatprep.subr.bf16.mxu1 %v6196_v50 }
 0x7f0   : > { %2660 = vmatmul.mubr.bf16.vlgmr.msra.gmra.mrb[48].mxu0 %v4530_v60  ;;  %2733 = vmatmul.mubr.bf16.vlgmr.msra.gmra.mrb[48].mxu1 %v4530_v60 }
 0x7f1   : > { %2669 = vmatprep.mubr.bf16.mxu0 %v6883_v15  ;;  %2742 = vmatprep.mubr.bf16.mxu1 %v6883_v15 }
 0x7f2   : > { %3023 = vmatpush1.bf16.msra.mxu0 %v6198_v13  ;;  %3064 = vmatpush1.bf16.msra.mxu1 %v6200_v58 }
 0x7f3   : > { %3024 = vmatprep.subr.bf16.mxu0 %v6206_v49  ;;  %3065 = vmatprep.subr.bf16.mxu1 %v6208_v51 }
 0x7f6   : > { %3025 = vmatpush1.bf16.msra.mxu0 %v6210_v9  ;;  %3066 = vmatpush1.bf16.msra.mxu1 %v6212_v18 }
 0x7f7   : > { %3026 = vmatprep.subr.bf16.mxu0 %v6216_v22  ;;  %3067 = vmatprep.subr.bf16.mxu1 %v6222_v16 }
 0x7f8   : > { %2670 = vmatmul.mubr.bf16.gmra.mrb[52].mxu0 %v4531_v10  ;;  %2743 = vmatmul.mubr.bf16.gmra.mrb[52].mxu1 %v4531_v10 }
 0x7f9   : > { %2679 = vmatprep.mubr.bf16.mxu0 %v6883_v15  ;;  %2752 = vmatprep.mubr.bf16.mxu1 %v6883_v15 }
 0x7fa   : > { %3027 = vmatpush1.bf16.msra.mxu0 %v6220_v31  ;;  %3068 = vmatpush1.bf16.msra.mxu1 %v6224_v21 }
 0x7fb   : > { %3028 = vmatprep.subr.bf16.mxu0 %v6227_v33  ;;  %3069 = vmatprep.subr.bf16.mxu1 %v6229_v24 }
 0x7fe   : > { %3029 = vmatpush1.bf16.msra.mxu0 %v6234_v48  ;;  %3070 = vmatpush1.bf16.msra.mxu1 %v6236_v23 }
 0x7ff   : > { %3030 = vmatprep.subr.bf16.mxu0 %v6240_v27  ;;  %3071 = vmatprep.subr.bf16.mxu1 %v6242_v11 }
 0x800   : > { %2680 = vmatmul.mubr.bf16.gmra.mrb[56].mxu0 %v4532_v17  ;;  %2753 = vmatmul.mubr.bf16.gmra.mrb[56].mxu1 %v4532_v17 }
 0x801   : > { %2689 = vmatprep.mubr.bf16.mxu0 %v6883_v15  ;;  %2762 = vmatprep.mubr.bf16.mxu1 %v6883_v15 }
 0x802   : > { %3031 = vmatpush1.bf16.msra.mxu0 %v6246_v26  ;;  %3072 = vmatpush1.bf16.msra.mxu1 %v6248_v12 }
 0x803   : > { %3032 = vmatprep.subr.bf16.mxu0 %v6252_v39  ;;  %3073 = vmatprep.subr.bf16.mxu1 %v6254_v1 }
 0x806   : > { %3033 = vmatpush1.bf16.msra.mxu0 %v6258_v37  ;;  %3074 = vmatpush1.bf16.msra.mxu1 %v6260_v44 }
 0x807   : > { %3034 = vmatprep.subr.bf16.mxu0 %v6264_v2  ;;  %3075 = vmatprep.subr.bf16.mxu1 %v6266_v53 }
 0x80a   : > { %3035 = vmatpush1.bf16.msra.mxu0 %v6270_v6  ;;  %3076 = vmatpush1.bf16.msra.mxu1 %v6272_v59 }
 0x80b   : > { %3036 = vmatprep.subr.bf16.mxu0 %v6276_v55  ;;  %3077 = vmatprep.subr.bf16.mxu1 %v6278_v3 }
 0x80e   : > { %3037 = vmatpush1.bf16.msra.mxu0 %v6282_v62  ;;  %3078 = vmatpush1.bf16.msra.mxu1 %v6284_v30 }
 0x80f   : > { %3131 = vmatprep.subr.bf16.mxu0 %v6194_v46  ;;  %3172 = vmatprep.subr.bf16.mxu1 %v6196_v50 }
 0x8a3   : > { %v2297_v29 = vpop.f32.mrb[44].mxu0  ;;  %v2338_v63 = vpop.f32.mrb[44].mxu1 }
 0x8a4   : > { %v2345_v35 = vadd.f32 %v2297_v29, %v6907_v40  ;;  %v2347_v14 = vadd.f32 %v2338_v63, %v6908_v41  ;;  %v2299_v36 = vpop.f32.mrb[45].mxu0  ;;  %v2340_v43 = vpop.f32.mrb[45].mxu1 }
 0x8a5   : > { %v2346_v0 = vadd.f32 %v2299_v36, %v6909_v56  ;;  %v2348_v34 = vadd.f32 %v2340_v43, %v6910_v57  ;;  %v2301_v28 = vpop.f32.mrb[46].mxu0  ;;  %v2342_v4 = vpop.f32.mrb[46].mxu1 }
 0x8a6   : > { %v2349_v45 = vmul.f32 0.5, %v2345_v35  ;;  %v2302_v8 = vpop.f32.mrb[47].mxu0  ;;  %v2343_v7 = vpop.f32.mrb[47].mxu1  ;;  %v2351_v61 = vmul.f32 0.5, %v2347_v14 }
 0x8a7   : > { %v2350_v38 = vmul.f32 0.5, %v2346_v0 }
 0x8a8   : > { %4660 = vtanh.f32 %v2349_v45 }
 0x8a9   : > { %4662 = vtanh.f32 %v2350_v38 }
 0x8aa   : > { %4664 = vtanh.f32 %v2348_v34 }
 0x8ab   : > { %4666 = vtanh.f32 %v2351_v61 }
 0x8b2   : > { %v4661_v5 = vpop.eup %4660 }
 0x8b3   : > { %v2355_v52 = vadd.f32 1.0, %v4661_v5  ;;  %v4663_v42 = vpop.eup %4662 }
 0x8b4   : > { %v2356_v19 = vadd.f32 1.0, %v4663_v42  ;;  %v4665_v25 = vpop.eup %4664 }
 0x8b5   : > { %v2358_v32 = vmul.f32 0.5, %v2355_v52  ;;  %v4667_v17 = vpop.eup %4666 }
 0x8b6   : > { %v2359_v47 = vmul.f32 0.5, %v2356_v19  ;;  %v2357_v29 = vadd.f32 1.0, %v4667_v17  ;;  %v2402_v17 = vld [vmem:[%s6792_s6] sm:$0xf] }
 0x8b7   : > { %v2363_v20 = vmul.f32 %v4665_v25, %v2358_v32 }
 0x8b8   : > { %v2362_v60 = vmul.f32 %v2359_v47, %v6183_v54  ;;  %v2360_v43 = vmul.f32 0.5, %v2357_v29 }
 0x8ba   : > { %v2364_v10 = vadd.f32 %v2363_v20, %v2362_v60 }
 0x8bc   : > { %4668 = vtanh.f32 %v2364_v10 }
 0x8c3   : > { %v6297_v63 = vpop.f32.mrb[48].mxu0  ;;  %v6299_v40 = vpop.f32.mrb[48].mxu1 }
 0x8c4   : > { %v6301_v35 = vpop.f32.mrb[49].mxu0  ;;  %v6303_v41 = vpop.f32.mrb[49].mxu1 }
 0x8c5   : > { %v6305_v14 = vpop.f32.mrb[50].mxu0  ;;  %v6307_v36 = vpop.f32.mrb[50].mxu1 }
 0x8c6   : > { %v6309_v56 = vpop.f32.mrb[51].mxu0  ;;  %v6311_v54 = vpop.f32.mrb[51].mxu1 }
 0x8c7   : > { %v4669_v0 = vpop.eup %4668 }
 0x8c8   : > { %v2366_v57 = vmul.f32 %v4669_v0, %v2360_v43 }
 0x8ca   : > { %v2367_v34 = vpack.c.bf16 %v2366_v57, %v2366_v57 }
 0x8cb   : > { %v6313_v28 = vpop.f32.mrb[52].mxu0  ;;  %v6315_v4 = vpop.f32.mrb[52].mxu1 }
 0x8cc   : > { %6911 = vst [vmem:[#allocation21_spill] sm:$0xff] %v6313_v28  ;;  %6912 = vst [vmem:[#allocation22_spill] sm:$0xff] %v6315_v4  ;;  %v6317_v45 = vpop.f32.mrb[53].mxu0  ;;  %v6319_v8 = vpop.f32.mrb[53].mxu1 }
 0x8cd   : > { %2369 = vst [vmem:[#allocation3 + $0x1c] sm:$0xf] %v2367_v34  ;;  %6913 = vst [vmem:[#allocation24_spill] sm:$0xff] %v6317_v45  ;;  %v6321_v7 = vpop.f32.mrb[54].mxu0  ;;  %v6323_v38 = vpop.f32.mrb[54].mxu1 }
 0x8ce   : > { %6914 = vst [vmem:[#allocation23_spill] sm:$0xff] %v6319_v8  ;;  %6915 = vst [vmem:[#allocation26_spill] sm:$0xff] %v6321_v7  ;;  %v6325_v61 = vpop.f32.mrb[55].mxu0  ;;  %v6327_v5 = vpop.f32.mrb[55].mxu1 }
 0x8cf   : > { %6916 = vst [vmem:[#allocation25_spill] sm:$0xff] %v6323_v38  ;;  %6917 = vst [vmem:[#allocation28_spill] sm:$0xff] %v6325_v61 }
 0x8d0   : > { %6918 = vst [vmem:[#allocation27_spill] sm:$0xff] %v6327_v5 }
 0x8d3   : > { %v6329_v52 = vpop.f32.mrb[56].mxu0  ;;  %v6331_v42 = vpop.f32.mrb[56].mxu1 }
 0x8d4   : > { %6919 = vst [vmem:[#allocation29_spill] sm:$0xff] %v6329_v52  ;;  %6920 = vst [vmem:[#allocation30_spill] sm:$0xff] %v6331_v42  ;;  %v4571_v32 = vld [vmem:[#allocation3 + $0x18] sm:$0xff]   ;;  %v6333_v19 = vpop.f32.mrb[57].mxu0  ;;  %v6335_v25 = vpop.f32.mrb[57].mxu1 }
 0x8d5   : > { %6921 = vst [vmem:[#allocation32_spill] sm:$0xff] %v6333_v19  ;;  %6922 = vst [vmem:[#allocation31_spill] sm:$0xff] %v6335_v25  ;;  %v6337_v47 = vpop.f32.mrb[58].mxu0  ;;  %v6339_v20 = vpop.f32.mrb[58].mxu1  ;;  %2690 = vmatmul.mubr.bf16.gmra.mrb[60].mxu0 %v4571_v32  ;;  %2763 = vmatmul.mubr.bf16.gmra.mrb[60].mxu1 %v4571_v32 }
 0x8d6   : > { %6923 = vst [vmem:[#allocation34_spill] sm:$0xff] %v6337_v47  ;;  %6924 = vst [vmem:[#allocation33_spill] sm:$0xff] %v6339_v20  ;;  %v6341_v60 = vpop.f32.mrb[59].mxu0  ;;  %v6343_v10 = vpop.f32.mrb[59].mxu1  ;;  %3054 = vmatprep.mubr.bf16.mxu0 %v6883_v15  ;;  %3095 = vmatprep.mubr.bf16.mxu1 %v6883_v15 }
 0x8d7   : > { %6925 = vst [vmem:[#allocation36_spill] sm:$0xff] %v6341_v60  ;;  %6926 = vst [vmem:[#allocation35_spill] sm:$0xff] %v6343_v10  ;;  %v6933_v10 = vld [vmem:[#allocation40_spill] sm:$0xff] }
 0x8d8   : > { %v6934_v60 = vsub.s32 0, %v6933_v10  ;;  %v6935_v47 = vsub.s32 2, %v6933_v10 }
 0x8da   : > { %v6400_v20 = vrot.slane %v2402_v17, %v6934_v60  ;;  %v6404_v25 = vrot.slane %v2402_v17, %v6935_v47 }
 0x8dc   : > { %v2794_v60 = vadd.f32 %v6400_v20, %v6297_v63 }
 0x8dd   : > { %3055 = vmatmul.mubr.bf16.vlgmr.msra.gmra.mrb[64].mxu0 %v6883_v15  ;;  %3096 = vmatmul.mubr.bf16.vlgmr.msra.gmra.mrb[64].mxu1 %v6883_v15 }
 0x8de   : > { %3132 = vmatpush1.bf16.msra.mxu0 %v6198_v13  ;;  %3173 = vmatpush1.bf16.msra.mxu1 %v6200_v58 }
 0x8df   : > { %3133 = vmatprep.subr.bf16.mxu0 %v6206_v49  ;;  %3174 = vmatprep.subr.bf16.mxu1 %v6208_v51 }
 0x8e0   : > { %3163 = vmatprep.mubr.bf16.mxu0 %v6883_v15  ;;  %3204 = vmatprep.mubr.bf16.mxu1 %v6883_v15 }
 0x8e2   : > { %3134 = vmatpush1.bf16.msra.mxu0 %v6210_v9  ;;  %3175 = vmatpush1.bf16.msra.mxu1 %v6212_v18 }
 0x8e3   : > { %3135 = vmatprep.subr.bf16.mxu0 %v6216_v22  ;;  %3176 = vmatprep.subr.bf16.mxu1 %v6222_v16 }
 0x8e6   : > { %3136 = vmatpush1.bf16.msra.mxu0 %v6220_v31  ;;  %3177 = vmatpush1.bf16.msra.mxu1 %v6224_v21 }
 0x8e7   : > { %3137 = vmatprep.subr.bf16.mxu0 %v6227_v33  ;;  %3178 = vmatprep.subr.bf16.mxu1 %v6229_v24 }
 0x8ea   : > { %3138 = vmatpush1.bf16.msra.mxu0 %v6234_v48  ;;  %3179 = vmatpush1.bf16.msra.mxu1 %v6236_v23 }
 0x8eb   : > { %3139 = vmatprep.subr.bf16.mxu0 %v6240_v27  ;;  %3180 = vmatprep.subr.bf16.mxu1 %v6242_v11 }
 0x8ee   : > { %3140 = vmatpush1.bf16.msra.mxu0 %v6246_v26  ;;  %3181 = vmatpush1.bf16.msra.mxu1 %v6248_v12 }
 0x8ef   : > { %3141 = vmatprep.subr.bf16.mxu0 %v6252_v39  ;;  %3182 = vmatprep.subr.bf16.mxu1 %v6254_v1 }
 0x8f2   : > { %3142 = vmatpush1.bf16.msra.mxu0 %v6258_v37  ;;  %3183 = vmatpush1.bf16.msra.mxu1 %v6260_v44 }
 0x8f3   : > { %3143 = vmatprep.subr.bf16.mxu0 %v6264_v2  ;;  %3184 = vmatprep.subr.bf16.mxu1 %v6266_v53 }
 0x8f6   : > { %3144 = vmatpush1.bf16.msra.mxu0 %v6270_v6  ;;  %3185 = vmatpush1.bf16.msra.mxu1 %v6272_v59 }
 0x8f7   : > { %3145 = vmatprep.subr.bf16.mxu0 %v6276_v55  ;;  %3186 = vmatprep.subr.bf16.mxu1 %v6278_v3 }
 0x8fa   : > { %3146 = vmatpush1.bf16.msra.mxu0 %v6282_v62  ;;  %3187 = vmatpush1.bf16.msra.mxu1 %v6284_v30 }
 0x8fb   : > { %3240 = vmatprep.subr.bf16.mxu0 %v6194_v46  ;;  %3281 = vmatprep.subr.bf16.mxu1 %v6196_v50 }
 0x9a8   : > { %v6386_v29 = vpop.f32.mrb[60].mxu0  ;;  %v6388_v43 = vpop.f32.mrb[60].mxu1 }
 0x9a9   : > { %6927 = vst [vmem:[#allocation37_spill] sm:$0xff] %v6386_v29  ;;  %6928 = vst [vmem:[#allocation38_spill] sm:$0xff] %v6388_v43  ;;  %v6390_v0 = vpop.f32.mrb[61].mxu0  ;;  %v6392_v57 = vpop.f32.mrb[61].mxu1 }
 0x9aa   : > { %6929 = vst [vmem:[#allocation39_spill] sm:$0xff] %v6390_v0  ;;  %6930 = vst [vmem:[#allocation41_spill] sm:$0xff] %v6392_v57  ;;  %v6394_v34 = vpop.f32.mrb[62].mxu0  ;;  %v6396_v32 = vpop.f32.mrb[62].mxu1  ;;  %v6938_v0 = vsub.s32 1, %v6933_v10 }
 0x9ab   : > { %6931 = vst [vmem:[#allocation42_spill] sm:$0xff] %v6394_v34  ;;  %6932 = vst [vmem:[#allocation45_spill] sm:$0xff] %v6396_v32  ;;  %v6406_v19 = vpop.f32.mrb[63].mxu0  ;;  %v6408_v29 = vpop.f32.mrb[63].mxu1  ;;  %v6939_v34 = vsub.s32 3, %v6933_v10  ;;  %v2796_v32 = vadd.f32 %v6404_v25, %v6299_v40 }
 0x9ac   : > { %6936 = vst [vmem:[#allocation46_spill] sm:$0xff] %v6406_v19  ;;  %6937 = vst [vmem:[#allocation43_spill] sm:$0xff] %v6408_v29  ;;  %v6412_v43 = vrot.slane %v2402_v17, %v6938_v0 }
 0x9ad   : > { %v6416_v57 = vrot.slane %v2402_v17, %v6939_v34 }
 0x9ae   : > { %v2795_v47 = vadd.f32 %v6412_v43, %v6301_v35 }
 0x9af   : > { %v2797_v29 = vadd.f32 %v6416_v57, %v6303_v41 }
 0x9b0   : > { %v3056_v19 = vpop.f32.mrb[64].mxu0  ;;  %v3097_v42 = vpop.f32.mrb[64].mxu1 }
 0x9b1   : > { %v3104_v0 = vadd.f32 %v3056_v19, %v2794_v60  ;;  %v3106_v52 = vadd.f32 %v3097_v42, %v2796_v32  ;;  %v3058_v5 = vpop.f32.mrb[65].mxu0  ;;  %v3099_v10 = vpop.f32.mrb[65].mxu1 }
 0x9b2   : > { %v3105_v17 = vadd.f32 %v3058_v5, %v2795_v47  ;;  %v3107_v34 = vadd.f32 %v3099_v10, %v2797_v29  ;;  %v3060_v61 = vpop.f32.mrb[66].mxu0  ;;  %v3101_v38 = vpop.f32.mrb[66].mxu1 }
 0x9b3   : > { %v3108_v63 = vmul.f32 0.5, %v3104_v0  ;;  %v3061_v7 = vpop.f32.mrb[67].mxu0  ;;  %v3102_v8 = vpop.f32.mrb[67].mxu1  ;;  %v3110_v35 = vmul.f32 0.5, %v3106_v52  ;;  %v2801_v0 = vadd.f32 %v6416_v57, %v6311_v54 }
 0x9b4   : > { %v3109_v40 = vmul.f32 0.5, %v3105_v17 }
 0x9b5   : > { %4670 = vtanh.f32 %v3108_v63 }
 0x9b6   : > { %4672 = vtanh.f32 %v3109_v40 }
 0x9b7   : > { %4674 = vtanh.f32 %v3107_v34 }
 0x9b8   : > { %4676 = vtanh.f32 %v3110_v35 }
 0x9bf   : > { %v4671_v45 = vpop.eup %4670 }
 0x9c0   : > { %v3114_v41 = vadd.f32 1.0, %v4671_v45  ;;  %v4673_v4 = vpop.eup %4672  ;;  %v2799_v45 = vadd.f32 %v6412_v43, %v6309_v56 }
 0x9c1   : > { %v3115_v42 = vadd.f32 1.0, %v4673_v4  ;;  %v4675_v19 = vpop.eup %4674  ;;  %v2800_v4 = vadd.f32 %v6404_v25, %v6307_v36 }
 0x9c2   : > { %v3117_v28 = vmul.f32 0.5, %v3114_v41  ;;  %v4677_v8 = vpop.eup %4676 }
 0x9c3   : > { %v3118_v32 = vmul.f32 0.5, %v3115_v42  ;;  %v3116_v7 = vadd.f32 1.0, %v4677_v8 }
 0x9c4   : > { %v3122_v5 = vmul.f32 %v4675_v19, %v3117_v28  ;;  %v2798_v28 = vadd.f32 %v6400_v20, %v6305_v14 }
 0x9c5   : > { %v3121_v29 = vmul.f32 0.0, %v3118_v32  ;;  %v3119_v38 = vmul.f32 0.5, %v3116_v7 }
 0x9c7   : > { %v6426_v61 = vadd.f32 %v3122_v5, %v3121_v29 }
 0x9c9   : > { %4678 = vtanh.f32 %v6426_v61 }
 0x9d3   : > { %v4679_v60 = vpop.eup %4678 }
 0x9d4   : > { %v3125_v47 = vmul.f32 %v4679_v60, %v3119_v38 }
 0x9d6   : > { %v3130_v52 = vpack.c.bf16 %v3125_v47, %v3125_v47 }
 0x9d8   : > { %3164 = vmatmul.mubr.bf16.vlgmr.msra.gmra.mrb[68].mxu0 %v3130_v52  ;;  %3205 = vmatmul.mubr.bf16.vlgmr.msra.gmra.mrb[68].mxu1 %v3130_v52 }
 0x9d9   : > { %3241 = vmatpush1.bf16.msra.mxu0 %v6198_v13  ;;  %3282 = vmatpush1.bf16.msra.mxu1 %v6200_v58 }
 0x9da   : > { %3242 = vmatprep.subr.bf16.mxu0 %v6206_v49  ;;  %3283 = vmatprep.subr.bf16.mxu1 %v6208_v51 }
 0x9db   : > { %3272 = vmatprep.mubr.bf16.mxu0 %v6883_v15  ;;  %3313 = vmatprep.mubr.bf16.mxu1 %v6883_v15 }
 0x9dd   : > { %3243 = vmatpush1.bf16.msra.mxu0 %v6210_v9  ;;  %3284 = vmatpush1.bf16.msra.mxu1 %v6212_v18 }
 0x9de   : > { %3244 = vmatprep.subr.bf16.mxu0 %v6216_v22  ;;  %3285 = vmatprep.subr.bf16.mxu1 %v6222_v16 }
 0x9e1   : > { %3245 = vmatpush1.bf16.msra.mxu0 %v6220_v31  ;;  %3286 = vmatpush1.bf16.msra.mxu1 %v6224_v21 }
 0x9e2   : > { %3246 = vmatprep.subr.bf16.mxu0 %v6227_v33  ;;  %3287 = vmatprep.subr.bf16.mxu1 %v6229_v24 }
 0x9e5   : > { %3247 = vmatpush1.bf16.msra.mxu0 %v6234_v48  ;;  %3288 = vmatpush1.bf16.msra.mxu1 %v6236_v23 }
 0x9e6   : > { %3248 = vmatprep.subr.bf16.mxu0 %v6240_v27  ;;  %3289 = vmatprep.subr.bf16.mxu1 %v6242_v11 }
 0x9e9   : > { %3249 = vmatpush1.bf16.msra.mxu0 %v6246_v26  ;;  %3290 = vmatpush1.bf16.msra.mxu1 %v6248_v12 }
 0x9ea   : > { %3250 = vmatprep.subr.bf16.mxu0 %v6252_v39  ;;  %3291 = vmatprep.subr.bf16.mxu1 %v6254_v1 }
 0x9ed   : > { %3251 = vmatpush1.bf16.msra.mxu0 %v6258_v37  ;;  %3292 = vmatpush1.bf16.msra.mxu1 %v6260_v44 }
 0x9ee   : > { %3252 = vmatprep.subr.bf16.mxu0 %v6264_v2  ;;  %3293 = vmatprep.subr.bf16.mxu1 %v6266_v53 }
 0x9f1   : > { %3253 = vmatpush1.bf16.msra.mxu0 %v6270_v6  ;;  %3294 = vmatpush1.bf16.msra.mxu1 %v6272_v59 }
 0x9f2   : > { %3254 = vmatprep.subr.bf16.mxu0 %v6276_v55  ;;  %3295 = vmatprep.subr.bf16.mxu1 %v6278_v3 }
 0x9f5   : > { %3255 = vmatpush1.bf16.msra.mxu0 %v6282_v62  ;;  %3296 = vmatpush1.bf16.msra.mxu1 %v6284_v30 }
 0x9f6   : > { %3349 = vmatprep.subr.bf16.mxu0 %v6194_v46  ;;  %3390 = vmatprep.subr.bf16.mxu1 %v6196_v50 }
 0xaab   : > { %v3165_v10 = vpop.f32.mrb[68].mxu0  ;;  %v3206_v17 = vpop.f32.mrb[68].mxu1 }
 0xaac   : > { %v3213_v34 = vadd.f32 %v3165_v10, %v2798_v28  ;;  %v3215_v63 = vadd.f32 %v3206_v17, %v2800_v4  ;;  %v3167_v40 = vpop.f32.mrb[69].mxu0  ;;  %v3208_v35 = vpop.f32.mrb[69].mxu1 }
 0xaad   : > { %v3214_v41 = vadd.f32 %v3167_v40, %v2799_v45  ;;  %v3216_v42 = vadd.f32 %v3208_v35, %v2801_v0  ;;  %v3169_v19 = vpop.f32.mrb[70].mxu0  ;;  %v3210_v32 = vpop.f32.mrb[70].mxu1 }
 0xaae   : > { %v3217_v14 = vmul.f32 0.5, %v3213_v34  ;;  %v3170_v5 = vpop.f32.mrb[71].mxu0  ;;  %v3211_v29 = vpop.f32.mrb[71].mxu1  ;;  %v3219_v56 = vmul.f32 0.5, %v3215_v63  ;;  %v6942_v19 = vld [vmem:[#allocation24_spill] sm:$0xff] }
 0xaaf   : > { %v3218_v36 = vmul.f32 0.5, %v3214_v41  ;;  %v6941_v41 = vld [vmem:[#allocation22_spill] sm:$0xff]  ;;  %v2803_v32 = vadd.f32 %v6412_v43, %v6942_v19 }
 0xab0   : > { %4680 = vtanh.f32 %v3217_v14  ;;  %v6943_v14 = vld [vmem:[#allocation23_spill] sm:$0xff] }
 0xab1   : > { %4682 = vtanh.f32 %v3218_v36  ;;  %v2805_v5 = vadd.f32 %v6416_v57, %v6943_v14 }
 0xab2   : > { %4684 = vtanh.f32 %v3216_v42  ;;  %v2804_v42 = vadd.f32 %v6404_v25, %v6941_v41 }
 0xab3   : > { %4686 = vtanh.f32 %v3219_v56 }
 0xaba   : > { %v4681_v8 = vpop.eup %4680 }
 0xabb   : > { %v3223_v54 = vadd.f32 1.0, %v4681_v8  ;;  %v4683_v7 = vpop.eup %4682 }
 0xabc   : > { %v3224_v60 = vadd.f32 1.0, %v4683_v7  ;;  %v4685_v47 = vpop.eup %4684 }
 0xabd   : > { %v3226_v38 = vmul.f32 0.5, %v3223_v54  ;;  %v4687_v0 = vpop.eup %4686 }
 0xabe   : > { %v3227_v52 = vmul.f32 0.5, %v3224_v60  ;;  %v3225_v10 = vadd.f32 1.0, %v4687_v0 }
 0xabf   : > { %v3231_v28 = vmul.f32 %v4685_v47, %v3226_v38 }
 0xac0   : > { %v3230_v4 = vmul.f32 %v3227_v52, %v6426_v61  ;;  %v3228_v17 = vmul.f32 0.5, %v3225_v10  ;;  %v6940_v61 = vld [vmem:[#allocation21_spill] sm:$0xff] }
 0xac1   : > { %v2802_v35 = vadd.f32 %v6400_v20, %v6940_v61 }
 0xac2   : > { %v6472_v45 = vadd.f32 %v3231_v28, %v3230_v4 }
 0xac4   : > { %4688 = vtanh.f32 %v6472_v45 }
 0xace   : > { %v4689_v34 = vpop.eup %4688 }
 0xacf   : > { %v3234_v63 = vmul.f32 %v4689_v34, %v3228_v17 }
 0xad1   : > { %v3239_v40 = vpack.c.bf16 %v3234_v63, %v3234_v63 }
 0xad3   : > { %3273 = vmatmul.mubr.bf16.vlgmr.msra.gmra.mrb[72].mxu0 %v3239_v40  ;;  %3314 = vmatmul.mubr.bf16.vlgmr.msra.gmra.mrb[72].mxu1 %v3239_v40 }
 0xad4   : > { %3350 = vmatpush1.bf16.msra.mxu0 %v6198_v13  ;;  %3391 = vmatpush1.bf16.msra.mxu1 %v6200_v58 }
 0xad5   : > { %3351 = vmatprep.subr.bf16.mxu0 %v6206_v49  ;;  %3392 = vmatprep.subr.bf16.mxu1 %v6208_v51 }
 0xad6   : > { %3381 = vmatprep.mubr.bf16.mxu0 %v6883_v15  ;;  %3422 = vmatprep.mubr.bf16.mxu1 %v6883_v15 }
 0xad8   : > { %3352 = vmatpush1.bf16.msra.mxu0 %v6210_v9  ;;  %3393 = vmatpush1.bf16.msra.mxu1 %v6212_v18 }
 0xad9   : > { %3353 = vmatprep.subr.bf16.mxu0 %v6216_v22  ;;  %3394 = vmatprep.subr.bf16.mxu1 %v6222_v16 }
 0xadc   : > { %3354 = vmatpush1.bf16.msra.mxu0 %v6220_v31  ;;  %3395 = vmatpush1.bf16.msra.mxu1 %v6224_v21 }
 0xadd   : > { %3355 = vmatprep.subr.bf16.mxu0 %v6227_v33  ;;  %3396 = vmatprep.subr.bf16.mxu1 %v6229_v24 }
 0xae0   : > { %3356 = vmatpush1.bf16.msra.mxu0 %v6234_v48  ;;  %3397 = vmatpush1.bf16.msra.mxu1 %v6236_v23 }
 0xae1   : > { %3357 = vmatprep.subr.bf16.mxu0 %v6240_v27  ;;  %3398 = vmatprep.subr.bf16.mxu1 %v6242_v11 }
 0xae4   : > { %3358 = vmatpush1.bf16.msra.mxu0 %v6246_v26  ;;  %3399 = vmatpush1.bf16.msra.mxu1 %v6248_v12 }
 0xae5   : > { %3359 = vmatprep.subr.bf16.mxu0 %v6252_v39  ;;  %3400 = vmatprep.subr.bf16.mxu1 %v6254_v1 }
 0xae8   : > { %3360 = vmatpush1.bf16.msra.mxu0 %v6258_v37  ;;  %3401 = vmatpush1.bf16.msra.mxu1 %v6260_v44 }
 0xae9   : > { %3361 = vmatprep.subr.bf16.mxu0 %v6264_v2  ;;  %3402 = vmatprep.subr.bf16.mxu1 %v6266_v53 }
 0xaec   : > { %3362 = vmatpush1.bf16.msra.mxu0 %v6270_v6  ;;  %3403 = vmatpush1.bf16.msra.mxu1 %v6272_v59 }
 0xaed   : > { %3363 = vmatprep.subr.bf16.mxu0 %v6276_v55  ;;  %3404 = vmatprep.subr.bf16.mxu1 %v6278_v3 }
 0xaf0   : > { %3364 = vmatpush1.bf16.msra.mxu0 %v6282_v62  ;;  %3405 = vmatpush1.bf16.msra.mxu1 %v6284_v30 }
 0xaf1   : > { %3458 = vmatprep.subr.bf16.mxu0 %v6194_v46  ;;  %3499 = vmatprep.subr.bf16.mxu1 %v6196_v50 }
 0xba6   : > { %v3274_v29 = vpop.f32.mrb[72].mxu0  ;;  %v3315_v36 = vpop.f32.mrb[72].mxu1 }
 0xba7   : > { %v3322_v56 = vadd.f32 %v3274_v29, %v2802_v35  ;;  %v3324_v8 = vadd.f32 %v3315_v36, %v2804_v42  ;;  %v3276_v54 = vpop.f32.mrb[73].mxu0  ;;  %v3317_v7 = vpop.f32.mrb[73].mxu1 }
 0xba8   : > { %v3323_v38 = vadd.f32 %v3276_v54, %v2803_v32  ;;  %v3325_v60 = vadd.f32 %v3317_v7, %v2805_v5  ;;  %v3278_v47 = vpop.f32.mrb[74].mxu0  ;;  %v3319_v52 = vpop.f32.mrb[74].mxu1 }
 0xba9   : > { %v3326_v28 = vmul.f32 0.5, %v3322_v56  ;;  %v3279_v4 = vpop.f32.mrb[75].mxu0  ;;  %v3320_v0 = vpop.f32.mrb[75].mxu1  ;;  %v3328_v17 = vmul.f32 0.5, %v3324_v8  ;;  %v6946_v47 = vld [vmem:[#allocation28_spill] sm:$0xff] }
 0xbaa   : > { %v3327_v10 = vmul.f32 0.5, %v3323_v38  ;;  %v6945_v38 = vld [vmem:[#allocation25_spill] sm:$0xff]  ;;  %v2807_v52 = vadd.f32 %v6412_v43, %v6946_v47 }
 0xbab   : > { %4690 = vtanh.f32 %v3326_v28  ;;  %v6947_v28 = vld [vmem:[#allocation27_spill] sm:$0xff] }
 0xbac   : > { %4692 = vtanh.f32 %v3327_v10  ;;  %v2809_v4 = vadd.f32 %v6416_v57, %v6947_v28 }
 0xbad   : > { %4694 = vtanh.f32 %v3325_v60  ;;  %v2808_v60 = vadd.f32 %v6404_v25, %v6945_v38 }
 0xbae   : > { %4696 = vtanh.f32 %v3328_v17 }
 0xbb5   : > { %v4691_v34 = vpop.eup %4690 }
 0xbb6   : > { %v3332_v63 = vadd.f32 1.0, %v4691_v34  ;;  %v4693_v40 = vpop.eup %4692 }
 0xbb7   : > { %v3333_v35 = vadd.f32 1.0, %v4693_v40  ;;  %v4695_v41 = vpop.eup %4694 }
 0xbb8   : > { %v3335_v61 = vmul.f32 0.5, %v3332_v63  ;;  %v4697_v5 = vpop.eup %4696 }
 0xbb9   : > { %v3336_v42 = vmul.f32 0.5, %v3333_v35  ;;  %v3334_v29 = vadd.f32 1.0, %v4697_v5 }
 0xbba   : > { %v3340_v19 = vmul.f32 %v4695_v41, %v3335_v61 }
 0xbbb   : > { %v3339_v32 = vmul.f32 %v3336_v42, %v6472_v45  ;;  %v3337_v36 = vmul.f32 0.5, %v3334_v29  ;;  %v6944_v45 = vld [vmem:[#allocation26_spill] sm:$0xff] }
 0xbbc   : > { %v2806_v7 = vadd.f32 %v6400_v20, %v6944_v45 }
 0xbbd   : > { %v6518_v14 = vadd.f32 %v3340_v19, %v3339_v32 }
 0xbbf   : > { %4698 = vtanh.f32 %v6518_v14 }
 0xbc9   : > { %v4699_v56 = vpop.eup %4698 }
 0xbca   : > { %v3343_v8 = vmul.f32 %v4699_v56, %v3337_v36 }
 0xbcc   : > { %v3348_v54 = vpack.c.bf16 %v3343_v8, %v3343_v8 }
 0xbce   : > { %3382 = vmatmul.mubr.bf16.vlgmr.msra.gmra.mrb[76].mxu0 %v3348_v54  ;;  %3423 = vmatmul.mubr.bf16.vlgmr.msra.gmra.mrb[76].mxu1 %v3348_v54 }
 0xbcf   : > { %3459 = vmatpush1.bf16.msra.mxu0 %v6198_v13  ;;  %3500 = vmatpush1.bf16.msra.mxu1 %v6200_v58 }
 0xbd0   : > { %3460 = vmatprep.subr.bf16.mxu0 %v6206_v49  ;;  %3501 = vmatprep.subr.bf16.mxu1 %v6208_v51 }
 0xbd1   : > { %3490 = vmatprep.mubr.bf16.mxu0 %v6883_v15  ;;  %3531 = vmatprep.mubr.bf16.mxu1 %v6883_v15 }
 0xbd3   : > { %3461 = vmatpush1.bf16.msra.mxu0 %v6210_v9  ;;  %3502 = vmatpush1.bf16.msra.mxu1 %v6212_v18 }
 0xbd4   : > { %3462 = vmatprep.subr.bf16.mxu0 %v6216_v22  ;;  %3503 = vmatprep.subr.bf16.mxu1 %v6222_v16 }
 0xbd7   : > { %3463 = vmatpush1.bf16.msra.mxu0 %v6220_v31  ;;  %3504 = vmatpush1.bf16.msra.mxu1 %v6224_v21 }
 0xbd8   : > { %3464 = vmatprep.subr.bf16.mxu0 %v6227_v33  ;;  %3505 = vmatprep.subr.bf16.mxu1 %v6229_v24 }
 0xbdb   : > { %3465 = vmatpush1.bf16.msra.mxu0 %v6234_v48  ;;  %3506 = vmatpush1.bf16.msra.mxu1 %v6236_v23 }
 0xbdc   : > { %3466 = vmatprep.subr.bf16.mxu0 %v6240_v27  ;;  %3507 = vmatprep.subr.bf16.mxu1 %v6242_v11 }
 0xbdf   : > { %3467 = vmatpush1.bf16.msra.mxu0 %v6246_v26  ;;  %3508 = vmatpush1.bf16.msra.mxu1 %v6248_v12 }
 0xbe0   : > { %3468 = vmatprep.subr.bf16.mxu0 %v6252_v39  ;;  %3509 = vmatprep.subr.bf16.mxu1 %v6254_v1 }
 0xbe3   : > { %3469 = vmatpush1.bf16.msra.mxu0 %v6258_v37  ;;  %3510 = vmatpush1.bf16.msra.mxu1 %v6260_v44 }
 0xbe4   : > { %3470 = vmatprep.subr.bf16.mxu0 %v6264_v2  ;;  %3511 = vmatprep.subr.bf16.mxu1 %v6266_v53 }
 0xbe7   : > { %3471 = vmatpush1.bf16.msra.mxu0 %v6270_v6  ;;  %3512 = vmatpush1.bf16.msra.mxu1 %v6272_v59 }
 0xbe8   : > { %3472 = vmatprep.subr.bf16.mxu0 %v6276_v55  ;;  %3513 = vmatprep.subr.bf16.mxu1 %v6278_v3 }
 0xbeb   : > { %3473 = vmatpush1.bf16.msra.mxu0 %v6282_v62  ;;  %3514 = vmatpush1.bf16.msra.mxu1 %v6284_v30 }
 0xbec   : > { %3567 = vmatprep.subr.bf16.mxu0 %v6194_v46  ;;  %3608 = vmatprep.subr.bf16.mxu1 %v6196_v50 }
 0xca1   : > { %v3383_v0 = vpop.f32.mrb[76].mxu0  ;;  %v3424_v10 = vpop.f32.mrb[76].mxu1 }
 0xca2   : > { %v3431_v17 = vadd.f32 %v3383_v0, %v2806_v7  ;;  %v3433_v34 = vadd.f32 %v3424_v10, %v2808_v60  ;;  %v3385_v63 = vpop.f32.mrb[77].mxu0  ;;  %v3426_v40 = vpop.f32.mrb[77].mxu1 }
 0xca3   : > { %v3432_v61 = vadd.f32 %v3385_v63, %v2807_v52  ;;  %v3434_v35 = vadd.f32 %v3426_v40, %v2809_v4  ;;  %v3387_v41 = vpop.f32.mrb[78].mxu0  ;;  %v3428_v42 = vpop.f32.mrb[78].mxu1 }
 0xca4   : > { %v3435_v19 = vmul.f32 0.5, %v3431_v17  ;;  %v3388_v32 = vpop.f32.mrb[79].mxu0  ;;  %v3429_v5 = vpop.f32.mrb[79].mxu1  ;;  %v3437_v36 = vmul.f32 0.5, %v3433_v34 }
 0xca5   : > { %v3436_v29 = vmul.f32 0.5, %v3432_v61 }
 0xca6   : > { %4700 = vtanh.f32 %v3435_v19 }
 0xca7   : > { %4702 = vtanh.f32 %v3436_v29 }
 0xca8   : > { %4704 = vtanh.f32 %v3434_v35 }
 0xca9   : > { %4706 = vtanh.f32 %v3437_v36 }
 0xcb0   : > { %v4701_v56 = vpop.eup %4700 }
 0xcb1   : > { %v3441_v8 = vadd.f32 1.0, %v4701_v56  ;;  %v4703_v54 = vpop.eup %4702 }
 0xcb2   : > { %v3442_v7 = vadd.f32 1.0, %v4703_v54  ;;  %v4705_v38 = vpop.eup %4704 }
 0xcb3   : > { %v3444_v45 = vmul.f32 0.5, %v3441_v8  ;;  %v4707_v4 = vpop.eup %4706 }
 0xcb4   : > { %v3445_v60 = vmul.f32 0.5, %v3442_v7  ;;  %v3443_v0 = vadd.f32 1.0, %v4707_v4  ;;  %v6616_v4 = vld [vmem:[#allocation12 + $0x8] ss:$16 sps:$4 sm:$0xff]  }
 0xcb5   : > { %v3449_v47 = vmul.f32 %v4705_v38, %v3444_v45 }
 0xcb6   : > { %v3448_v52 = vmul.f32 %v3445_v60, %v6518_v14  ;;  %v3446_v10 = vmul.f32 0.5, %v3443_v0  ;;  %v6622_v0 = vld [vmem:[#allocation12 + $0x2c] ss:$16 sps:$4 sm:$0xff]  }
 0xcb8   : > { %v6564_v28 = vadd.f32 %v3449_v47, %v3448_v52  ;;  %v6613_v52 = vld [vmem:[#allocation12] ss:$16 sps:$4 sm:$0xff]  }
 0xcba   : > { %4708 = vtanh.f32 %v6564_v28 }
 0xcc4   : > { %v4709_v17 = vpop.eup %4708 }
 0xcc5   : > { %v3452_v34 = vmul.f32 %v4709_v17, %v3446_v10  ;;  %v6627_v10 = vld [vmem:[#allocation12 + $0x20] ss:$16 sps:$4 sm:$0xff]   ;;  %v6630_v17 = vld [vmem:[#allocation12 + $0x28] ss:$16 sps:$4 sm:$0xff]  }
 0xcc7   : > { %v3457_v63 = vpack.c.bf16 %v3452_v34, %v3452_v34  ;;  %v6633_v34 = vld [vmem:[#allocation12 + $0x44] ss:$16 sps:$4 sm:$0xff]  }
 0xcc9   : > { %3491 = vmatmul.mubr.bf16.vlgmr.msra.gmra.mrb[80].mxu0 %v3457_v63  ;;  %3532 = vmatmul.mubr.bf16.vlgmr.msra.gmra.mrb[80].mxu1 %v3457_v63  ;;  %v6636_v63 = vld [vmem:[#allocation12 + $0x4c] ss:$16 sps:$4 sm:$0xff]  }
 0xcca   : > { %3568 = vmatpush1.bf16.msra.mxu0 %v6198_v13  ;;  %3609 = vmatpush1.bf16.msra.mxu1 %v6200_v58  ;;  %v6948_v13 = vld [vmem:[#allocation29_spill] sm:$0xff] }
 0xccb   : > { %3569 = vmatprep.subr.bf16.mxu0 %v6206_v49  ;;  %3610 = vmatprep.subr.bf16.mxu1 %v6208_v51  ;;  %v2810_v58 = vadd.f32 %v6400_v20, %v6948_v13  ;;  %v6949_v49 = vld [vmem:[#allocation30_spill] sm:$0xff]  ;;  %v6639_v13 = vld [vmem:[#allocation12 + $0x40] ss:$16 sps:$4 sm:$0xff]  }
 0xccc   : > { %3599 = vmatprep.mubr.bf16.mxu0 %v6883_v15  ;;  %3640 = vmatprep.mubr.bf16.mxu1 %v6883_v15  ;;  %v2812_v51 = vadd.f32 %v6404_v25, %v6949_v49  ;;  %v6645_v49 = vld [vmem:[#allocation12 + $0x64] ss:$16 sps:$4 sm:$0xff]  }
 0xcce   : > { %3570 = vmatpush1.bf16.msra.mxu0 %v6210_v9  ;;  %3611 = vmatpush1.bf16.msra.mxu1 %v6212_v18  ;;  %v6950_v9 = vld [vmem:[#allocation32_spill] sm:$0xff] }
 0xccf   : > { %3571 = vmatprep.subr.bf16.mxu0 %v6216_v22  ;;  %3612 = vmatprep.subr.bf16.mxu1 %v6222_v16  ;;  %v2811_v18 = vadd.f32 %v6412_v43, %v6950_v9  ;;  %v6951_v22 = vld [vmem:[#allocation31_spill] sm:$0xff] }
 0xcd0   : > { %v6651_v9 = vld [vmem:[#allocation12 + $0x60] ss:$16 sps:$4 sm:$0xff]  }
 0xcd2   : > { %3572 = vmatpush1.bf16.msra.mxu0 %v6220_v31  ;;  %3613 = vmatpush1.bf16.msra.mxu1 %v6224_v21  ;;  %v2813_v31 = vadd.f32 %v6416_v57, %v6951_v22  ;;  %v6657_v22 = vld [vmem:[#allocation12 + $0x84] ss:$16 sps:$4 sm:$0xff]  }
 0xcd3   : > { %3573 = vmatprep.subr.bf16.mxu0 %v6227_v33  ;;  %3614 = vmatprep.subr.bf16.mxu1 %v6229_v24 }
 0xcd6   : > { %3574 = vmatpush1.bf16.msra.mxu0 %v6234_v48  ;;  %3615 = vmatpush1.bf16.msra.mxu1 %v6236_v23 }
 0xcd7   : > { %3575 = vmatprep.subr.bf16.mxu0 %v6240_v27  ;;  %3616 = vmatprep.subr.bf16.mxu1 %v6242_v11 }
 0xcda   : > { %3576 = vmatpush1.bf16.msra.mxu0 %v6246_v26  ;;  %3617 = vmatpush1.bf16.msra.mxu1 %v6248_v12 }
 0xcdb   : > { %3577 = vmatprep.subr.bf16.mxu0 %v6252_v39  ;;  %3618 = vmatprep.subr.bf16.mxu1 %v6254_v1 }
 0xcde   : > { %3578 = vmatpush1.bf16.msra.mxu0 %v6258_v37  ;;  %3619 = vmatpush1.bf16.msra.mxu1 %v6260_v44 }
 0xcdf   : > { %3579 = vmatprep.subr.bf16.mxu0 %v6264_v2  ;;  %3620 = vmatprep.subr.bf16.mxu1 %v6266_v53 }
 0xce2   : > { %3580 = vmatpush1.bf16.msra.mxu0 %v6270_v6  ;;  %3621 = vmatpush1.bf16.msra.mxu1 %v6272_v59 }
 0xce3   : > { %3581 = vmatprep.subr.bf16.mxu0 %v6276_v55  ;;  %3622 = vmatprep.subr.bf16.mxu1 %v6278_v3 }
 0xce6   : > { %3582 = vmatpush1.bf16.msra.mxu0 %v6282_v62  ;;  %3623 = vmatpush1.bf16.msra.mxu1 %v6284_v30 }
 0xce7   : > { %3676 = vmatprep.subr.bf16.mxu0 %v6194_v46  ;;  %3717 = vmatprep.subr.bf16.mxu1 %v6196_v50 }
 0xd9c   : > { %v3492_v16 = vpop.f32.mrb[80].mxu0  ;;  %v3533_v21 = vpop.f32.mrb[80].mxu1 }
 0xd9d   : > { %v3540_v33 = vadd.f32 %v3492_v16, %v2810_v58  ;;  %v3542_v24 = vadd.f32 %v3533_v21, %v2812_v51  ;;  %v3494_v48 = vpop.f32.mrb[81].mxu0  ;;  %v3535_v46 = vpop.f32.mrb[81].mxu1  ;;  %v6642_v58 = vld [vmem:[#allocation12 + $0x48] ss:$16 sps:$4 sm:$0xff]   ;;  %v6648_v51 = vld [vmem:[#allocation12 + $0x6c] ss:$16 sps:$4 sm:$0xff]  }
 0xd9e   : > { %v3541_v23 = vadd.f32 %v3494_v48, %v2811_v18  ;;  %v3543_v50 = vadd.f32 %v3535_v46, %v2813_v31  ;;  %v3496_v27 = vpop.f32.mrb[82].mxu0  ;;  %v3537_v11 = vpop.f32.mrb[82].mxu1  ;;  %v6654_v18 = vld [vmem:[#allocation12 + $0x68] ss:$16 sps:$4 sm:$0xff]   ;;  %v6660_v31 = vld [vmem:[#allocation12 + $0x8c] ss:$16 sps:$4 sm:$0xff]  }
 0xd9f   : > { %v3544_v26 = vmul.f32 0.5, %v3540_v33  ;;  %v3497_v12 = vpop.f32.mrb[83].mxu0  ;;  %v3538_v14 = vpop.f32.mrb[83].mxu1  ;;  %v3546_v61 = vmul.f32 0.5, %v3542_v24  ;;  %v6663_v16 = vld [vmem:[#allocation12 + $0x80] ss:$16 sps:$4 sm:$0xff]  }
 0xda0   : > { %v3545_v40 = vmul.f32 0.5, %v3541_v23  ;;  %v6666_v21 = vld [vmem:[#allocation12 + $0x88] ss:$16 sps:$4 sm:$0xff]  }
 0xda1   : > { %4710 = vtanh.f32 %v3544_v26 }
 0xda2   : > { %4712 = vtanh.f32 %v3545_v40 }
 0xda3   : > { %4714 = vtanh.f32 %v3543_v50 }
 0xda4   : > { %4716 = vtanh.f32 %v3546_v61 }
 0xdab   : > { %v4711_v35 = vpop.eup %4710 }
 0xdac   : > { %v3550_v41 = vadd.f32 1.0, %v4711_v35  ;;  %v4713_v42 = vpop.eup %4712 }
 0xdad   : > { %v3551_v32 = vadd.f32 1.0, %v4713_v42  ;;  %v4715_v5 = vpop.eup %4714 }
 0xdae   : > { %v3553_v19 = vmul.f32 0.5, %v3550_v41  ;;  %v4717_v54 = vpop.eup %4716 }
 0xdaf   : > { %v3554_v29 = vmul.f32 0.5, %v3551_v32  ;;  %v3552_v45 = vadd.f32 1.0, %v4717_v54 }
 0xdb0   : > { %v3558_v36 = vmul.f32 %v4715_v5, %v3553_v19 }
 0xdb1   : > { %v3557_v56 = vmul.f32 %v3554_v29, %v6564_v28  ;;  %v3555_v7 = vmul.f32 0.5, %v3552_v45  ;;  %v6619_v28 = vld [vmem:[#allocation12 + $0x24] ss:$16 sps:$4 sm:$0xff]  }
 0xdb3   : > { %v6610_v8 = vadd.f32 %v3558_v36, %v3557_v56 }
 0xdb5   : > { %4718 = vtanh.f32 %v6610_v8 }
 0xdbf   : > { %v4719_v38 = vpop.eup %4718 }
 0xdc0   : > { %v3561_v60 = vmul.f32 %v4719_v38, %v3555_v7 }
 0xdc2   : > { %v3566_v47 = vpack.c.bf16 %v3561_v60, %v3561_v60 }
 0xdc4   : > { %3600 = vmatmul.mubr.bf16.vlgmr.msra.gmra.mrb[84].mxu0 %v3566_v47  ;;  %3641 = vmatmul.mubr.bf16.vlgmr.msra.gmra.mrb[84].mxu1 %v3566_v47 }
 0xdc5   : > { %3677 = vmatpush1.bf16.msra.mxu0 %v6613_v52  ;;  %3718 = vmatpush1.bf16.msra.mxu1 %v6616_v4 }
 0xdc6   : > { %3678 = vmatprep.subr.bf16.mxu0 %v6619_v28  ;;  %3719 = vmatprep.subr.bf16.mxu1 %v6622_v0 }
 0xdc7   : > { %3708 = vmatprep.mubr.bf16.mxu0 %v6883_v15  ;;  %3749 = vmatprep.mubr.bf16.mxu1 %v6883_v15 }
 0xdc9   : > { %3679 = vmatpush1.bf16.msra.mxu0 %v6627_v10  ;;  %3720 = vmatpush1.bf16.msra.mxu1 %v6630_v17 }
 0xdca   : > { %3680 = vmatprep.subr.bf16.mxu0 %v6633_v34  ;;  %3721 = vmatprep.subr.bf16.mxu1 %v6636_v63 }
 0xdcd   : > { %3681 = vmatpush1.bf16.msra.mxu0 %v6639_v13  ;;  %3722 = vmatpush1.bf16.msra.mxu1 %v6642_v58 }
 0xdce   : > { %3682 = vmatprep.subr.bf16.mxu0 %v6645_v49  ;;  %3723 = vmatprep.subr.bf16.mxu1 %v6648_v51 }
 0xdd1   : > { %3683 = vmatpush1.bf16.msra.mxu0 %v6651_v9  ;;  %3724 = vmatpush1.bf16.msra.mxu1 %v6654_v18 }
 0xdd2   : > { %3684 = vmatprep.subr.bf16.mxu0 %v6657_v22  ;;  %3725 = vmatprep.subr.bf16.mxu1 %v6660_v31 }
 0xdd5   : > { %3685 = vmatpush1.bf16.msra.mxu0 %v6663_v16  ;;  %3726 = vmatpush1.bf16.msra.mxu1 %v6666_v21 }
 0xdd6   : > { %3686 = vmatprep.subr.bf16.mxu0 %v6252_v39  ;;  %3727 = vmatprep.subr.bf16.mxu1 %v6254_v1  ;;  %v4800_v39 = vld [vmem:[#allocation12 + $0x4] ss:$16 sps:$4 sm:$0xff]   ;;  %v4801_v1 = vld [vmem:[#allocation12 + $0xc] ss:$16 sps:$4 sm:$0xff]  }
 0xdd9   : > { %3687 = vmatpush1.bf16.msra.mxu0 %v6258_v37  ;;  %3728 = vmatpush1.bf16.msra.mxu1 %v6260_v44  ;;  %v6952_v37 = vld [vmem:[#allocation34_spill] sm:$0xff] }
 0xdda   : > { %3688 = vmatprep.subr.bf16.mxu0 %v6264_v2  ;;  %3729 = vmatprep.subr.bf16.mxu1 %v6266_v53  ;;  %v2814_v44 = vadd.f32 %v6400_v20, %v6952_v37  ;;  %v6953_v2 = vld [vmem:[#allocation33_spill] sm:$0xff] }
 0xddb   : > { %v2816_v53 = vadd.f32 %v6404_v25, %v6953_v2 }
 0xddd   : > { %3689 = vmatpush1.bf16.msra.mxu0 %v6270_v6  ;;  %3730 = vmatpush1.bf16.msra.mxu1 %v6272_v59  ;;  %v6954_v6 = vld [vmem:[#allocation36_spill] sm:$0xff] }
 0xdde   : > { %3690 = vmatprep.subr.bf16.mxu0 %v6276_v55  ;;  %3731 = vmatprep.subr.bf16.mxu1 %v6278_v3  ;;  %v2815_v59 = vadd.f32 %v6412_v43, %v6954_v6  ;;  %v6955_v55 = vld [vmem:[#allocation35_spill] sm:$0xff] }
 0xddf   : > { %v2817_v3 = vadd.f32 %v6416_v57, %v6955_v55 }
 0xde1   : > { %3691 = vmatpush1.bf16.msra.mxu0 %v6282_v62  ;;  %3732 = vmatpush1.bf16.msra.mxu1 %v6284_v30 }
 0xde2   : > { %3785 = vmatprep.subr.bf16.mxu0 %v4800_v39  ;;  %3826 = vmatprep.subr.bf16.mxu1 %v4801_v1 }
 0xe97   : > { %v3601_v33 = vpop.f32.mrb[84].mxu0  ;;  %v3642_v62 = vpop.f32.mrb[84].mxu1 }
 0xe98   : > { %v3649_v24 = vadd.f32 %v3601_v33, %v2814_v44  ;;  %v3651_v30 = vadd.f32 %v3642_v62, %v2816_v53  ;;  %v3603_v48 = vpop.f32.mrb[85].mxu0  ;;  %v3644_v46 = vpop.f32.mrb[85].mxu1 }
 0xe99   : > { %v3650_v23 = vadd.f32 %v3603_v48, %v2815_v59  ;;  %v3652_v50 = vadd.f32 %v3644_v46, %v2817_v3  ;;  %v3605_v27 = vpop.f32.mrb[86].mxu0  ;;  %v3646_v11 = vpop.f32.mrb[86].mxu1 }
 0xe9a   : > { %v3653_v26 = vmul.f32 0.5, %v3649_v24  ;;  %v3606_v12 = vpop.f32.mrb[87].mxu0  ;;  %v3647_v14 = vpop.f32.mrb[87].mxu1  ;;  %v3655_v61 = vmul.f32 0.5, %v3651_v30 }
 0xe9b   : > { %v3654_v40 = vmul.f32 0.5, %v3650_v23 }
 0xe9c   : > { %4720 = vtanh.f32 %v3653_v26 }
 0xe9d   : > { %4722 = vtanh.f32 %v3654_v40 }
 0xe9e   : > { %4724 = vtanh.f32 %v3652_v50 }
 0xe9f   : > { %4726 = vtanh.f32 %v3655_v61 }
 0xea6   : > { %v4721_v35 = vpop.eup %4720 }
 0xea7   : > { %v3659_v41 = vadd.f32 1.0, %v4721_v35  ;;  %v4723_v42 = vpop.eup %4722 }
 0xea8   : > { %v3660_v32 = vadd.f32 1.0, %v4723_v42  ;;  %v4725_v5 = vpop.eup %4724 }
 0xea9   : > { %v3662_v19 = vmul.f32 0.5, %v3659_v41  ;;  %v4727_v45 = vpop.eup %4726 }
 0xeaa   : > { %v3663_v29 = vmul.f32 0.5, %v3660_v32  ;;  %v3661_v7 = vadd.f32 1.0, %v4727_v45  ;;  %v4583_v45 = vld [vmem:[#allocation13 + $0x8] sm:$0xff]  }
 0xeab   : > { %v3667_v36 = vmul.f32 %v4725_v5, %v3662_v19 }
 0xeac   : > { %v3666_v56 = vmul.f32 %v3663_v29, %v6610_v8  ;;  %v3664_v38 = vmul.f32 0.5, %v3661_v7  ;;  %v4803_v8 = vld [vmem:[#allocation12 + $0xac] ss:$16 sps:$4 sm:$0xff]  }
 0xead   : > { %v4585_v7 = vld [vmem:[#allocation13 + $0x18] sm:$0xff]  }
 0xeae   : > { %v6690_v54 = vadd.f32 %v3667_v36, %v3666_v56  ;;  %v4582_v36 = vld [vmem:[#allocation13] sm:$0xff]   ;;  %v5079_v56 = vmov 0.0  }
 0xeb0   : > { %4728 = vtanh.f32 %v6690_v54 }
 0xeba   : > { %v4729_v60 = vpop.eup %4728 }
 0xebb   : > { %v3670_v47 = vmul.f32 %v4729_v60, %v3664_v38  ;;  %v4586_v38 = vld [vmem:[#allocation13 + $0x20] sm:$0xff]   ;;  %v4587_v60 = vld [vmem:[#allocation13 + $0x28] sm:$0xff]  }
 0xebd   : > { %v3675_v39 = vpack.c.bf16 %v3670_v47, %v3670_v47  ;;  %v4588_v47 = vld [vmem:[#allocation13 + $0x30] sm:$0xff]  }
 0xebf   : > { %3709 = vmatmul.mubr.bf16.vlgmr.msra.gmra.mrb[88].mxu0 %v3675_v39  ;;  %3750 = vmatmul.mubr.bf16.vlgmr.msra.gmra.mrb[88].mxu1 %v3675_v39  ;;  %v4589_v39 = vld [vmem:[#allocation13 + $0x38] sm:$0xff]  }
 0xec0   : > { %3786 = vmatpush1.bf16.msra.mxu0 %v6613_v52  ;;  %3827 = vmatpush1.bf16.msra.mxu1 %v6616_v4  ;;  %v4804_v52 = vld [vmem:[#allocation12 + $0xa0] ss:$16 sps:$4 sm:$0xff]   ;;  %v4805_v4 = vld [vmem:[#allocation12 + $0xa8] ss:$16 sps:$4 sm:$0xff]  }
 0xec1   : > { %3787 = vmatprep.subr.bf16.mxu0 %v6619_v28  ;;  %3828 = vmatprep.subr.bf16.mxu1 %v6622_v0  ;;  %v4806_v28 = vld [vmem:[#allocation12 + $0xc4] ss:$16 sps:$4 sm:$0xff]   ;;  %v4807_v0 = vld [vmem:[#allocation12 + $0xcc] ss:$16 sps:$4 sm:$0xff]  }
 0xec2   : > { %3817 = vmatprep.mubr.bf16.mxu0 %v6883_v15  ;;  %3858 = vmatprep.mubr.bf16.mxu1 %v6883_v15  ;;  %v4802_v15 = vld [vmem:[#allocation12 + $0xa4] ss:$16 sps:$4 sm:$0xff]  }
 0xec4   : > { %3788 = vmatpush1.bf16.msra.mxu0 %v6627_v10  ;;  %3829 = vmatpush1.bf16.msra.mxu1 %v6630_v17  ;;  %v4808_v10 = vld [vmem:[#allocation12 + $0xc0] ss:$16 sps:$4 sm:$0xff]   ;;  %v4809_v17 = vld [vmem:[#allocation12 + $0xc8] ss:$16 sps:$4 sm:$0xff]  }
 0xec5   : > { %3789 = vmatprep.subr.bf16.mxu0 %v6633_v34  ;;  %3830 = vmatprep.subr.bf16.mxu1 %v6636_v63  ;;  %v4810_v34 = vld [vmem:[#allocation12 + $0xe4] ss:$16 sps:$4 sm:$0xff]   ;;  %v4811_v63 = vld [vmem:[#allocation12 + $0xec] ss:$16 sps:$4 sm:$0xff]  }
 0xec8   : > { %3790 = vmatpush1.bf16.msra.mxu0 %v6639_v13  ;;  %3831 = vmatpush1.bf16.msra.mxu1 %v6642_v58  ;;  %v4812_v13 = vld [vmem:[#allocation12 + $0xe0] ss:$16 sps:$4 sm:$0xff]   ;;  %v4813_v58 = vld [vmem:[#allocation12 + $0xe8] ss:$16 sps:$4 sm:$0xff]  }
 0xec9   : > { %3791 = vmatprep.subr.bf16.mxu0 %v6645_v49  ;;  %3832 = vmatprep.subr.bf16.mxu1 %v6648_v51  ;;  %v6956_v49 = vld [vmem:[#allocation37_spill] sm:$0xff] }
 0xeca   : > { %v2818_v51 = vadd.f32 %v6400_v20, %v6956_v49 }
 0xecc   : > { %3792 = vmatpush1.bf16.msra.mxu0 %v6651_v9  ;;  %3833 = vmatpush1.bf16.msra.mxu1 %v6654_v18  ;;  %v6957_v9 = vld [vmem:[#allocation38_spill] sm:$0xff] }
 0xecd   : > { %3793 = vmatprep.subr.bf16.mxu0 %v6657_v22  ;;  %3834 = vmatprep.subr.bf16.mxu1 %v6660_v31  ;;  %v2820_v18 = vadd.f32 %v6404_v25, %v6957_v9  ;;  %v6958_v22 = vld [vmem:[#allocation39_spill] sm:$0xff] }
 0xece   : > { %v2819_v31 = vadd.f32 %v6412_v43, %v6958_v22 }
 0xed0   : > { %3794 = vmatpush1.bf16.msra.mxu0 %v6663_v16  ;;  %3835 = vmatpush1.bf16.msra.mxu1 %v6666_v21  ;;  %v6959_v16 = vld [vmem:[#allocation41_spill] sm:$0xff] }
 0xed1   : > { %3795 = vmatprep.subr.bf16.mxu0 %v4802_v15  ;;  %3836 = vmatprep.subr.bf16.mxu1 %v4803_v8  ;;  %v2821_v21 = vadd.f32 %v6416_v57, %v6959_v16  ;;  %v6960_v15 = vld [vmem:[#allocation42_spill] sm:$0xff] }
 0xed2   : > { %v2822_v8 = vadd.f32 %v6400_v20, %v6960_v15 }
 0xed4   : > { %3796 = vmatpush1.bf16.msra.mxu0 %v4804_v52  ;;  %3837 = vmatpush1.bf16.msra.mxu1 %v4805_v4  ;;  %v6961_v52 = vld [vmem:[#allocation45_spill] sm:$0xff] }
 0xed5   : > { %3797 = vmatprep.subr.bf16.mxu0 %v4806_v28  ;;  %3838 = vmatprep.subr.bf16.mxu1 %v4807_v0  ;;  %v2824_v4 = vadd.f32 %v6404_v25, %v6961_v52  ;;  %v6962_v28 = vld [vmem:[#allocation46_spill] sm:$0xff] }
 0xed6   : > { %v2823_v0 = vadd.f32 %v6412_v43, %v6962_v28 }
 0xed8   : > { %3798 = vmatpush1.bf16.msra.mxu0 %v4808_v10  ;;  %3839 = vmatpush1.bf16.msra.mxu1 %v4809_v17  ;;  %v6963_v10 = vld [vmem:[#allocation43_spill] sm:$0xff] }
 0xed9   : > { %3799 = vmatprep.subr.bf16.mxu0 %v4810_v34  ;;  %3840 = vmatprep.subr.bf16.mxu1 %v4811_v63  ;;  %v2825_v17 = vadd.f32 %v6416_v57, %v6963_v10 }
 0xedc   : > { %3800 = vmatpush1.bf16.msra.mxu0 %v4812_v13  ;;  %3841 = vmatpush1.bf16.msra.mxu1 %v4813_v58 }
 0xedd   : > { %4294 = vmatprep.subr.bf16.mxu0 %v5079_v56 }
 0xf92   : > { %v3710_v1 = vpop.f32.mrb[88].mxu0  ;;  %v3751_v37 = vpop.f32.mrb[88].mxu1 }
 0xf93   : > { %v3758_v44 = vadd.f32 %v3710_v1, %v2818_v51  ;;  %v3760_v2 = vadd.f32 %v3751_v37, %v2820_v18  ;;  %v3712_v53 = vpop.f32.mrb[89].mxu0  ;;  %v3753_v6 = vpop.f32.mrb[89].mxu1 }
 0xf94   : > { %v3759_v59 = vadd.f32 %v3712_v53, %v2819_v31  ;;  %v3761_v55 = vadd.f32 %v3753_v6, %v2821_v21  ;;  %v3714_v3 = vpop.f32.mrb[90].mxu0  ;;  %v3755_v33 = vpop.f32.mrb[90].mxu1 }
 0xf95   : > { %v3762_v62 = vmul.f32 0.5, %v3758_v44  ;;  %v3715_v24 = vpop.f32.mrb[91].mxu0  ;;  %v3756_v30 = vpop.f32.mrb[91].mxu1  ;;  %v3764_v46 = vmul.f32 0.5, %v3760_v2 }
 0xf96   : > { %v3763_v48 = vmul.f32 0.5, %v3759_v59 }
 0xf97   : > { %4730 = vtanh.f32 %v3762_v62 }
 0xf98   : > { %4732 = vtanh.f32 %v3763_v48 }
 0xf99   : > { %4734 = vtanh.f32 %v3761_v55 }
 0xf9a   : > { %4736 = vtanh.f32 %v3764_v46 }
 0xfa1   : > { %v4731_v23 = vpop.eup %4730 }
 0xfa2   : > { %v3768_v50 = vadd.f32 1.0, %v4731_v23  ;;  %v4733_v27 = vpop.eup %4732  ;;  %v4271_v23 = vld [vmem:[%s6794_s8] ss:$0 sm:$0xff] }
 0xfa3   : > { %v3769_v26 = vadd.f32 1.0, %v4733_v27  ;;  %v4735_v12 = vpop.eup %4734 }
 0xfa4   : > { %v3771_v11 = vmul.f32 0.5, %v3768_v50  ;;  %v4737_v41 = vpop.eup %4736 }
 0xfa5   : > { %v3772_v14 = vmul.f32 0.5, %v3769_v26  ;;  %v3770_v42 = vadd.f32 1.0, %v4737_v41 }
 0xfa6   : > { %v3776_v40 = vmul.f32 %v4735_v12, %v3771_v11 }
 0xfa7   : > { %v3775_v61 = vmul.f32 %v3772_v14, %v6690_v54  ;;  %v3773_v19 = vmul.f32 0.5, %v3770_v42  ;;  %v4584_v54 = vld [vmem:[#allocation13 + $0x10] sm:$0xff]  }
 0xfa9   : > { %v6722_v35 = vadd.f32 %v3776_v40, %v3775_v61 }
 0xfab   : > { %4738 = vtanh.f32 %v6722_v35 }
 0xfb5   : > { %v4739_v32 = vpop.eup %4738 }
 0xfb6   : > { %v3779_v5 = vmul.f32 %v4739_v32, %v3773_v19 }
 0xfb8   : > { %v3784_v29 = vpack.c.bf16 %v3779_v5, %v3779_v5 }
 0xfba   : > { %3818 = vmatmul.mubr.bf16.vlgmr.msra.gmra.mrb[92].mxu0 %v3784_v29  ;;  %3859 = vmatmul.mubr.bf16.vlgmr.msra.gmra.mrb[92].mxu1 %v3784_v29 }
 0xfbb   : > { %4295 = vmatpush3.bf16.msra.mxu0 %v4582_v36  ;;  %4310 = vmatprep.mubr.msk.bf16.mxu0 %vm5080_vm2, %v5079_v56 }
 0xfbc   : > { %4296 = vmatprep.subr.bf16.mxu0 %v5079_v56 }
 0xfbf   : > { %4297 = vmatpush3.bf16.msra.mxu0 %v4583_v45 }
 0xfc0   : > { %4298 = vmatprep.subr.bf16.mxu0 %v5079_v56 }
 0xfc3   : > { %4299 = vmatpush3.bf16.msra.mxu0 %v4584_v54 }
 0xfc4   : > { %4300 = vmatprep.subr.bf16.mxu0 %v5079_v56 }
 0xfc7   : > { %4301 = vmatpush3.bf16.msra.mxu0 %v4585_v7 }
 0xfc8   : > { %4302 = vmatprep.subr.bf16.mxu0 %v5079_v56 }
 0xfcb   : > { %4303 = vmatpush3.bf16.msra.mxu0 %v4586_v38 }
 0xfcc   : > { %4304 = vmatprep.subr.bf16.mxu0 %v5079_v56 }
 0xfcf   : > { %4305 = vmatpush3.bf16.msra.mxu0 %v4587_v60 }
 0xfd0   : > { %4306 = vmatprep.subr.bf16.mxu0 %v5079_v56 }
 0xfd3   : > { %4307 = vmatpush3.bf16.msra.mxu0 %v4588_v47 }
 0xfd4   : > { %4308 = vmatprep.subr.bf16.mxu0 %v5079_v56 }
 0xfd7   : > { %4309 = vmatpush3.bf16.msra.mxu0 %v4589_v39 }
0x108d   : > { %v3819_v34 = vpop.f32.mrb[92].mxu0  ;;  %v3860_v63 = vpop.f32.mrb[92].mxu1 }
0x108e   : > { %v3867_v13 = vadd.f32 %v3819_v34, %v2822_v8  ;;  %v3869_v58 = vadd.f32 %v3860_v63, %v2824_v4  ;;  %v3821_v49 = vpop.f32.mrb[93].mxu0  ;;  %v3862_v51 = vpop.f32.mrb[93].mxu1 }
0x108f   : > { %v3868_v9 = vadd.f32 %v3821_v49, %v2823_v0  ;;  %v3870_v18 = vadd.f32 %v3862_v51, %v2825_v17  ;;  %v3823_v22 = vpop.f32.mrb[94].mxu0  ;;  %v3864_v31 = vpop.f32.mrb[94].mxu1 }
0x1090   : > { %v3871_v20 = vmul.f32 0.5, %v3867_v13  ;;  %v3824_v16 = vpop.f32.mrb[95].mxu0  ;;  %v3865_v21 = vpop.f32.mrb[95].mxu1  ;;  %v3873_v43 = vmul.f32 0.5, %v3869_v58 }
0x1091   : > { %v3872_v25 = vmul.f32 0.5, %v3868_v9 }
0x1092   : > { %4740 = vtanh.f32 %v3871_v20 }
0x1093   : > { %4742 = vtanh.f32 %v3872_v25 }
0x1094   : > { %4744 = vtanh.f32 %v3870_v18 }
0x1095   : > { %4746 = vtanh.f32 %v3873_v43 }
0x109c   : > { %v4741_v1 = vpop.eup %4740 }
0x109d   : > { %v3877_v57 = vadd.f32 1.0, %v4741_v1  ;;  %v4743_v37 = vpop.eup %4742 }
0x109e   : > { %v3878_v2 = vadd.f32 1.0, %v4743_v37  ;;  %v4745_v53 = vpop.eup %4744 }
0x109f   : > { %v3880_v44 = vmul.f32 0.5, %v3877_v57  ;;  %v4747_v33 = vpop.eup %4746 }
0x10a0   : > { %v3881_v6 = vmul.f32 0.5, %v3878_v2  ;;  %v3879_v62 = vadd.f32 1.0, %v4747_v33 }
0x10a1   : > { %v3885_v59 = vmul.f32 %v4745_v53, %v3880_v44 }
0x10a2   : > { %v3884_v55 = vmul.f32 %v3881_v6, %v6722_v35  ;;  %v3882_v24 = vmul.f32 0.5, %v3879_v62 }
0x10a4   : > { %v3886_v3 = vadd.f32 %v3885_v59, %v3884_v55 }
0x10a6   : > { %4748 = vtanh.f32 %v3886_v3 }
0x10b0   : > { %v4749_v30 = vpop.eup %4748 }
0x10b1   : > { %v3888_v48 = vmul.f32 %v4749_v30, %v3882_v24 }
0x10b3   : > { %v3889_v46 = vpack.c.bf16 %v3888_v48, %v3888_v48 }
0x10b5   : > { %4311 = vmatmul.mubr.bf16.vlgmr.msra.gmra.mrb[96].mxu0 %v3889_v46 }
0x1188   : > { %v3995_v50 = vpop.f32.mrb[96].mxu0 }
0x1189   : > { %v3996_v27 = vadd.f32 %v4271_v23, %v3995_v50  ;;  %v4312_v11 = vpop.f32.mrb[97].mxu0 }
0x118a   : > { %v3998_v26 = vpop.f32.mrb[98].mxu0 }
0x118b   : > { %4001 = vst [vmem:[%s423_s9] sm:$0xff] %v3996_v27  ;;  %v4313_v12 = vpop.f32.mrb[99].mxu0 }
0x118c   : > { %4997 = shalt.err (!%p4994_p8)
}
0x118d   : > { %s4998_s18 = scalar_lea.hbm %s6742_s16, 128  ;;  %s5002_s29 = scalar_lea.hbm %s6964_s27, 256 }
0x118e   : > { %p4999_p6 = scmp.ne.s32.totalorder %s6742_s16, %s4998_s18  ;;  %p5003_p3 = scmp.lt.u32.totalorder %s6742_s16, %s6964_s27 }
0x118f   : > { %p5004_p5 = scmp.lt.u32.totalorder %s5002_s29, %s4998_s18  ;;  %p5006_p7 = scmp.lt.u32.totalorder %s4998_s18, %s6742_s16 }
0x1190   : > { %p5000_p10 = pnand %p4999_p6, %p6965_p4 }
0x1191   : > { %p5005_p9 = por %p5004_p5, %p5003_p3 }
0x1192   : > { %p5001_p11 = pneg %p5000_p10 }
0x1193   : > { %p5007_p12 = por %p5006_p7, %p5005_p9 }
0x1195   : > { %p5008_p1 = pnand %p5007_p12, %p5001_p11 }
0x1197   : > { %5011 = shalt.err (!%p5008_p1)
}
0x1198   : > { %4336 = dma.vmem_to_hbm [thread:$0]  (%p6965_p4), %s6744_s13, 128, %s6742_s16, %s4003_s19  }
0x1199 PF: > { %s4028_s26 = sand.u32 1, %s5050_s30   ;;  %p6966_p13 = scmp.ne.s32.totalorder %s6839_s28, 0 }
0x119a   : > { %p6967_p0 = scmp.ge.s32.totalorder %s5062_s12, 2  ;;  %s4029_s15 = scalar_lea.sflag [#allocation6], %s4028_s26 }
0x119c   : > { %p4359_p2 = pnand %p6967_p0, %p6966_p13 }
0x119e   : > { %5045 = dma.done.wait (!%p4359_p2), %s4029_s15, 128  }
0x119f   : > { %5047 = vsyncadd (!%p4359_p2), %s4029_s15, 4294967168  ;;  %p25_p8 = scmp.ge.s32.totalorder %s5302_s1, 4   ;;  %s6968_s30 = smov %s5054_s10 }
0x11a0   : > { %s6969_s10 = smov %s5058_s11  ;;  %s6970_s11 = smov %s5314_s24 }
0x11a1   : > { %s6971_s12 = smov %s5302_s1  ;;  %27 = sbr.rel (!%p25_p8) target bundleno = 11 (0xb), region = 135 }
0x11a8   :  { %4034 = vsyncpa [#allocation5], 1 }
0x11a9   :  { %4036 = vsyncpa [#allocation5 + $0x1], 1 }
0x11aa   :  { %4037 = vsyncpa [#allocation8], 1 }
0x11ab   :  { %4038 = vsyncpa [#allocation11], 1 }
0x11ac   :  { %4039 = vsyncpa [#allocation14], 1 }
0x11ad   :  { %4040 = vsyncpa [#allocation6], 1 }
0x11ae   :  { %4042 = vsyncpa [#allocation6 + $0x1], 1 }

</bundles_post_ra>
